<compile_context>
chip_gen: v7x
topology: tpu7x:2x2x1
jax: 0.10.0
libtpu: 0.0.40
codegen_flags: <defaults>
</compile_context>

<pallas_src>
import numpy as np
import jax
import jax.numpy as jnp
from jax import lax
from jax.experimental import pallas as pl
from jax.experimental.pallas import tpu as pltpu


_LEAKY = 0.2
_TAPS_PER_STEP = 3          # 9 taps of the 3x3 conv, 3 taps per grid step


def _dequant_bf16(w_i8):
    """int8 -> bf16 via i32/f32 (each hop is a basic, well-supported convert)."""
    return w_i8.astype(jnp.int32).astype(jnp.float32).astype(jnp.bfloat16)


# ------------------------------ Pallas kernel ------------------------------

def _fused_kernel(x_ref, selg_ref, w0q_ref, scale_ref, y_ref, sele_ref,
                  w1r_ref, w2_ref, o_ref, acc_ref):
    """Fully fused D_GET_LOGITS forward (batch 1, 4x4 spatial).

    x_ref    : (16, 1024)      bf16  activations, rows = spatial positions
    selg_ref : (3, 16, 16)     bf16  0/1 shift-select matrices, this step's taps
    w0q_ref  : (3, 1024, 256)  int8  conv weight (tap, cin, cout), this step
    scale_ref: (1, 256)        f32   per-output-channel dequant scales
    y_ref    : (1, 256)        bf16  selected conditioning row
    sele_ref : (9, 16, 16)     f32   shift-select matrices, all taps (epilogue)
    w1r_ref  : (512, 9*C2)     bf16  joint_conv[0] weight, (cin, tap*C2 + cout)
    w2_ref   : (16, C2)        bf16  joint_conv[2] 4x4 weight, spatial-major
    o_ref    : (1, 1)          f32   logit
    acc_ref  : (16, 256)       f32   GEMM1 accumulator (VMEM scratch)
    """
    k = pl.program_id(0)

    @pl.when(k == 0)
    def _init():
        acc_ref[...] = jnp.zeros_like(acc_ref)

    # GEMM1 with fused im2col: this step's 3 taps of the 1024->256 3x3 conv.
    x = x_ref[...]                                            # (16, 1024) bf16
    for t in range(_TAPS_PER_STEP):                           # static unroll
        # 0/1 selection matrix -> exact gather; the bf16 cast is lossless.
        a_t = jnp.dot(selg_ref[t], x,
                      preferred_element_type=jnp.float32).astype(jnp.bfloat16)
        acc_ref[...] += jnp.dot(a_t, _dequant_bf16(w0q_ref[t]),
                                preferred_element_type=jnp.float32)

    @pl.when(k == pl.num_programs(0) - 1)
    def _epilogue():
        npos = acc_ref.shape[0]                               # 16 = 4x4 spatial
        c2 = w2_ref.shape[1]
        # Fold the per-channel int8 scales in here (single broadcast multiply).
        conv1 = (acc_ref[...] * scale_ref[...]).astype(jnp.bfloat16)   # (16, 256)
        y_b = jnp.broadcast_to(y_ref[...], (npos, y_ref.shape[1]))
        h = jnp.concatenate([conv1, y_b], axis=1)             # (16, 512) bf16

        # joint_conv[0] (3x3, pad 1, on the 4x4 grid): one lane-dense matmul
        # producing per-input-position, per-tap partials, then 9 tiny 0/1
        # tap-select matmuls accumulate them onto output positions.  Everything
        # stays in VMEM / vregs; accumulation is f32.
        p = jnp.dot(h, w1r_ref[...],
                    preferred_element_type=jnp.float32)       # (16, 9*C2) f32
        acc2 = jnp.zeros((npos, c2), jnp.float32)
        for t in range(sele_ref.shape[0]):                    # 9 taps, unrolled
            acc2 = acc2 + jnp.dot(sele_ref[t], p[:, t * c2:(t + 1) * c2],
                                  preferred_element_type=jnp.float32)

        act = jnp.where(acc2 >= 0.0, acc2, _LEAKY * acc2)     # LeakyReLU(0.2)

        # joint_conv[2]: Conv2d(C2, 1, 4, 4) valid == full dot product.
        o_ref[...] = jnp.sum(act * w2_ref[...].astype(jnp.float32),
                             keepdims=True)


def _fused_forward(xs, sel_g, w0q, scale, y_row, sel_e, w1r, w2m):
    npos, cin = xs.shape                    # (16, 1024)
    ntaps, _, cout = w0q.shape              # (9, 1024, 256)
    c2 = w2m.shape[1]
    assert ntaps % _TAPS_PER_STEP == 0
    grid = (ntaps // _TAPS_PER_STEP,)

    flops = 2 * npos * ntaps * cin * cout + 2 * npos * (2 * cout) * ntaps * c2
    bytes_accessed = (w0q.size + 2 * w1r.size + 2 * xs.size
                      + 4 * scale.size + 2 * y_row.size + 4)

    return pl.pallas_call(
        _fused_kernel,
        out_shape=jax.ShapeDtypeStruct((1, 1), jnp.float32),
        grid_spec=pltpu.PrefetchScalarGridSpec(
            num_scalar_prefetch=0,
            grid=grid,
            in_specs=[
                pl.BlockSpec((npos, cin), lambda k: (0, 0)),             # X (resident)
                pl.BlockSpec((_TAPS_PER_STEP, npos, npos),
                             lambda k: (k, 0, 0)),                       # GEMM1 tap selects
                pl.BlockSpec((_TAPS_PER_STEP, cin, cout),
                             lambda k: (k, 0, 0)),                       # int8 W0 tile
                pl.BlockSpec((1, cout), lambda k: (0, 0)),               # dequant scales
                pl.BlockSpec((1, cout), lambda k: (0, 0)),               # y row
                pl.BlockSpec((ntaps, npos, npos), lambda k: (0, 0, 0)),  # epilogue selects
                pl.BlockSpec(w1r.shape, lambda k: (0, 0)),               # joint_conv[0] W
                pl.BlockSpec(w2m.shape, lambda k: (0, 0)),               # joint_conv[2] W
            ],
            out_specs=pl.BlockSpec((1, 1), lambda k: (0, 0)),
            scratch_shapes=[pltpu.VMEM((npos, cout), jnp.float32)],
        ),
        compiler_params=pltpu.CompilerParams(
            dimension_semantics=("arbitrary",),
            vmem_limit_bytes=32 * 1024 * 1024,
        ),
        cost_estimate=pl.CostEstimate(flops=int(flops), transcendentals=0,
                                      bytes_accessed=int(bytes_accessed)),
    )(xs, sel_g, w0q, scale, y_row, sel_e, w1r, w2m)


# ------------------------------- JAX glue ----------------------------------

def _shift_select_matrices(h, w):
    """(9, h*w, h*w) 0/1 matrices: S[t] @ x gathers, for every output spatial
    position, the input row feeding kernel tap t of a 3x3 pad-1 conv
    (an all-zero row == zero padding)."""
    s = np.zeros((9, h * w, h * w), np.float32)
    for ki in range(3):
        for kj in range(3):
            t = ki * 3 + kj
            for oy in range(h):
                for ox in range(w):
                    iy, ix = oy + ki - 1, ox + kj - 1
                    if 0 <= iy < h and 0 <= ix < w:
                        s[t, oy * w + ox, iy * w + ix] = 1.0
    return s


@jax.jit
def _forward(w0q, scale, w1r, w2m, sel_g, sel_e, x, y, select_key):
    # TODO(synk): torch.randperm draws from PyTorch's global RNG; we use a
    # deterministic jax.random permutation with an explicit key instead.
    idx = jax.random.permutation(select_key, y.shape[0])[:1]
    y_row = y[idx].astype(jnp.bfloat16)                       # (1, 256)
    b, c, hh, ww = x.shape                                    # (1, 1024, 4, 4)
    xs = x.reshape(c, hh * ww).T.astype(jnp.bfloat16)         # (16, 1024), rows = positions
    logit = _fused_forward(xs, sel_g, w0q, scale, y_row, sel_e, w1r, w2m)
    return logit.reshape(1, 1, 1, 1)


class DGetLogits:
    """JAX/Pallas port of the PyTorch D_GET_LOGITS module."""

    def __init__(self, ndf, key):
        self.df_dim = ndf
        k1, k2, k3 = jax.random.split(key, 3)
        # f32 "PyTorch-layout" parameters.
        self.w_conv = 0.02 * jax.random.normal(k1, (256, 1024, 3, 3), jnp.float32)
        self.w_j1 = 0.02 * jax.random.normal(k2, (ndf * 2, 512, 3, 3), jnp.float32)
        self.w_j2 = 0.02 * jax.random.normal(k3, (1, ndf * 2, 4, 4), jnp.float32)

        # ---- conv (1024->256, 3x3): tap-major, int8 per-out-channel quant ----
        w0 = self.w_conv.transpose(2, 3, 1, 0).reshape(9, 1024, 256)    # [tap, cin, cout]
        amax = jnp.maximum(jnp.max(jnp.abs(w0), axis=(0, 1), keepdims=True), 1e-12)
        scale = amax / 127.0                                            # (1, 1, 256)
        self.w0_q = jnp.clip(jnp.round(w0 / scale), -127, 127).astype(jnp.int8)
        self.w0_scale = scale.reshape(1, 256).astype(jnp.float32)
        # De-quantized copy (exactly what the kernel applies) for reference().
        self.w0_deq = (self.w0_q.astype(jnp.float32) * scale
                       ).reshape(3, 3, 1024, 256).transpose(3, 2, 0, 1)  # OIHW

        # ---- joint_conv[0] (512 -> ndf*2, 3x3): one lane-dense (512, 9*C2) ----
        #   w1r[cin, tap*C2 + cout] = w_j1[cout, cin, ki, kj],  tap = ki*3+kj
        self.w1r = (self.w_j1.transpose(1, 2, 3, 0)           # (512, 3, 3, C2)
                    .reshape(512, 9 * ndf * 2).astype(jnp.bfloat16))
        # ---- joint_conv[2] (ndf*2 -> 1, 4x4 valid): spatial-major (16, C2) ----
        self.w2m = (self.w_j2[0].transpose(1, 2, 0)
                    .reshape(16, ndf * 2).astype(jnp.bfloat16))

        sel = _shift_select_matrices(4, 4)
        self.sel_g = jnp.asarray(sel, jnp.bfloat16)   # GEMM1 tap selects (tiled per step)
        self.sel_e = jnp.asarray(sel, jnp.float32)    # epilogue tap selects (resident)

    def __call__(self, out, y, select_key):
        return _forward(self.w0_q, self.w0_scale, self.w1r, self.w2m,
                        self.sel_g, self.sel_e, out, y, select_key)

    def reference(self, out, y, select_key):
        """Plain-JAX NCHW reference with operands quantized at the same points
        as the kernel (bf16 activations, int8-dequantized first-conv weight)."""
        q = lambda t: t.astype(jnp.bfloat16).astype(jnp.float32)
        dn = ("NCHW", "OIHW", "NCHW")
        prec = lax.Precision.HIGHEST
        h1 = lax.conv_general_dilated(q(out), self.w0_deq, (1, 1),
                                      [(1, 1), (1, 1)], dimension_numbers=dn,
                                      precision=prec)
        idx = jax.random.permutation(select_key, y.shape[0])[:1]
        y_sel = jnp.tile(y[idx].reshape(-1, 256, 1, 1), (1, 1, 4, 4))
        h = jnp.concatenate([h1, y_sel], axis=1)
        h2 = lax.conv_general_dilated(q(h), q(self.w_j1), (1, 1),
                                      [(1, 1), (1, 1)], dimension_numbers=dn,
                                      precision=prec)
        h2 = jnp.where(h2 >= 0.0, h2, _LEAKY * h2)
        return lax.conv_general_dilated(h2, q(self.w_j2), (1, 1),
                                        [(0, 0), (0, 0)], dimension_numbers=dn,
                                        precision=prec)


if __name__ == "__main__":
    ndf = 32
    key = jax.random.PRNGKey(0)
    k_params, k_out, k_y, k_sel = jax.random.split(key, 4)

    model = DGetLogits(ndf, k_params)

    # `out` must be (1, 1024, 4, 4): joint_conv's 4x4 valid conv and the
    # batch-1 concat with the randomly selected y row imply this shape.
    x_out = jax.random.normal(k_out, (1, 1024, 4, 4), jnp.float32)
    y = jax.random.normal(k_y, (5, 256), jnp.float32)

    logits = model(x_out, y, k_sel)
    jax.block_until_ready(logits)
    assert logits.shape == (1, 1, 1, 1), logits.shape

    # Correctness smoke test vs. a plain-JAX NCHW conv pipeline.
    ref = model.reference(x_out, y, k_sel)
    np.testing.assert_allclose(np.asarray(logits), np.asarray(ref),
                               rtol=5e-2, atol=2e-2)
    print("KERNEL_OK")
</pallas_src>

<mosaic_0001>
module attributes {stable_mosaic.version = 11 : i64} {
  func.func @_fused_kernel(%arg0: i32, %arg1: memref<16x1024xbf16, #tpu.memory_space<vmem>>, %arg2: memref<3x16x16xbf16, #tpu.memory_space<vmem>>, %arg3: memref<3x1024x256xi8, #tpu.memory_space<vmem>>, %arg4: memref<1x256xf32, #tpu.memory_space<vmem>>, %arg5: memref<1x256xbf16, #tpu.memory_space<vmem>>, %arg6: memref<9x16x16xf32, #tpu.memory_space<vmem>>, %arg7: memref<512x576xbf16, #tpu.memory_space<vmem>>, %arg8: memref<16x64xbf16, #tpu.memory_space<vmem>>, %arg9: memref<1x1xf32, #tpu.memory_space<vmem>>, %arg10: memref<16x256xf32, #tpu.memory_space<vmem>>) attributes {dimension_semantics = [#tpu.dimension_semantics<arbitrary>], iteration_bounds = array<i64: 3>, scalar_prefetch = 0 : i64, scratch_operands = 1 : i64, tpu.core_type = #tpu.core_type<tc>, window_params = [{pipeline_mode = #tpu.pipeline_mode<synchronous>, transform_indices = @transform_0, window_bounds = array<i64: 16, 1024>}, {transform_indices = @transform_1, window_bounds = array<i64: 3, 16, 16>}, {transform_indices = @transform_2, window_bounds = array<i64: 3, 1024, 256>}, {pipeline_mode = #tpu.pipeline_mode<synchronous>, transform_indices = @transform_3, window_bounds = array<i64: 1, 256>}, {pipeline_mode = #tpu.pipeline_mode<synchronous>, transform_indices = @transform_4, window_bounds = array<i64: 1, 256>}, {pipeline_mode = #tpu.pipeline_mode<synchronous>, transform_indices = @transform_5, window_bounds = array<i64: 9, 16, 16>}, {pipeline_mode = #tpu.pipeline_mode<synchronous>, transform_indices = @transform_6, window_bounds = array<i64: 512, 576>}, {pipeline_mode = #tpu.pipeline_mode<synchronous>, transform_indices = @transform_7, window_bounds = array<i64: 16, 64>}, {pipeline_mode = #tpu.pipeline_mode<synchronous>, transform_indices = @transform_8, window_bounds = array<i64: 1, 1>}]} {
    %c0_i32 = arith.constant 0 : i32
    %0 = arith.cmpi eq, %arg0, %c0_i32 : i32
    %1 = arith.extui %0 : i1 to i32
    %c0_i32_0 = arith.constant 0 : i32
    %2 = arith.cmpi ne, %1, %c0_i32_0 : i32
    scf.if %2 {
      %cst_36 = arith.constant 0.000000e+00 : f32
      %46 = vector.broadcast %cst_36 : f32 to vector<16x256xf32>
      %c0_37 = arith.constant 0 : index
      %c0_38 = arith.constant 0 : index
      %47 = vector.load %arg10[%c0_37, %c0_38] : memref<16x256xf32, #tpu.memory_space<vmem>>, vector<16x256xf32>
      tpu.vector_store %arg10[%c0_37, %c0_38], %46 {strides = array<i32>} : memref<16x256xf32, #tpu.memory_space<vmem>>, vector<16x256xf32>,
    } else {
    }
    %c0 = arith.constant 0 : index
    %c0_1 = arith.constant 0 : index
    %3 = vector.load %arg1[%c0, %c0_1] : memref<16x1024xbf16, #tpu.memory_space<vmem>>, vector<16x1024xbf16>
    %c0_2 = arith.constant 0 : index
    %c0_3 = arith.constant 0 : index
    %c0_4 = arith.constant 0 : index
    %4 = vector.load %arg2[%c0_2, %c0_3, %c0_4] : memref<3x16x16xbf16, #tpu.memory_space<vmem>>, vector<1x16x16xbf16>
    %5 = vector.shape_cast %4 : vector<1x16x16xbf16> to vector<16x16xbf16>
    %cst = arith.constant dense<0.000000e+00> : vector<16x1024xf32>
    %6 = tpu.matmul %5, %3, %cst {dimension_numbers = #tpu.dot_dimension_numbers<[1], [0], [0], [1], [0, 0, 1, 1], [], []>} : vector<16x16xbf16>, vector<16x1024xbf16>, vector<16x1024xf32> -> vector<16x1024xf32>
    %7 = arith.truncf %6 : vector<16x1024xf32> to vector<16x1024xbf16>
    %c0_5 = arith.constant 0 : index
    %c0_6 = arith.constant 0 : index
    %8 = vector.load %arg10[%c0_5, %c0_6] : memref<16x256xf32, #tpu.memory_space<vmem>>, vector<16x256xf32>
    %c0_7 = arith.constant 0 : index
    %c0_8 = arith.constant 0 : index
    %c0_9 = arith.constant 0 : index
    %9 = vector.load %arg3[%c0_7, %c0_8, %c0_9] : memref<3x1024x256xi8, #tpu.memory_space<vmem>>, vector<1x1024x256xi8>
    %10 = vector.shape_cast %9 : vector<1x1024x256xi8> to vector<1024x256xi8>
    %11 = arith.extsi %10 : vector<1024x256xi8> to vector<1024x256xi32>
    %12 = arith.sitofp %11 : vector<1024x256xi32> to vector<1024x256xf32>
    %13 = arith.truncf %12 : vector<1024x256xf32> to vector<1024x256xbf16>
    %cst_10 = arith.constant dense<0.000000e+00> : vector<16x256xf32>
    %14 = tpu.matmul %7, %13, %cst_10 {dimension_numbers = #tpu.dot_dimension_numbers<[1], [0], [0], [1], [0, 0, 1, 1], [], []>} : vector<16x1024xbf16>, vector<1024x256xbf16>, vector<16x256xf32> -> vector<16x256xf32>
    %15 = arith.addf %8, %14 : vector<16x256xf32>
    %c0_11 = arith.constant 0 : index
    %c0_12 = arith.constant 0 : index
    %16 = vector.load %arg10[%c0_11, %c0_12] : memref<16x256xf32, #tpu.memory_space<vmem>>, vector<16x256xf32>
    tpu.vector_store %arg10[%c0_11, %c0_12], %15 {strides = array<i32>} : memref<16x256xf32, #tpu.memory_space<vmem>>, vector<16x256xf32>,
    %c1 = arith.constant 1 : index
    %c0_13 = arith.constant 0 : index
    %c0_14 = arith.constant 0 : index
    %17 = vector.load %arg2[%c1, %c0_13, %c0_14] : memref<3x16x16xbf16, #tpu.memory_space<vmem>>, vector<1x16x16xbf16>
    %18 = vector.shape_cast %17 : vector<1x16x16xbf16> to vector<16x16xbf16>
    %cst_15 = arith.constant dense<0.000000e+00> : vector<16x1024xf32>
    %19 = tpu.matmul %18, %3, %cst_15 {dimension_numbers = #tpu.dot_dimension_numbers<[1], [0], [0], [1], [0, 0, 1, 1], [], []>} : vector<16x16xbf16>, vector<16x1024xbf16>, vector<16x1024xf32> -> vector<16x1024xf32>
    %20 = arith.truncf %19 : vector<16x1024xf32> to vector<16x1024xbf16>
    %c0_16 = arith.constant 0 : index
    %c0_17 = arith.constant 0 : index
    %21 = vector.load %arg10[%c0_16, %c0_17] : memref<16x256xf32, #tpu.memory_space<vmem>>, vector<16x256xf32>
    %c1_18 = arith.constant 1 : index
    %c0_19 = arith.constant 0 : index
    %c0_20 = arith.constant 0 : index
    %22 = vector.load %arg3[%c1_18, %c0_19, %c0_20] : memref<3x1024x256xi8, #tpu.memory_space<vmem>>, vector<1x1024x256xi8>
    %23 = vector.shape_cast %22 : vector<1x1024x256xi8> to vector<1024x256xi8>
    %24 = arith.extsi %23 : vector<1024x256xi8> to vector<1024x256xi32>
    %25 = arith.sitofp %24 : vector<1024x256xi32> to vector<1024x256xf32>
    %26 = arith.truncf %25 : vector<1024x256xf32> to vector<1024x256xbf16>
    %cst_21 = arith.constant dense<0.000000e+00> : vector<16x256xf32>
    %27 = tpu.matmul %20, %26, %cst_21 {dimension_numbers = #tpu.dot_dimension_numbers<[1], [0], [0], [1], [0, 0, 1, 1], [], []>} : vector<16x1024xbf16>, vector<1024x256xbf16>, vector<16x256xf32> -> vector<16x256xf32>
    %28 = arith.addf %21, %27 : vector<16x256xf32>
    %c0_22 = arith.constant 0 : index
    %c0_23 = arith.constant 0 : index
    %29 = vector.load %arg10[%c0_22, %c0_23] : memref<16x256xf32, #tpu.memory_space<vmem>>, vector<16x256xf32>
    tpu.vector_store %arg10[%c0_22, %c0_23], %28 {strides = array<i32>} : memref<16x256xf32, #tpu.memory_space<vmem>>, vector<16x256xf32>,
    %c2 = arith.constant 2 : index
    %c0_24 = arith.constant 0 : index
    %c0_25 = arith.constant 0 : index
    %30 = vector.load %arg2[%c2, %c0_24, %c0_25] : memref<3x16x16xbf16, #tpu.memory_space<vmem>>, vector<1x16x16xbf16>
    %31 = vector.shape_cast %30 : vector<1x16x16xbf16> to vector<16x16xbf16>
    %cst_26 = arith.constant dense<0.000000e+00> : vector<16x1024xf32>
    %32 = tpu.matmul %31, %3, %cst_26 {dimension_numbers = #tpu.dot_dimension_numbers<[1], [0], [0], [1], [0, 0, 1, 1], [], []>} : vector<16x16xbf16>, vector<16x1024xbf16>, vector<16x1024xf32> -> vector<16x1024xf32>
    %33 = arith.truncf %32 : vector<16x1024xf32> to vector<16x1024xbf16>
    %c0_27 = arith.constant 0 : index
    %c0_28 = arith.constant 0 : index
    %34 = vector.load %arg10[%c0_27, %c0_28] : memref<16x256xf32, #tpu.memory_space<vmem>>, vector<16x256xf32>
    %c2_29 = arith.constant 2 : index
    %c0_30 = arith.constant 0 : index
    %c0_31 = arith.constant 0 : index
    %35 = vector.load %arg3[%c2_29, %c0_30, %c0_31] : memref<3x1024x256xi8, #tpu.memory_space<vmem>>, vector<1x1024x256xi8>
    %36 = vector.shape_cast %35 : vector<1x1024x256xi8> to vector<1024x256xi8>
    %37 = arith.extsi %36 : vector<1024x256xi8> to vector<1024x256xi32>
    %38 = arith.sitofp %37 : vector<1024x256xi32> to vector<1024x256xf32>
    %39 = arith.truncf %38 : vector<1024x256xf32> to vector<1024x256xbf16>
    %cst_32 = arith.constant dense<0.000000e+00> : vector<16x256xf32>
    %40 = tpu.matmul %33, %39, %cst_32 {dimension_numbers = #tpu.dot_dimension_numbers<[1], [0], [0], [1], [0, 0, 1, 1], [], []>} : vector<16x1024xbf16>, vector<1024x256xbf16>, vector<16x256xf32> -> vector<16x256xf32>
    %41 = arith.addf %34, %40 : vector<16x256xf32>
    %c0_33 = arith.constant 0 : index
    %c0_34 = arith.constant 0 : index
    %42 = vector.load %arg10[%c0_33, %c0_34] : memref<16x256xf32, #tpu.memory_space<vmem>>, vector<16x256xf32>
    tpu.vector_store %arg10[%c0_33, %c0_34], %41 {strides = array<i32>} : memref<16x256xf32, #tpu.memory_space<vmem>>, vector<16x256xf32>,
    %c2_i32 = arith.constant 2 : i32
    %43 = arith.cmpi eq, %arg0, %c2_i32 : i32
    %44 = arith.extui %43 : i1 to i32
    %c0_i32_35 = arith.constant 0 : i32
    %45 = arith.cmpi ne, %44, %c0_i32_35 : i32
    scf.if %45 {
      %c0_36 = arith.constant 0 : index
      %c0_37 = arith.constant 0 : index
      %46 = vector.load %arg10[%c0_36, %c0_37] : memref<16x256xf32, #tpu.memory_space<vmem>>, vector<16x256xf32>
      %c0_38 = arith.constant 0 : index
      %c0_39 = arith.constant 0 : index
      %47 = vector.load %arg4[%c0_38, %c0_39] : memref<1x256xf32, #tpu.memory_space<vmem>>, vector<1x256xf32>
      %48 = vector.broadcast %47 : vector<1x256xf32> to vector<16x256xf32>
      %49 = arith.mulf %46, %48 : vector<16x256xf32>
      %50 = arith.truncf %49 : vector<16x256xf32> to vector<16x256xbf16>
      %c0_40 = arith.constant 0 : index
      %c0_41 = arith.constant 0 : index
      %51 = vector.load %arg5[%c0_40, %c0_41] : memref<1x256xbf16, #tpu.memory_space<vmem>>, vector<1x256xbf16>
      %52 = vector.shape_cast %51 : vector<1x256xbf16> to vector<1x256xbf16>
      %53 = vector.broadcast %52 : vector<1x256xbf16> to vector<16x256xbf16>
      %54 = tpu.concatenate %50, %53 in 1 : vector<16x256xbf16>, vector<16x256xbf16> -> vector<16x512xbf16>
      %c0_42 = arith.constant 0 : index
      %c0_43 = arith.constant 0 : index
      %55 = vector.load %arg7[%c0_42, %c0_43] : memref<512x576xbf16, #tpu.memory_space<vmem>>, vector<512x576xbf16>
      %cst_44 = arith.constant dense<0.000000e+00> : vector<16x576xf32>
      %56 = tpu.matmul %54, %55, %cst_44 {dimension_numbers = #tpu.dot_dimension_numbers<[1], [0], [0], [1], [0, 0, 1, 1], [], []>} : vector<16x512xbf16>, vector<512x576xbf16>, vector<16x576xf32> -> vector<16x576xf32>
      %cst_45 = arith.constant 0.000000e+00 : f32
      %57 = vector.broadcast %cst_45 : f32 to vector<16x64xf32>
      %c0_46 = arith.constant 0 : index
      %c0_47 = arith.constant 0 : index
      %c0_48 = arith.constant 0 : index
      %58 = vector.load %arg6[%c0_46, %c0_47, %c0_48] : memref<9x16x16xf32, #tpu.memory_space<vmem>>, vector<1x16x16xf32>
      %59 = vector.shape_cast %58 : vector<1x16x16xf32> to vector<16x16xf32>
      %60 = vector.extract_strided_slice %56 {offsets = [0, 0], sizes = [16, 64], strides = [1, 1]} : vector<16x576xf32> to vector<16x64xf32>
      %cst_49 = arith.constant dense<0.000000e+00> : vector<16x64xf32>
      %61 = tpu.matmul %59, %60, %cst_49 {dimension_numbers = #tpu.dot_dimension_numbers<[1], [0], [0], [1], [0, 0, 1, 1], [], []>} : vector<16x16xf32>, vector<16x64xf32>, vector<16x64xf32> -> vector<16x64xf32>
      %62 = arith.addf %57, %61 : vector<16x64xf32>
      %c1_50 = arith.constant 1 : index
      %c0_51 = arith.constant 0 : index
      %c0_52 = arith.constant 0 : index
      %63 = vector.load %arg6[%c1_50, %c0_51, %c0_52] : memref<9x16x16xf32, #tpu.memory_space<vmem>>, vector<1x16x16xf32>
      %64 = vector.shape_cast %63 : vector<1x16x16xf32> to vector<16x16xf32>
      %65 = vector.extract_strided_slice %56 {offsets = [0, 64], sizes = [16, 64], strides = [1, 1]} : vector<16x576xf32> to vector<16x64xf32>
      %cst_53 = arith.constant dense<0.000000e+00> : vector<16x64xf32>
      %66 = tpu.matmul %64, %65, %cst_53 {dimension_numbers = #tpu.dot_dimension_numbers<[1], [0], [0], [1], [0, 0, 1, 1], [], []>} : vector<16x16xf32>, vector<16x64xf32>, vector<16x64xf32> -> vector<16x64xf32>
      %67 = arith.addf %62, %66 : vector<16x64xf32>
      %c2_54 = arith.constant 2 : index
      %c0_55 = arith.constant 0 : index
      %c0_56 = arith.constant 0 : index
      %68 = vector.load %arg6[%c2_54, %c0_55, %c0_56] : memref<9x16x16xf32, #tpu.memory_space<vmem>>, vector<1x16x16xf32>
      %69 = vector.shape_cast %68 : vector<1x16x16xf32> to vector<16x16xf32>
      %70 = vector.extract_strided_slice %56 {offsets = [0, 128], sizes = [16, 64], strides = [1, 1]} : vector<16x576xf32> to vector<16x64xf32>
      %cst_57 = arith.constant dense<0.000000e+00> : vector<16x64xf32>
      %71 = tpu.matmul %69, %70, %cst_57 {dimension_numbers = #tpu.dot_dimension_numbers<[1], [0], [0], [1], [0, 0, 1, 1], [], []>} : vector<16x16xf32>, vector<16x64xf32>, vector<16x64xf32> -> vector<16x64xf32>
      %72 = arith.addf %67, %71 : vector<16x64xf32>
      %c3 = arith.constant 3 : index
      %c0_58 = arith.constant 0 : index
      %c0_59 = arith.constant 0 : index
      %73 = vector.load %arg6[%c3, %c0_58, %c0_59] : memref<9x16x16xf32, #tpu.memory_space<vmem>>, vector<1x16x16xf32>
      %74 = vector.shape_cast %73 : vector<1x16x16xf32> to vector<16x16xf32>
      %75 = vector.extract_strided_slice %56 {offsets = [0, 192], sizes = [16, 64], strides = [1, 1]} : vector<16x576xf32> to vector<16x64xf32>
      %cst_60 = arith.constant dense<0.000000e+00> : vector<16x64xf32>
      %76 = tpu.matmul %74, %75, %cst_60 {dimension_numbers = #tpu.dot_dimension_numbers<[1], [0], [0], [1], [0, 0, 1, 1], [], []>} : vector<16x16xf32>, vector<16x64xf32>, vector<16x64xf32> -> vector<16x64xf32>
      %77 = arith.addf %72, %76 : vector<16x64xf32>
      %c4 = arith.constant 4 : index
      %c0_61 = arith.constant 0 : index
      %c0_62 = arith.constant 0 : index
      %78 = vector.load %arg6[%c4, %c0_61, %c0_62] : memref<9x16x16xf32, #tpu.memory_space<vmem>>, vector<1x16x16xf32>
      %79 = vector.shape_cast %78 : vector<1x16x16xf32> to vector<16x16xf32>
      %80 = vector.extract_strided_slice %56 {offsets = [0, 256], sizes = [16, 64], strides = [1, 1]} : vector<16x576xf32> to vector<16x64xf32>
      %cst_63 = arith.constant dense<0.000000e+00> : vector<16x64xf32>
      %81 = tpu.matmul %79, %80, %cst_63 {dimension_numbers = #tpu.dot_dimension_numbers<[1], [0], [0], [1], [0, 0, 1, 1], [], []>} : vector<16x16xf32>, vector<16x64xf32>, vector<16x64xf32> -> vector<16x64xf32>
      %82 = arith.addf %77, %81 : vector<16x64xf32>
      %c5 = arith.constant 5 : index
      %c0_64 = arith.constant 0 : index
      %c0_65 = arith.constant 0 : index
      %83 = vector.load %arg6[%c5, %c0_64, %c0_65] : memref<9x16x16xf32, #tpu.memory_space<vmem>>, vector<1x16x16xf32>
      %84 = vector.shape_cast %83 : vector<1x16x16xf32> to vector<16x16xf32>
      %85 = vector.extract_strided_slice %56 {offsets = [0, 320], sizes = [16, 64], strides = [1, 1]} : vector<16x576xf32> to vector<16x64xf32>
      %cst_66 = arith.constant dense<0.000000e+00> : vector<16x64xf32>
      %86 = tpu.matmul %84, %85, %cst_66 {dimension_numbers = #tpu.dot_dimension_numbers<[1], [0], [0], [1], [0, 0, 1, 1], [], []>} : vector<16x16xf32>, vector<16x64xf32>, vector<16x64xf32> -> vector<16x64xf32>
      %87 = arith.addf %82, %86 : vector<16x64xf32>
      %c6 = arith.constant 6 : index
      %c0_67 = arith.constant 0 : index
      %c0_68 = arith.constant 0 : index
      %88 = vector.load %arg6[%c6, %c0_67, %c0_68] : memref<9x16x16xf32, #tpu.memory_space<vmem>>, vector<1x16x16xf32>
      %89 = vector.shape_cast %88 : vector<1x16x16xf32> to vector<16x16xf32>
      %90 = vector.extract_strided_slice %56 {offsets = [0, 384], sizes = [16, 64], strides = [1, 1]} : vector<16x576xf32> to vector<16x64xf32>
      %cst_69 = arith.constant dense<0.000000e+00> : vector<16x64xf32>
      %91 = tpu.matmul %89, %90, %cst_69 {dimension_numbers = #tpu.dot_dimension_numbers<[1], [0], [0], [1], [0, 0, 1, 1], [], []>} : vector<16x16xf32>, vector<16x64xf32>, vector<16x64xf32> -> vector<16x64xf32>
      %92 = arith.addf %87, %91 : vector<16x64xf32>
      %c7 = arith.constant 7 : index
      %c0_70 = arith.constant 0 : index
      %c0_71 = arith.constant 0 : index
      %93 = vector.load %arg6[%c7, %c0_70, %c0_71] : memref<9x16x16xf32, #tpu.memory_space<vmem>>, vector<1x16x16xf32>
      %94 = vector.shape_cast %93 : vector<1x16x16xf32> to vector<16x16xf32>
      %95 = vector.extract_strided_slice %56 {offsets = [0, 448], sizes = [16, 64], strides = [1, 1]} : vector<16x576xf32> to vector<16x64xf32>
      %cst_72 = arith.constant dense<0.000000e+00> : vector<16x64xf32>
      %96 = tpu.matmul %94, %95, %cst_72 {dimension_numbers = #tpu.dot_dimension_numbers<[1], [0], [0], [1], [0, 0, 1, 1], [], []>} : vector<16x16xf32>, vector<16x64xf32>, vector<16x64xf32> -> vector<16x64xf32>
      %97 = arith.addf %92, %96 : vector<16x64xf32>
      %c8 = arith.constant 8 : index
      %c0_73 = arith.constant 0 : index
      %c0_74 = arith.constant 0 : index
      %98 = vector.load %arg6[%c8, %c0_73, %c0_74] : memref<9x16x16xf32, #tpu.memory_space<vmem>>, vector<1x16x16xf32>
      %99 = vector.shape_cast %98 : vector<1x16x16xf32> to vector<16x16xf32>
      %100 = vector.extract_strided_slice %56 {offsets = [0, 512], sizes = [16, 64], strides = [1, 1]} : vector<16x576xf32> to vector<16x64xf32>
      %cst_75 = arith.constant dense<0.000000e+00> : vector<16x64xf32>
      %101 = tpu.matmul %99, %100, %cst_75 {dimension_numbers = #tpu.dot_dimension_numbers<[1], [0], [0], [1], [0, 0, 1, 1], [], []>} : vector<16x16xf32>, vector<16x64xf32>, vector<16x64xf32> -> vector<16x64xf32>
      %102 = arith.addf %97, %101 : vector<16x64xf32>
      %cst_76 = arith.constant 0.000000e+00 : f32
      %103 = vector.broadcast %cst_76 : f32 to vector<16x64xf32>
      %104 = arith.cmpf oge, %102, %103 : vector<16x64xf32>
      %cst_77 = arith.constant 2.000000e-01 : f32
      %105 = vector.broadcast %cst_77 : f32 to vector<16x64xf32>
      %106 = arith.mulf %105, %102 : vector<16x64xf32>
      %107 = arith.select %104, %102, %106 : vector<16x64xi1>, vector<16x64xf32>
      %c0_78 = arith.constant 0 : index
      %c0_79 = arith.constant 0 : index
      %108 = vector.load %arg8[%c0_78, %c0_79] : memref<16x64xbf16, #tpu.memory_space<vmem>>, vector<16x64xbf16>
      %109 = arith.extf %108 : vector<16x64xbf16> to vector<16x64xf32>
      %110 = arith.mulf %107, %109 : vector<16x64xf32>
      %111 = vector.shape_cast %110 : vector<16x64xf32> to vector<1x16x64xf32>
      %cst_80 = arith.constant dense<0.000000e+00> : vector<1xf32>
      %112 = vector.multi_reduction <add>, %111, %cst_80 [1, 2] : vector<1x16x64xf32> to vector<1xf32>
      %113 = vector.shape_cast %112 : vector<1xf32> to vector<1x1x1xf32>
      %114 = vector.extract %113[0, 0, 0] : f32 from vector<1x1x1xf32>
      %115 = vector.broadcast %114 : f32 to vector<1x1xf32>
      %c0_81 = arith.constant 0 : index
      %c0_82 = arith.constant 0 : index
      %116 = vector.load %arg9[%c0_81, %c0_82] : memref<1x1xf32, #tpu.memory_space<vmem>>, vector<1x1xf32>
      tpu.vector_store %arg9[%c0_81, %c0_82], %115 {strides = array<i32>} : memref<1x1xf32, #tpu.memory_space<vmem>>, vector<1x1xf32>,
    } else {
    }
    return
  }
  func.func @transform_0(%arg0: i32) -> (i32, i32) {
    %c0_i32 = arith.constant 0 : i32
    %c0_i32_0 = arith.constant 0 : i32
    %c0_i32_1 = arith.constant 0 : i32
    return %c0_i32, %c0_i32_0 : i32, i32
  }
  func.func @transform_1(%arg0: i32) -> (i32, i32, i32) {
    %c0_i32 = arith.constant 0 : i32
    %c0_i32_0 = arith.constant 0 : i32
    %c0_i32_1 = arith.constant 0 : i32
    return %arg0, %c0_i32, %c0_i32_0 : i32, i32, i32
  }
  func.func @transform_2(%arg0: i32) -> (i32, i32, i32) {
    %c0_i32 = arith.constant 0 : i32
    %c0_i32_0 = arith.constant 0 : i32
    %c0_i32_1 = arith.constant 0 : i32
    return %arg0, %c0_i32, %c0_i32_0 : i32, i32, i32
  }
  func.func @transform_3(%arg0: i32) -> (i32, i32) {
    %c0_i32 = arith.constant 0 : i32
    %c0_i32_0 = arith.constant 0 : i32
    %c0_i32_1 = arith.constant 0 : i32
    return %c0_i32, %c0_i32_0 : i32, i32
  }
  func.func @transform_4(%arg0: i32) -> (i32, i32) {
    %c0_i32 = arith.constant 0 : i32
    %c0_i32_0 = arith.constant 0 : i32
    %c0_i32_1 = arith.constant 0 : i32
    return %c0_i32, %c0_i32_0 : i32, i32
  }
  func.func @transform_5(%arg0: i32) -> (i32, i32, i32) {
    %c0_i32 = arith.constant 0 : i32
    %c0_i32_0 = arith.constant 0 : i32
    %c0_i32_1 = arith.constant 0 : i32
    %c0_i32_2 = arith.constant 0 : i32
    return %c0_i32, %c0_i32_0, %c0_i32_1 : i32, i32, i32
  }
  func.func @transform_6(%arg0: i32) -> (i32, i32) {
    %c0_i32 = arith.constant 0 : i32
    %c0_i32_0 = arith.constant 0 : i32
    %c0_i32_1 = arith.constant 0 : i32
    return %c0_i32, %c0_i32_0 : i32, i32
  }
  func.func @transform_7(%arg0: i32) -> (i32, i32) {
    %c0_i32 = arith.constant 0 : i32
    %c0_i32_0 = arith.constant 0 : i32
    %c0_i32_1 = arith.constant 0 : i32
    return %c0_i32, %c0_i32_0 : i32, i32
  }
  func.func @transform_8(%arg0: i32) -> (i32, i32) {
    %c0_i32 = arith.constant 0 : i32
    %c0_i32_0 = arith.constant 0 : i32
    %c0_i32_1 = arith.constant 0 : i32
    return %c0_i32, %c0_i32_0 : i32, i32
  }
}

</mosaic_0001>

<bundles_post_ra>
// kernel: _forward.1
= control target key start
LH: loop header
LB: loop body
LE: loop exit
PB: predicated region body
PF: predicated region fallthrough
CT: control target
= control target key end

     0   :  { %s6951_s0 = inlined_call_operand.vmem [shape: bf16[16,1024], index: 0, kind: input, shape index: {}]   ;;  %s6952_s1 = inlined_call_operand.hbm [shape: bf16[9,16,16], index: 1, kind: input, shape index: {}]   ;;  %s6953_s2 = inlined_call_operand.hbm [shape: s8[9,1024,256], index: 2, kind: input, shape index: {}]   ;;  %s6954_s3 = inlined_call_operand.hbm [shape: f32[1,256], index: 3, kind: input, shape index: {}]   ;;  %s6955_s4 = inlined_call_operand.vmem [shape: bf16[1,256], index: 4, kind: input, shape index: {}]   ;;  %s6956_s5 = inlined_call_operand.hbm [shape: f32[9,16,16], index: 5, kind: input, shape index: {}]   ;;  %s6957_s6 = inlined_call_operand.vmem [shape: bf16[512,576], index: 6, kind: input, shape index: {}]   ;;  %s6958_s7 = inlined_call_operand.hbm [shape: bf16[16,64], index: 7, kind: input, shape index: {}]   ;;  %s6959_s8 = inlined_call_operand.hbm [shape: f32[1,1], index: 8, kind: output, shape index: {}]  }
   0x1   :  { %6964 = sst [smem:[#allocation18_spill]] %s6952_s1 }
   0x2   :  { %6965 = sst [smem:[#allocation19_spill]] %s6954_s3 }
   0x3   :  { %6966 = sst [smem:[#allocation20_spill]] %s6956_s5 }
   0x4   :  { %13 = vsyncpa [#allocation4], 0 }
   0x5   :  { %15 = vsyncpa [#allocation4 + $0x1], 0 }
   0x6   :  { %16 = vsyncpa [#allocation7], 0 }
   0x7   :  { %18 = vsyncpa [#allocation7 + $0x1], 0 }
   0x8   :  { %19 = vsyncpa [#allocation10], 0 }
   0x9   :  { %20 = vsyncpa [#allocation5], 0  ;;  %s5695_s27 = smov 0   ;;  %s5697_s28 = smov 0  }
   0xa   :  { %s5699_s29 = smov 0   ;;  %s5701_s30 = smov 0  }
   0xb LB: > { %s5714_s9 = sadd.s32 4294967295, %s5632_s30   ;;  %p67_p0 = scmp.ne.s32.totalorder %s5624_s28, %s5620_s27  ;;  %s5632_s30 = sphi %s5701_s30, %s6987_s30   ;;  %s5628_s29 = sphi %s5699_s29, %s6986_s29   ;;  %s5624_s28 = sphi %s5697_s28, %s6985_s28   ;;  %s5620_s27 = sphi %s5695_s27, %s6984_s27  }
   0xc   : > { %p6960_p1 = scmp.eq.s32.totalorder %s5714_s9, 0  ;;  %p4437_p2 = scmp.ge.s32.totalorder %s5632_s30, 1 }
   0xd   : > { %p230_p3 = scmp.lt.s32.totalorder %s5632_s30, 4  ;;  %s5634_s12 = smov [#allocation8]  }
   0xe   : > { %p5723_p5 = por %p6960_p1, %p67_p0  ;;  %s246_s13 = sshll.u32 %s5634_s12, 4  ;;  %s247_s13 = int_to_ptr.vmem [resolvable:$true] %s246_s13 }
   0xf   : > { %p5727_p6 = pnand %p4437_p2, %p230_p3  ;;  %s5635_s14 = smov [#allocation9]  }
  0x10   : > { %s6967_s10 = scalar_select %p5723_p5, 1, 0 }
  0x11   : > { %s6968_s11 = scalar_select %p5727_p6, 1, 0 }
  0x12   : > { %p5093_p7 = pneg %p5727_p6  ;;  %s259_s15 = sshll.u32 %s5635_s14, 4  ;;  %s5739_s15 = int_to_ptr.vmem [resolvable:$true] %s259_s15 }
  0x13   : > { %s5636_s17 = smov [#allocation11]   ;;  %s6970_s3 = sld [smem:[#allocation19_spill]] }
  0x14   : > { %p5735_p8 = pnand %p5093_p7, %p6960_p1  ;;  %s5741_s18 = sshll.u32 %s5636_s17, 4  ;;  %s276_s18 = int_to_ptr.vmem [resolvable:$true] %s5741_s18 }
  0x16   : > { %p5751_p10 = pneg %p5735_p8 }
  0x19   : > { %s5412_s21 = scalar_lea.hbm %s6970_s3, 32 }
  0x1a   : > { %p5413_p9 = scmp.ne.s32.totalorder %s6970_s3, %s5412_s21  ;;  %p5419_p13 = scmp.lt.u32.totalorder %s5412_s21, %s6970_s3 }
  0x1c   : > { %p5415_p11 = pnand %p5751_p10, %p5413_p9 }
  0x1e   : > { %p5416_p12 = pneg %p5415_p11 }
  0x20   : > { %p5421_p0 = pnand %p5419_p13, %p5416_p12 }
  0x22   : > { %5424 = shalt.err (!%p5421_p0)
}
  0x23   : > { %s5425_s27 = scalar_lea.vmem %s247_s13, 32  ;;  %p5433_p4 = scmp.lt.s32.totalorder %s247_s13, %s247_s13 }
  0x24   : > { %p5426_p2 = scmp.ne.s32.totalorder %s247_s13, %s5425_s27  ;;  %p5434_p1 = scmp.lt.s32.totalorder %s5425_s27, %s5425_s27 }
  0x26   : > { %p5428_p3 = pnand %p5426_p2, %p5751_p10  ;;  %p5435_p5 = por %p5434_p1, %p5433_p4 }
  0x28   : > { %p5429_p7 = pneg %p5428_p3 }
  0x2a   : > { %p5436_p6 = pnand %p5435_p5, %p5429_p7 }
  0x2c   : > { %5439 = shalt.err (!%p5436_p6)
}
  0x2d   : > { %5096 = dma.hbm_to_vmem [thread:$0]  (!%p5735_p8), %s6970_s3, 32, %s247_s13, [#allocation7]  }
  0x2e   : > { %s6972_s5 = sld [smem:[#allocation20_spill]] }
  0x34   : > { %s5440_s20 = scalar_lea.hbm %s6972_s5, 2304 }
  0x35   : > { %p5441_p9 = scmp.ne.s32.totalorder %s6972_s5, %s5440_s20  ;;  %p5447_p4 = scmp.lt.u32.totalorder %s5440_s20, %s6972_s5 }
  0x37   : > { %p5443_p11 = pnand %p5441_p9, %p5751_p10 }
  0x39   : > { %p5444_p1 = pneg %p5443_p11 }
  0x3b   : > { %p5449_p5 = pnand %p5447_p4, %p5444_p1 }
  0x3d   : > { %5452 = shalt.err (!%p5449_p5)
}
  0x3e   : > { %s5453_s13 = scalar_lea.vmem %s5739_s15, 2304  ;;  %p5461_p0 = scmp.lt.s32.totalorder %s5739_s15, %s5739_s15 }
  0x3f   : > { %p5454_p6 = scmp.ne.s32.totalorder %s5739_s15, %s5453_s13  ;;  %p5462_p2 = scmp.lt.s32.totalorder %s5453_s13, %s5453_s13 }
  0x41   : > { %p5456_p12 = pnand %p5454_p6, %p5751_p10  ;;  %p5463_p3 = por %p5462_p2, %p5461_p0 }
  0x43   : > { %p5457_p13 = pneg %p5456_p12 }
  0x45   : > { %p5464_p7 = pnand %p5463_p3, %p5457_p13 }
  0x47   : > { %5467 = shalt.err (!%p5464_p7)
}
  0x48   : > { %s5637_s26 = smov 128   ;;  %s5638_s27 = smov 8  }
  0x49   : > { %5099 = dma.hbm_to_vmem [thread:$0]  (!%p5735_p8), %s6972_s5, 2304, %s5739_s15, [#allocation10], %s5637_s26, %s5637_s26, %s5638_s27  }
  0x4a   : > { %s5468_s20 = scalar_lea.hbm %s6958_s7, 128 }
  0x4b   : > { %p5469_p9 = scmp.ne.s32.totalorder %s6958_s7, %s5468_s20  ;;  %p5475_p4 = scmp.lt.u32.totalorder %s5468_s20, %s6958_s7 }
  0x4d   : > { %p5471_p11 = pnand %p5469_p9, %p5751_p10 }
  0x4f   : > { %p5472_p1 = pneg %p5471_p11 }
  0x51   : > { %p5477_p5 = pnand %p5475_p4, %p5472_p1 }
  0x53   : > { %5480 = shalt.err (!%p5477_p5)
}
  0x54   : > { %s5481_s13 = scalar_lea.vmem %s276_s18, 128  ;;  %p5489_p0 = scmp.lt.s32.totalorder %s276_s18, %s276_s18 }
  0x55   : > { %p5482_p6 = scmp.ne.s32.totalorder %s276_s18, %s5481_s13  ;;  %p5490_p2 = scmp.lt.s32.totalorder %s5481_s13, %s5481_s13 }
  0x57   : > { %p5484_p12 = pnand %p5482_p6, %p5751_p10  ;;  %p5491_p3 = por %p5490_p2, %p5489_p0 }
  0x59   : > { %p5485_p13 = pneg %p5484_p12 }
  0x5b   : > { %p5492_p7 = pnand %p5491_p3, %p5485_p13 }
  0x5d   : > { %5495 = shalt.err (!%p5492_p7)
}
  0x5e   : > { %s6963_s15 = smov 64   ;;  %s5640_s24 = smov 4  }
  0x5f   : > { %5102 = dma.hbm_to_vmem [thread:$0]  (!%p5735_p8), %s6958_s7, 128, %s276_s18, [#allocation10], %s6963_s15, %s6963_s15, %s5640_s24  }
  0x60   : > { %s5813_s12 = sadd.s32 1, %s5632_s30   ;;  %s54_s17 = sadd.s32 1, %s5628_s29 }
  0x61   : > { %s51_s14 = ssub.s32 %s5632_s30, %s5813_s12  ;;  %p61_p9 = scmp.ne.s32.totalorder %s5628_s29, %s5624_s28 }
  0x62   : > { %p52_p10 = scmp.eq.s32.totalorder %s51_s14, 0  ;;  %p62_p11 = scmp.eq.s32.totalorder %s5632_s30, 0 }
  0x63   : > { %p5113_p1 = scmp.lt.s32.totalorder %s5632_s30, 3  ;;  %s5826_s16 = sand.u32 1, %s5628_s29  }
  0x64   : > { %s5823_s19 = scalar_select %p52_p10, %s5628_s29, %s54_s17  }
  0x65   : > { %p63_p4 = por %p62_p11, %p61_p9  ;;  %s5067_s20 = smul.u32 24, %s5826_s16 }
  0x66   : > { %s4798_s21 = smul.u32 384, %s5632_s30  ;;  %s6974_s1 = sld [smem:[#allocation18_spill]] }
  0x67   : > { %p5830_p5 = pnand %p5113_p1, %p63_p4  ;;  %s293_s26 = scalar_lea.vmem [#allocation3], %s5067_s20 }
  0x68   : > { %s301_s27 = sshll.u32 %s293_s26, 4  ;;  %s290_s14 = scalar_lea.sflag [#allocation4], %s5826_s16  ;;  %s5840_s27 = int_to_ptr.vmem [resolvable:$true] %s301_s27 }
  0x69   : > { %p5498_p6 = pneg %p5830_p5 }
  0x6c   : > { %s5838_s13 = scalar_lea.hbm %s6974_s1, %s4798_s21  ;;  %s5501_s25 = scalar_lea.hbm %s6974_s1, 1152 }
  0x6d   : > { %s5496_s17 = scalar_lea.hbm %s5838_s13, 384  ;;  %p5502_p0 = scmp.lt.u32.totalorder %s5838_s13, %s6974_s1 }
  0x6e   : > { %p5497_p8 = scmp.ne.s32.totalorder %s5838_s13, %s5496_s17  ;;  %p5503_p2 = scmp.lt.u32.totalorder %s5501_s25, %s5496_s17 }
  0x6f   : > { %p5505_p7 = scmp.lt.u32.totalorder %s5496_s17, %s5838_s13 }
  0x70   : > { %p5499_p12 = pnand %p5498_p6, %p5497_p8  ;;  %p5504_p3 = por %p5503_p2, %p5502_p0 }
  0x72   : > { %p5500_p13 = pneg %p5499_p12  ;;  %p5506_p10 = por %p5505_p7, %p5504_p3 }
  0x74   : > { %p5507_p9 = pnand %p5506_p10, %p5500_p13 }
  0x76   : > { %5510 = shalt.err (!%p5507_p9)
}
  0x77   : > { %s5511_s20 = scalar_lea.vmem %s5840_s27, 384  ;;  %s5641_s26 = smov [#allocation3]  }
  0x78   : > { %p5512_p11 = scmp.ne.s32.totalorder %s5840_s27, %s5511_s20  ;;  %s5516_s23 = sshll.u32 %s5641_s26, 4  ;;  %s5517_s23 = int_to_ptr.vmem [resolvable:$false] %s5516_s23 }
  0x79   : > { %s5518_s15 = scalar_lea.vmem %s5517_s23, 768  ;;  %p5519_p8 = scmp.lt.s32.totalorder %s5840_s27, %s5517_s23 }
  0x7a   : > { %p5514_p1 = pnand %p5512_p11, %p5498_p6  ;;  %p5520_p12 = scmp.lt.s32.totalorder %s5518_s15, %s5511_s20 }
  0x7c   : > { %p5515_p4 = pneg %p5514_p1  ;;  %p5521_p0 = por %p5520_p12, %p5519_p8 }
  0x7e   : > { %p5522_p2 = pnand %p5521_p0, %p5515_p4 }
  0x80   : > { %5525 = shalt.err (!%p5522_p2)
}
  0x81   : > { %s6975_s22 = smov 64   ;;  %s5068_s17 = smul.u32 1536, %s5826_s16 }
  0x82   : > { %5106 = dma.hbm_to_vmem [thread:$0]  (!%p5830_p5), %s5838_s13, 384, %s5840_s27, %s290_s14, %s6975_s22, %s6975_s22, %s5640_s24  }
  0x83   : > { %s4799_s21 = smul.u32 24576, %s5632_s30  ;;  %s315_s23 = scalar_lea.vmem [#allocation6], %s5068_s17 }
  0x84   : > { %s323_s15 = sshll.u32 %s315_s23, 4  ;;  %s6976_s1 = sand.u32 1, %s5632_s30   ;;  %s5880_s15 = int_to_ptr.vmem [resolvable:$true] %s323_s15 }
  0x85   : > { %s5878_s26 = scalar_lea.hbm %s6953_s2, %s4799_s21  ;;  %s5884_s3 = scalar_lea.sflag [#allocation7], %s6976_s1 }
  0x86   : > { %s5526_s5 = scalar_lea.hbm %s5878_s26, 24576  ;;  %s5531_s13 = scalar_lea.hbm %s6953_s2, 73728 }
  0x87   : > { %p5527_p13 = scmp.ne.s32.totalorder %s5878_s26, %s5526_s5  ;;  %p5532_p10 = scmp.lt.u32.totalorder %s5878_s26, %s6953_s2 }
  0x88   : > { %p5533_p9 = scmp.lt.u32.totalorder %s5531_s13, %s5526_s5  ;;  %p5535_p1 = scmp.lt.u32.totalorder %s5526_s5, %s5878_s26 }
  0x89   : > { %p5529_p3 = pnand %p5527_p13, %p5498_p6 }
  0x8a   : > { %p5534_p11 = por %p5533_p9, %p5532_p10 }
  0x8b   : > { %p5530_p7 = pneg %p5529_p3 }
  0x8c   : > { %p5536_p4 = por %p5535_p1, %p5534_p11 }
  0x8e   : > { %p5537_p8 = pnand %p5536_p4, %p5530_p7 }
  0x90   : > { %5540 = shalt.err (!%p5537_p8)
}
  0x91   : > { %s5541_s1 = scalar_lea.vmem %s5880_s15, 24576  ;;  %s5642_s30 = smov [#allocation6]  }
  0x92   : > { %p5542_p12 = scmp.ne.s32.totalorder %s5880_s15, %s5541_s1  ;;  %s5546_s22 = sshll.u32 %s5642_s30, 4  ;;  %s5547_s22 = int_to_ptr.vmem [resolvable:$false] %s5546_s22 }
  0x93   : > { %s5548_s17 = scalar_lea.vmem %s5547_s22, 49152  ;;  %p5549_p13 = scmp.lt.s32.totalorder %s5880_s15, %s5547_s22 }
  0x94   : > { %p5544_p0 = pnand %p5542_p12, %p5498_p6  ;;  %p5550_p3 = scmp.lt.s32.totalorder %s5548_s17, %s5541_s1 }
  0x96   : > { %p5545_p2 = pneg %p5544_p0  ;;  %p5551_p10 = por %p5550_p3, %p5549_p13 }
  0x98   : > { %p5552_p9 = pnand %p5551_p10, %p5545_p2 }
  0x9a   : > { %5555 = shalt.err (!%p5552_p9)
}
  0x9b   : > { %s5643_s5 = smov 256   ;;  %s5644_s21 = smov 16  }
  0x9c   : > { %5109 = dma.hbm_to_vmem [thread:$0]  (!%p5830_p5), %s5878_s26, 24576, %s5880_s15, %s5884_s3, %s5643_s5, %s5643_s5, %s5644_s21  }
  0x9d   : > { %p6977_p6 = scmp.ne.s32.totalorder %s6968_s11, 0 }
  0x9e   : > { %s337_s25 = sand.u32 (!%p6977_p6), 1, %s5624_s28   ;;  %p6978_p7 = scmp.ne.s32.totalorder (!%p6977_p6), %s6967_s10, 0 }
  0x9f   : > { %335 = sbr.rel (%p6977_p6) target bundleno = 2398 (0x95e), region = 52  ;;  %s338_s23 = scalar_lea.sflag (!%p6977_p6), [#allocation4], %s337_s25 }
  0xa0   : > { %s5069_s20 = smul.u32 (!%p6977_p6), 24, %s337_s25 }
  0xa2   : > { %s5913_s24 = scalar_lea.vmem (!%p6977_p6), [#allocation3], %s5069_s20 }
  0xa6   : > { %5599 = dma.done.wait (%p6978_p7), %s338_s23, 384  }
  0xa7   : > { %5601 = vsyncadd (%p6978_p7), %s338_s23, 4294966912  ;;  %s346_s16 = sand.u32 1, %s5714_s9   ;;  %s5070_s18 = smul.u32 1536, %s337_s25 }
  0xa8   : > { %s347_s3 = scalar_lea.sflag [#allocation7], %s346_s16 }
  0xa9   : > { %s5920_s26 = scalar_lea.vmem [#allocation6], %s5070_s18 }
  0xaa   : > { %5603 = dma.done.wait (%p6978_p7), %s347_s3, 24576  }
  0xab   : > { %5605 = vsyncadd (%p6978_p7), %s347_s3, 4294942720  ;;  %p6979_p5 = scmp.eq.s32.totalorder %s5714_s9, 0 }
  0xad   : > { %5607 = dma.done.wait (%p6979_p5), [#allocation7], 32   ;;  %p6980_p11 = pmov %p6979_p5 }
  0xae   : > { %p6981_p1 = pmov %p6979_p5 }
  0xaf   : > { %5609 = vsyncadd (%p6980_p11), [#allocation7], 4294967264 }
  0xb0   : > { %5611 = dma.done.wait (%p6981_p1), [#allocation10], 2432   ;;  %p6982_p4 = pmov %p6981_p1 }
  0xb1   : > { %p6983_p8 = scmp.ne.s32.totalorder %s5714_s9, 0 }
  0xb2   : > { %5613 = vsyncadd (%p6982_p4), [#allocation10], 4294964864  ;;  %v5645_v0 = vmov (!%p6983_p8), 0.0  }
  0xb3   : > { %401 = sbr.rel (%p6983_p8) target bundleno = 186 (0xba), region = 76  ;;  %402 = vst [vmem:[#allocation2] sm:$0xff] (!%p6983_p8), %v5645_v0  ;;  %403 = vst [vmem:[#allocation2 + $0x8] sm:$0xff] (!%p6983_p8), %v5645_v0 }
  0xb4   : > { %404 = vst [vmem:[#allocation2 + $0x10] sm:$0xff] (!%p6983_p8), %v5645_v0  ;;  %405 = vst [vmem:[#allocation2 + $0x18] sm:$0xff] (!%p6983_p8), %v5645_v0 }
  0xba PF: > { %v406_v1 = vld [vmem:[%s6951_s0] sm:$0xff]  ;;  %v5646_v5 = vmov 0   ;;  %v407_v6 = vld [vmem:[%s6951_s0 + $0x8] sm:$0xff]  ;;  %v408_v8 = vld [vmem:[%s6951_s0 + $0x10] sm:$0xff]  ;;  %vm461_vm0 = vcmask 130048   ;;  %p4606_p12 = scmp.ne.s32.totalorder %s5714_s9, 2 }
  0xbb   : > { %v410_v2 = vld [vmem:[%s6951_s0 + $0x20] sm:$0xff]  ;;  %497 = vmatprep.mubr.bf16.mxu1 %v5646_v5  ;;  %v411_v7 = vld [vmem:[%s6951_s0 + $0x28] sm:$0xff]  ;;  %v412_v9 = vld [vmem:[%s6951_s0 + $0x30] sm:$0xff]  ;;  %s5648_s3 = smov (!%p4606_p12), 64   ;;  %vm4312_vm3 = vcmask (!%p4606_p12), 523264   ;;  %vm4326_vm4 = vcmask (!%p4606_p12), 0  }
  0xbc   : > { %v5942_v3 = vcombine.high %v406_v1, %v410_v2  ;;  %v5944_v4 = vcombine.low %v406_v1, %v410_v2  ;;  %v5165_v10 = vld [vmem:[%s5913_s24] sm:$0xff]   ;;  %v5961_v11 = vcombine.high %v407_v6, %v411_v7  ;;  %v5964_v12 = vcombine.low %v407_v6, %v411_v7  ;;  %v649_v21 = vld [vmem:[%s5920_s26] sm:$0xff]  ;;  %v652_v24 = vld [vmem:[%s5920_s26 + $0x18] sm:$0xff] }
  0xbd   : > { %v5967_v13 = vcombine.high %v408_v8, %v412_v9  ;;  %v409_v14 = vld [vmem:[%s6951_s0 + $0x18] sm:$0xff]  ;;  %v5979_v16 = vcombine.low %v408_v8, %v412_v9  ;;  %v713_v22 = vunpack.c.l.s8.bf16 %v649_v21  ;;  %v715_v25 = vunpack.c.h.s8.bf16 %v649_v21  ;;  %v651_v27 = vld [vmem:[%s5920_s26 + $0x10] sm:$0xff]  ;;  %v653_v33 = vld [vmem:[%s5920_s26 + $0x20] sm:$0xff] }
  0xbe   : > { %465 = vmatprep.subr.bf16.mxu1 %v5942_v3  ;;  %v413_v15 = vld [vmem:[%s6951_s0 + $0x38] sm:$0xff]  ;;  %v718_v26 = vunpack.c.l.s8.bf16 %v652_v24  ;;  %v717_v28 = vunpack.c.l.s8.bf16 %v651_v27  ;;  %v720_v29 = vunpack.c.h.s8.bf16 %v652_v24  ;;  %v719_v31 = vunpack.c.h.s8.bf16 %v651_v27  ;;  %v656_v36 = vld [vmem:[%s5920_s26 + $0x38] sm:$0xff]  ;;  %v655_v39 = vld [vmem:[%s5920_s26 + $0x30] sm:$0xff] }
  0xbf   : > { %466 = vmatpush1.bf16.msra.mxu1 %v5944_v4  ;;  %v5981_v17 = vcombine.high %v409_v14, %v413_v15  ;;  %v650_v18 = vld [vmem:[%s5920_s26 + $0x8] sm:$0xff]  ;;  %v5988_v19 = vcombine.low %v409_v14, %v413_v15  ;;  %v721_v34 = vunpack.c.l.s8.bf16 %v653_v33  ;;  %v723_v37 = vunpack.c.h.s8.bf16 %v653_v33  ;;  %v657_v45 = vld [vmem:[%s5920_s26 + $0x40] sm:$0xff]  ;;  %v660_v48 = vld [vmem:[%s5920_s26 + $0x58] sm:$0xff] }
  0xc0   : > { %508 = vmatprep.subr.bf16.mxu1 %v5961_v11  ;;  %v714_v20 = vunpack.c.l.s8.bf16 %v650_v18  ;;  %v716_v23 = vunpack.c.h.s8.bf16 %v650_v18  ;;  %v654_v30 = vld [vmem:[%s5920_s26 + $0x28] sm:$0xff]  ;;  %v726_v38 = vunpack.c.l.s8.bf16 %v656_v36  ;;  %v725_v40 = vunpack.c.l.s8.bf16 %v655_v39  ;;  %v659_v51 = vld [vmem:[%s5920_s26 + $0x50] sm:$0xff]  ;;  %v661_v57 = vld [vmem:[%s5920_s26 + $0x60] sm:$0xff] }
  0xc1   : > { %v722_v32 = vunpack.c.l.s8.bf16 %v654_v30  ;;  %v724_v35 = vunpack.c.h.s8.bf16 %v654_v30  ;;  %v728_v41 = vunpack.c.h.s8.bf16 %v656_v36  ;;  %v658_v42 = vld [vmem:[%s5920_s26 + $0x48] sm:$0xff]  ;;  %v727_v43 = vunpack.c.h.s8.bf16 %v655_v39  ;;  %v664_v60 = vld [vmem:[%s5920_s26 + $0x78] sm:$0xff]  ;;  %v663_v63 = vld [vmem:[%s5920_s26 + $0x70] sm:$0xff] }
  0xc2   : > { %4460 = vmatmul.mubr.msk.bf16.vlgmr.msra.gmra.mrb[0].mxu1 %vm461_vm0, %v5165_v10  ;;  %v730_v44 = vunpack.c.l.s8.bf16 %v658_v42  ;;  %v729_v46 = vunpack.c.l.s8.bf16 %v657_v45  ;;  %v732_v47 = vunpack.c.h.s8.bf16 %v658_v42  ;;  %v731_v49 = vunpack.c.h.s8.bf16 %v657_v45  ;;  %v662_v54 = vld [vmem:[%s5920_s26 + $0x68] sm:$0xff]  ;;  %v667_v27 = vld [vmem:[%s5920_s26 + $0x90] sm:$0xff]  ;;  %v669_v39 = vld [vmem:[%s5920_s26 + $0xa0] sm:$0xff] }
  0xc3   : > { %509 = vmatpush1.bf16.msra.mxu1 %v5964_v12  ;;  %540 = vmatprep.mubr.bf16.mxu1 %v5646_v5  ;;  %v734_v50 = vunpack.c.l.s8.bf16 %v660_v48  ;;  %v733_v52 = vunpack.c.l.s8.bf16 %v659_v51  ;;  %v736_v53 = vunpack.c.h.s8.bf16 %v660_v48  ;;  %v735_v55 = vunpack.c.h.s8.bf16 %v659_v51  ;;  %v666_v6 = vld [vmem:[%s5920_s26 + $0x88] sm:$0xff]  ;;  %v671_v51 = vld [vmem:[%s5920_s26 + $0xb0] sm:$0xff] }
  0xc4   : > { %551 = vmatprep.subr.bf16.mxu1 %v5967_v13  ;;  %v738_v56 = vunpack.c.l.s8.bf16 %v662_v54  ;;  %v737_v58 = vunpack.c.l.s8.bf16 %v661_v57  ;;  %v740_v59 = vunpack.c.h.s8.bf16 %v662_v54  ;;  %v739_v61 = vunpack.c.h.s8.bf16 %v661_v57 }
  0xc5   : > { %v742_v62 = vunpack.c.l.s8.bf16 %v664_v60  ;;  %v741_v0 = vunpack.c.l.s8.bf16 %v663_v63  ;;  %v744_v1 = vunpack.c.h.s8.bf16 %v664_v60  ;;  %v743_v2 = vunpack.c.h.s8.bf16 %v663_v63 }
  0xc6   : > { %v746_v7 = vunpack.c.l.s8.bf16 %v666_v6  ;;  %v751_v36 = vunpack.c.h.s8.bf16 %v667_v27  ;;  %v755_v48 = vunpack.c.h.s8.bf16 %v669_v39  ;;  %v759_v60 = vunpack.c.h.s8.bf16 %v671_v51 }
  0xca   : > { %4461 = vmatmul.mubr.msk.bf16.vlgmr.msra.gmra.mrb[4].mxu1 %vm461_vm0, %v5165_v10 }
  0xcb   : > { %552 = vmatpush1.bf16.msra.mxu1 %v5979_v16  ;;  %583 = vmatprep.mubr.bf16.mxu1 %v5646_v5 }
  0xcc   : > { %594 = vmatprep.subr.bf16.mxu1 %v5981_v17 }
  0xd2   : > { %4462 = vmatmul.mubr.msk.bf16.vlgmr.msra.gmra.mrb[8].mxu1 %vm461_vm0, %v5165_v10 }
  0xd3   : > { %595 = vmatpush1.bf16.msra.mxu1 %v5988_v19  ;;  %626 = vmatprep.mubr.bf16.mxu1 %v5646_v5 }
  0xd4   : > { %841 = vmatprep.subr.bf16.mxu1 %v714_v20 }
  0xda   : > { %4463 = vmatmul.mubr.msk.bf16.vlgmr.msra.gmra.mrb[12].mxu1 %vm461_vm0, %v5165_v10  ;;  %v665_v10 = vld [vmem:[%s5920_s26 + $0x80] sm:$0xff] }
  0xdb   : > { %842 = vmatpush1.bf16.msra.mxu1 %v713_v22  ;;  %v745_v21 = vunpack.c.l.s8.bf16 %v665_v10  ;;  %v748_v22 = vunpack.c.h.s8.bf16 %v666_v6  ;;  %v747_v24 = vunpack.c.h.s8.bf16 %v665_v10  ;;  %v678_v10 = vld [vmem:[%s5920_s26 + $0xe8] sm:$0xff] }
  0xdc   : > { %843 = vmatprep.subr.bf16.mxu1 %v716_v23  ;;  %v668_v23 = vld [vmem:[%s5920_s26 + $0x98] sm:$0xff] }
  0xdf   : > { %844 = vmatpush1.bf16.msra.mxu1 %v715_v25 }
  0xe0   : > { %845 = vmatprep.subr.bf16.mxu1 %v718_v26  ;;  %v750_v26 = vunpack.c.l.s8.bf16 %v668_v23 }
  0xe3   : > { %846 = vmatpush1.bf16.msra.mxu1 %v717_v28 }
  0xe4   : > { %847 = vmatprep.subr.bf16.mxu1 %v720_v29 }
  0xe7   : > { %848 = vmatpush1.bf16.msra.mxu1 %v719_v31 }
  0xe8   : > { %849 = vmatprep.subr.bf16.mxu1 %v722_v32  ;;  %v749_v32 = vunpack.c.l.s8.bf16 %v667_v27 }
  0xeb   : > { %850 = vmatpush1.bf16.msra.mxu1 %v721_v34  ;;  %v752_v34 = vunpack.c.h.s8.bf16 %v668_v23 }
  0xec   : > { %851 = vmatprep.subr.bf16.mxu1 %v724_v35  ;;  %v670_v35 = vld [vmem:[%s5920_s26 + $0xa8] sm:$0xff] }
  0xef   : > { %852 = vmatpush1.bf16.msra.mxu1 %v723_v37 }
  0xf0   : > { %853 = vmatprep.subr.bf16.mxu1 %v726_v38  ;;  %v754_v38 = vunpack.c.l.s8.bf16 %v670_v35 }
  0xf3   : > { %854 = vmatpush1.bf16.msra.mxu1 %v725_v40 }
  0xf4   : > { %855 = vmatprep.subr.bf16.mxu1 %v728_v41 }
  0xf7   : > { %856 = vmatpush1.bf16.msra.mxu1 %v727_v43 }
  0xf8   : > { %857 = vmatprep.subr.bf16.mxu1 %v730_v44  ;;  %v753_v44 = vunpack.c.l.s8.bf16 %v669_v39 }
  0xfb   : > { %858 = vmatpush1.bf16.msra.mxu1 %v729_v46  ;;  %v756_v46 = vunpack.c.h.s8.bf16 %v670_v35 }
  0xfc   : > { %859 = vmatprep.subr.bf16.mxu1 %v732_v47  ;;  %v672_v47 = vld [vmem:[%s5920_s26 + $0xb8] sm:$0xff] }
  0xff   : > { %860 = vmatpush1.bf16.msra.mxu1 %v731_v49 }
 0x100   : > { %861 = vmatprep.subr.bf16.mxu1 %v734_v50  ;;  %v758_v50 = vunpack.c.l.s8.bf16 %v672_v47 }
 0x103   : > { %862 = vmatpush1.bf16.msra.mxu1 %v733_v52 }
 0x104   : > { %863 = vmatprep.subr.bf16.mxu1 %v736_v53 }
 0x107   : > { %864 = vmatpush1.bf16.msra.mxu1 %v735_v55 }
 0x108   : > { %865 = vmatprep.subr.bf16.mxu1 %v738_v56  ;;  %v757_v56 = vunpack.c.l.s8.bf16 %v671_v51 }
 0x10b   : > { %866 = vmatpush1.bf16.msra.mxu1 %v737_v58  ;;  %v760_v58 = vunpack.c.h.s8.bf16 %v672_v47 }
 0x10c   : > { %867 = vmatprep.subr.bf16.mxu1 %v740_v59  ;;  %v674_v59 = vld [vmem:[%s5920_s26 + $0xc8] sm:$0xff] }
 0x10f   : > { %868 = vmatpush1.bf16.msra.mxu1 %v739_v61  ;;  %v762_v61 = vunpack.c.l.s8.bf16 %v674_v59 }
 0x110   : > { %869 = vmatprep.subr.bf16.mxu1 %v742_v62  ;;  %v673_v62 = vld [vmem:[%s5920_s26 + $0xc0] sm:$0xff] }
 0x111   : > { %v761_v63 = vunpack.c.l.s8.bf16 %v673_v62 }
 0x113   : > { %870 = vmatpush1.bf16.msra.mxu1 %v741_v0  ;;  %v764_v0 = vunpack.c.h.s8.bf16 %v674_v59 }
 0x114   : > { %871 = vmatprep.subr.bf16.mxu1 %v744_v1  ;;  %v676_v1 = vld [vmem:[%s5920_s26 + $0xd8] sm:$0xff] }
 0x115   : > { %v766_v6 = vunpack.c.l.s8.bf16 %v676_v1 }
 0x117   : > { %872 = vmatpush1.bf16.msra.mxu1 %v743_v2  ;;  %v763_v2 = vunpack.c.h.s8.bf16 %v673_v62 }
 0x118   : > { %884 = vmatprep.subr.bf16.mxu1 %v746_v7  ;;  %v675_v7 = vld [vmem:[%s5920_s26 + $0xd0] sm:$0xff] }
 0x195   : > { %v499_v8 = vpop.f32.mrb[0].mxu1 }
 0x196   : > { %v501_v9 = vpop.f32.mrb[1].mxu1 }
 0x197   : > { %v503_v14 = vpop.f32.mrb[2].mxu1 }
 0x198   : > { %v637_v15 = vpack.c.bf16 %v503_v14, %v499_v8  ;;  %v505_v18 = vpop.f32.mrb[3].mxu1  ;;  %v765_v8 = vunpack.c.l.s8.bf16 %v675_v7  ;;  %v767_v14 = vunpack.c.h.s8.bf16 %v675_v7 }
 0x199   : > { %v638_v20 = vpack.c.bf16 %v505_v18, %v501_v9  ;;  %v768_v9 = vunpack.c.h.s8.bf16 %v676_v1  ;;  %v677_v18 = vld [vmem:[%s5920_s26 + $0xe0] sm:$0xff] }
 0x19a   : > { %v771_v23 = vunpack.c.h.s8.bf16 %v677_v18 }
 0x19b   : > { %873 = vmatprep.mubr.bf16.mxu1 %v638_v20  ;;  %v769_v20 = vunpack.c.l.s8.bf16 %v677_v18 }
 0x19c   : > { %874 = vmatmul.mubr.bf16.vlgmr.msra.gmra.mrb[16].mxu1 %v637_v15  ;;  %v770_v15 = vunpack.c.l.s8.bf16 %v678_v10 }
 0x19d   : > { %885 = vmatpush1.bf16.msra.mxu1 %v745_v21  ;;  %v6012_v25 = vpop.f32.mrb[4].mxu1  ;;  %v772_v21 = vunpack.c.h.s8.bf16 %v678_v10 }
 0x19e   : > { %886 = vmatprep.subr.bf16.mxu1 %v748_v22  ;;  %v544_v28 = vpop.f32.mrb[5].mxu1  ;;  %v680_v22 = vld [vmem:[%s5920_s26 + $0xf8] sm:$0xff] }
 0x19f   : > { %v6015_v29 = vpop.f32.mrb[6].mxu1 }
 0x1a0   : > { %v639_v30 = vpack.c.bf16 %v6015_v29, %v6012_v25  ;;  %v548_v31 = vpop.f32.mrb[7].mxu1 }
 0x1a1   : > { %887 = vmatpush1.bf16.msra.mxu1 %v747_v24  ;;  %v640_v33 = vpack.c.bf16 %v548_v31, %v544_v28  ;;  %v774_v24 = vunpack.c.l.s8.bf16 %v680_v22  ;;  %v776_v28 = vunpack.c.h.s8.bf16 %v680_v22  ;;  %v682_v31 = vld [vmem:[%s5920_s26 + $0x108] sm:$0xff] }
 0x1a2   : > { %888 = vmatprep.subr.bf16.mxu1 %v750_v26  ;;  %v679_v26 = vld [vmem:[%s5920_s26 + $0xf0] sm:$0xff] }
 0x1a3   : > { %916 = vmatprep.mubr.bf16.mxu1 %v640_v33  ;;  %v773_v27 = vunpack.c.l.s8.bf16 %v679_v26  ;;  %v778_v33 = vunpack.c.l.s8.bf16 %v682_v31 }
 0x1a5   : > { %889 = vmatpush1.bf16.msra.mxu1 %v749_v32  ;;  %v6020_v37 = vpop.f32.mrb[8].mxu1  ;;  %v775_v32 = vunpack.c.h.s8.bf16 %v679_v26 }
 0x1a6   : > { %890 = vmatprep.subr.bf16.mxu1 %v752_v34  ;;  %v6023_v40 = vpop.f32.mrb[9].mxu1  ;;  %v681_v34 = vld [vmem:[%s5920_s26 + $0x100] sm:$0xff] }
 0x1a7   : > { %v6025_v41 = vpop.f32.mrb[10].mxu1  ;;  %v777_v35 = vunpack.c.l.s8.bf16 %v681_v34  ;;  %v779_v39 = vunpack.c.h.s8.bf16 %v681_v34 }
 0x1a8   : > { %v641_v42 = vpack.c.bf16 %v6025_v41, %v6020_v37  ;;  %v6029_v43 = vpop.f32.mrb[11].mxu1  ;;  %v4492_v41 = vld [vmem:[%s5920_s26 + $0x2a8] sm:$0xff] }
 0x1a9   : > { %891 = vmatpush1.bf16.msra.mxu1 %v751_v36  ;;  %v642_v45 = vpack.c.bf16 %v6029_v43, %v6023_v40  ;;  %v780_v36 = vunpack.c.h.s8.bf16 %v682_v31  ;;  %v688_v43 = vld [vmem:[%s5920_s26 + $0x138] sm:$0xff] }
 0x1aa   : > { %892 = vmatprep.subr.bf16.mxu1 %v754_v38  ;;  %v684_v38 = vld [vmem:[%s5920_s26 + $0x118] sm:$0xff] }
 0x1ad   : > { %893 = vmatpush1.bf16.msra.mxu1 %v753_v44  ;;  %v6034_v49 = vpop.f32.mrb[12].mxu1  ;;  %v782_v44 = vunpack.c.l.s8.bf16 %v684_v38 }
 0x1ae   : > { %894 = vmatprep.subr.bf16.mxu1 %v756_v46  ;;  %v6037_v52 = vpop.f32.mrb[13].mxu1  ;;  %v683_v46 = vld [vmem:[%s5920_s26 + $0x110] sm:$0xff] }
 0x1af   : > { %v6039_v53 = vpop.f32.mrb[14].mxu1  ;;  %v781_v47 = vunpack.c.l.s8.bf16 %v683_v46  ;;  %v783_v25 = vunpack.c.h.s8.bf16 %v683_v46 }
 0x1b0   : > { %v643_v54 = vpack.c.bf16 %v6039_v53, %v6034_v49  ;;  %v6043_v55 = vpop.f32.mrb[15].mxu1  ;;  %v4472_v49 = vld [vmem:[%s5920_s26 + $0x208] sm:$0xff] }
 0x1b1   : > { %895 = vmatpush1.bf16.msra.mxu1 %v755_v48  ;;  %v644_v57 = vpack.c.bf16 %v6043_v55, %v6037_v52  ;;  %v784_v48 = vunpack.c.h.s8.bf16 %v684_v38  ;;  %v698_v38 = vld [vmem:[%s5920_s26 + $0x188] sm:$0xff]  ;;  %v4491_v52 = vld [vmem:[%s5920_s26 + $0x2a0] sm:$0xff]  ;;  %v1282_v53 = vunpack.c.l.s8.bf16 %v4472_v49 }
 0x1b2   : > { %896 = vmatprep.subr.bf16.mxu1 %v758_v50  ;;  %v686_v50 = vld [vmem:[%s5920_s26 + $0x128] sm:$0xff] }
 0x1b3   : > { %v786_v29 = vunpack.c.l.s8.bf16 %v686_v50  ;;  %v788_v40 = vunpack.c.h.s8.bf16 %v686_v50  ;;  %v702_v55 = vld [vmem:[%s5920_s26 + $0x1a8] sm:$0xff] }
 0x1b5   : > { %897 = vmatpush1.bf16.msra.mxu1 %v757_v56  ;;  %v790_v56 = vunpack.c.l.s8.bf16 %v688_v43 }
 0x1b6   : > { %898 = vmatprep.subr.bf16.mxu1 %v760_v58  ;;  %v687_v58 = vld [vmem:[%s5920_s26 + $0x130] sm:$0xff] }
 0x1b7   : > { %v789_v59 = vunpack.c.l.s8.bf16 %v687_v58  ;;  %v791_v62 = vunpack.c.h.s8.bf16 %v687_v58 }
 0x1b9   : > { %899 = vmatpush1.bf16.msra.mxu1 %v759_v60  ;;  %v792_v60 = vunpack.c.h.s8.bf16 %v688_v43 }
 0x1ba   : > { %900 = vmatprep.subr.bf16.mxu1 %v762_v61  ;;  %v690_v61 = vld [vmem:[%s5920_s26 + $0x148] sm:$0xff] }
 0x1bd   : > { %901 = vmatpush1.bf16.msra.mxu1 %v761_v63  ;;  %v794_v63 = vunpack.c.l.s8.bf16 %v690_v61 }
 0x1be   : > { %902 = vmatprep.subr.bf16.mxu1 %v764_v0  ;;  %v689_v0 = vld [vmem:[%s5920_s26 + $0x140] sm:$0xff] }
 0x1bf   : > { %v793_v1 = vunpack.c.l.s8.bf16 %v689_v0  ;;  %v795_v7 = vunpack.c.h.s8.bf16 %v689_v0  ;;  %v818_v0 = vunpack.c.l.s8.bf16 %v702_v55 }
 0x1c1   : > { %903 = vmatpush1.bf16.msra.mxu1 %v763_v2  ;;  %v796_v2 = vunpack.c.h.s8.bf16 %v690_v61  ;;  %v1322_v61 = vunpack.c.l.s8.bf16 %v4492_v41 }
 0x1c2   : > { %904 = vmatprep.subr.bf16.mxu1 %v766_v6  ;;  %v692_v6 = vld [vmem:[%s5920_s26 + $0x158] sm:$0xff] }
 0x1c5   : > { %905 = vmatpush1.bf16.msra.mxu1 %v765_v8  ;;  %v798_v8 = vunpack.c.l.s8.bf16 %v692_v6 }
 0x1c6   : > { %906 = vmatprep.subr.bf16.mxu1 %v768_v9  ;;  %v691_v9 = vld [vmem:[%s5920_s26 + $0x150] sm:$0xff] }
 0x1c7   : > { %v797_v10 = vunpack.c.l.s8.bf16 %v691_v9  ;;  %v799_v18 = vunpack.c.h.s8.bf16 %v691_v9 }
 0x1c9   : > { %907 = vmatpush1.bf16.msra.mxu1 %v767_v14  ;;  %v800_v14 = vunpack.c.h.s8.bf16 %v692_v6 }
 0x1ca   : > { %908 = vmatprep.subr.bf16.mxu1 %v770_v15  ;;  %v694_v15 = vld [vmem:[%s5920_s26 + $0x168] sm:$0xff] }
 0x1cd   : > { %909 = vmatpush1.bf16.msra.mxu1 %v769_v20  ;;  %v802_v20 = vunpack.c.l.s8.bf16 %v694_v15 }
 0x1ce   : > { %910 = vmatprep.subr.bf16.mxu1 %v772_v21  ;;  %v693_v21 = vld [vmem:[%s5920_s26 + $0x160] sm:$0xff] }
 0x1cf   : > { %v801_v22 = vunpack.c.l.s8.bf16 %v693_v21  ;;  %v803_v26 = vunpack.c.h.s8.bf16 %v693_v21 }
 0x1d1   : > { %911 = vmatpush1.bf16.msra.mxu1 %v771_v23  ;;  %v804_v23 = vunpack.c.h.s8.bf16 %v694_v15 }
 0x1d2   : > { %912 = vmatprep.subr.bf16.mxu1 %v774_v24  ;;  %v696_v24 = vld [vmem:[%s5920_s26 + $0x178] sm:$0xff] }
 0x1d5   : > { %913 = vmatpush1.bf16.msra.mxu1 %v773_v27  ;;  %v806_v27 = vunpack.c.l.s8.bf16 %v696_v24 }
 0x1d6   : > { %914 = vmatprep.subr.bf16.mxu1 %v776_v28  ;;  %v695_v28 = vld [vmem:[%s5920_s26 + $0x170] sm:$0xff] }
 0x1d7   : > { %v805_v31 = vunpack.c.l.s8.bf16 %v695_v28 }
 0x1d9   : > { %915 = vmatpush1.bf16.msra.mxu1 %v775_v32  ;;  %v4488_v32 = vld [vmem:[%s5920_s26 + $0x288] sm:$0xff] }
 0x1da   : > { %927 = vmatprep.subr.bf16.mxu1 %v778_v33  ;;  %v808_v33 = vunpack.c.h.s8.bf16 %v696_v24  ;;  %v1314_v34 = vunpack.c.l.s8.bf16 %v4488_v32 }
 0x1dc   : > { %917 = vmatmul.mubr.bf16.vlgmr.msra.gmra.mrb[16].mxu1 %v639_v30  ;;  %v685_v30 = vld [vmem:[%s5920_s26 + $0x120] sm:$0xff]  ;;  %1452 = vmatprep.subr.bf16.mxu0 %v1314_v34 }
 0x1dd   : > { %928 = vmatpush1.bf16.msra.mxu1 %v777_v35  ;;  %959 = vmatprep.mubr.bf16.mxu1 %v642_v45  ;;  %v785_v51 = vunpack.c.l.s8.bf16 %v685_v30  ;;  %v787_v45 = vunpack.c.h.s8.bf16 %v685_v30  ;;  %v1316_v35 = vunpack.c.h.s8.bf16 %v4488_v32  ;;  %v706_v32 = vld [vmem:[%s5920_s26 + $0x1c8] sm:$0xff] }
 0x1de   : > { %929 = vmatprep.subr.bf16.mxu1 %v780_v36  ;;  %v4487_v36 = vld [vmem:[%s5920_s26 + $0x280] sm:$0xff] }
 0x1df   : > { %v1315_v46 = vunpack.c.h.s8.bf16 %v4487_v36 }
 0x1e1   : > { %930 = vmatpush1.bf16.msra.mxu1 %v779_v39  ;;  %v1313_v39 = vunpack.c.l.s8.bf16 %v4487_v36  ;;  %v705_v36 = vld [vmem:[%s5920_s26 + $0x1c0] sm:$0xff] }
 0x1e2   : > { %931 = vmatprep.subr.bf16.mxu1 %v782_v44  ;;  %v807_v44 = vunpack.c.h.s8.bf16 %v695_v28 }
 0x1e3   : > { %1453 = vmatpush1.bf16.msra.mxu0 %v1313_v39  ;;  %v828_v39 = vunpack.c.h.s8.bf16 %v706_v32 }
 0x1e4   : > { %1454 = vmatprep.subr.bf16.mxu0 %v1316_v35  ;;  %v826_v35 = vunpack.c.l.s8.bf16 %v706_v32  ;;  %v4479_v32 = vld [vmem:[%s5920_s26 + $0x240] sm:$0xff] }
 0x1e5   : > { %932 = vmatpush1.bf16.msra.mxu1 %v781_v47  ;;  %v810_v47 = vunpack.c.l.s8.bf16 %v698_v38 }
 0x1e6   : > { %933 = vmatprep.subr.bf16.mxu1 %v784_v48  ;;  %v697_v48 = vld [vmem:[%s5920_s26 + $0x180] sm:$0xff] }
 0x1e7   : > { %v809_v50 = vunpack.c.l.s8.bf16 %v697_v48  ;;  %1455 = vmatpush1.bf16.msra.mxu0 %v1315_v46  ;;  %v827_v46 = vunpack.c.h.s8.bf16 %v705_v36 }
 0x1e9   : > { %934 = vmatpush1.bf16.msra.mxu1 %v783_v25  ;;  %v4490_v25 = vld [vmem:[%s5920_s26 + $0x298] sm:$0xff] }
 0x1ea   : > { %935 = vmatprep.subr.bf16.mxu1 %v786_v29  ;;  %v812_v29 = vunpack.c.h.s8.bf16 %v698_v38  ;;  %v1318_v30 = vunpack.c.l.s8.bf16 %v4490_v25  ;;  %v825_v38 = vunpack.c.l.s8.bf16 %v705_v36  ;;  %v1299_v36 = vunpack.c.h.s8.bf16 %v4479_v32 }
 0x1ec   : > { %1456 = vmatprep.subr.bf16.mxu0 %v1318_v30 }
 0x1ed   : > { %936 = vmatpush1.bf16.msra.mxu1 %v785_v51  ;;  %v4489_v51 = vld [vmem:[%s5920_s26 + $0x290] sm:$0xff] }
 0x1ee   : > { %937 = vmatprep.subr.bf16.mxu1 %v788_v40  ;;  %v700_v40 = vld [vmem:[%s5920_s26 + $0x198] sm:$0xff]  ;;  %v1317_v43 = vunpack.c.l.s8.bf16 %v4489_v51 }
 0x1ef   : > { %v814_v58 = vunpack.c.l.s8.bf16 %v700_v40 }
 0x1f0   : > { %1457 = vmatpush1.bf16.msra.mxu0 %v1317_v43 }
 0x1f1   : > { %938 = vmatpush1.bf16.msra.mxu1 %v787_v45  ;;  %v811_v45 = vunpack.c.h.s8.bf16 %v697_v48  ;;  %v707_v48 = vld [vmem:[%s5920_s26 + $0x1d0] sm:$0xff] }
 0x1f2   : > { %939 = vmatprep.subr.bf16.mxu1 %v790_v56  ;;  %v1320_v56 = vunpack.c.h.s8.bf16 %v4490_v25  ;;  %v831_v30 = vunpack.c.h.s8.bf16 %v707_v48 }
 0x1f4   : > { %1458 = vmatprep.subr.bf16.mxu0 %v1320_v56  ;;  %v712_v56 = vld [vmem:[%s5920_s26 + $0x1f8] sm:$0xff] }
 0x1f5   : > { %940 = vmatpush1.bf16.msra.mxu1 %v789_v59  ;;  %v699_v59 = vld [vmem:[%s5920_s26 + $0x190] sm:$0xff] }
 0x1f6   : > { %941 = vmatprep.subr.bf16.mxu1 %v792_v60  ;;  %v1319_v60 = vunpack.c.h.s8.bf16 %v4489_v51  ;;  %v813_v37 = vunpack.c.l.s8.bf16 %v699_v59 }
 0x1f8   : > { %1459 = vmatpush1.bf16.msra.mxu0 %v1319_v60  ;;  %v711_v60 = vld [vmem:[%s5920_s26 + $0x1f0] sm:$0xff] }
 0x1f9   : > { %942 = vmatpush1.bf16.msra.mxu1 %v791_v62  ;;  %1460 = vmatprep.subr.bf16.mxu0 %v1322_v61  ;;  %v815_v62 = vunpack.c.h.s8.bf16 %v699_v59  ;;  %v838_v59 = vunpack.c.l.s8.bf16 %v712_v56  ;;  %v5166_v61 = vld [vmem:[%s5913_s24 + $0x8] sm:$0xff]  }
 0x1fa   : > { %943 = vmatprep.subr.bf16.mxu1 %v794_v63  ;;  %v1324_v63 = vunpack.c.h.s8.bf16 %v4492_v41  ;;  %v840_v41 = vunpack.c.h.s8.bf16 %v712_v56 }
 0x1fd   : > { %944 = vmatpush1.bf16.msra.mxu1 %v793_v1  ;;  %v701_v1 = vld [vmem:[%s5920_s26 + $0x1a0] sm:$0xff] }
 0x1fe   : > { %945 = vmatprep.subr.bf16.mxu1 %v796_v2  ;;  %v1323_v2 = vunpack.c.h.s8.bf16 %v4491_v52  ;;  %v817_v6 = vunpack.c.l.s8.bf16 %v701_v1 }
 0x201   : > { %946 = vmatpush1.bf16.msra.mxu1 %v795_v7  ;;  %v4494_v7 = vld [vmem:[%s5920_s26 + $0x2b8] sm:$0xff] }
 0x202   : > { %947 = vmatprep.subr.bf16.mxu1 %v798_v8  ;;  %v820_v8 = vunpack.c.h.s8.bf16 %v702_v55  ;;  %v1326_v9 = vunpack.c.l.s8.bf16 %v4494_v7  ;;  %v1284_v55 = vunpack.c.h.s8.bf16 %v4472_v49 }
 0x205   : > { %948 = vmatpush1.bf16.msra.mxu1 %v797_v10  ;;  %v4493_v10 = vld [vmem:[%s5920_s26 + $0x2b0] sm:$0xff] }
 0x206   : > { %949 = vmatprep.subr.bf16.mxu1 %v800_v14  ;;  %v704_v14 = vld [vmem:[%s5920_s26 + $0x1b8] sm:$0xff]  ;;  %v1325_v15 = vunpack.c.l.s8.bf16 %v4493_v10 }
 0x207   : > { %v822_v21 = vunpack.c.l.s8.bf16 %v704_v14 }
 0x209   : > { %950 = vmatpush1.bf16.msra.mxu1 %v799_v18  ;;  %v819_v18 = vunpack.c.h.s8.bf16 %v701_v1 }
 0x20a   : > { %951 = vmatprep.subr.bf16.mxu1 %v802_v20  ;;  %v1328_v20 = vunpack.c.h.s8.bf16 %v4494_v7 }
 0x20d   : > { %952 = vmatpush1.bf16.msra.mxu1 %v801_v22  ;;  %v703_v22 = vld [vmem:[%s5920_s26 + $0x1b0] sm:$0xff] }
 0x20e   : > { %953 = vmatprep.subr.bf16.mxu1 %v804_v23  ;;  %v1327_v23 = vunpack.c.h.s8.bf16 %v4493_v10  ;;  %v821_v24 = vunpack.c.l.s8.bf16 %v703_v22  ;;  %v823_v34 = vunpack.c.h.s8.bf16 %v703_v22 }
 0x211   : > { %954 = vmatpush1.bf16.msra.mxu1 %v803_v26  ;;  %v6100_v26 = vld [vmem:[%s5920_s26 + $0x2c8] sm:$0xff] }
 0x212   : > { %955 = vmatprep.subr.bf16.mxu1 %v806_v27  ;;  %v824_v27 = vunpack.c.h.s8.bf16 %v704_v14  ;;  %v1330_v28 = vunpack.c.l.s8.bf16 %v6100_v26 }
 0x215   : > { %956 = vmatpush1.bf16.msra.mxu1 %v805_v31  ;;  %v6104_v31 = vld [vmem:[%s5920_s26 + $0x2c0] sm:$0xff] }
 0x216   : > { %957 = vmatprep.subr.bf16.mxu1 %v808_v33  ;;  %v1329_v33 = vunpack.c.l.s8.bf16 %v6104_v31 }
 0x219   : > { %958 = vmatpush1.bf16.msra.mxu1 %v807_v44  ;;  %v708_v44 = vld [vmem:[%s5920_s26 + $0x1d8] sm:$0xff] }
 0x21a   : > { %970 = vmatprep.subr.bf16.mxu1 %v810_v47  ;;  %v830_v47 = vunpack.c.l.s8.bf16 %v708_v44  ;;  %v832_v25 = vunpack.c.h.s8.bf16 %v708_v44 }
 0x21c   : > { %960 = vmatmul.mubr.bf16.vlgmr.msra.gmra.mrb[16].mxu1 %v641_v42  ;;  %v816_v42 = vunpack.c.h.s8.bf16 %v700_v40  ;;  %v709_v40 = vld [vmem:[%s5920_s26 + $0x1e0] sm:$0xff] }
 0x21d   : > { %971 = vmatpush1.bf16.msra.mxu1 %v809_v50  ;;  %1002 = vmatprep.mubr.bf16.mxu1 %v644_v57  ;;  %v1321_v57 = vunpack.c.l.s8.bf16 %v4491_v52  ;;  %v829_v50 = vunpack.c.l.s8.bf16 %v707_v48  ;;  %v833_v43 = vunpack.c.l.s8.bf16 %v709_v40 }
 0x21e   : > { %972 = vmatprep.subr.bf16.mxu1 %v812_v29  ;;  %v710_v29 = vld [vmem:[%s5920_s26 + $0x1e8] sm:$0xff] }
 0x21f   : > { %1461 = vmatpush1.bf16.msra.mxu0 %v1321_v57  ;;  %v834_v51 = vunpack.c.l.s8.bf16 %v710_v29  ;;  %v4474_v57 = vld [vmem:[%s5920_s26 + $0x218] sm:$0xff] }
 0x220   : > { %1462 = vmatprep.subr.bf16.mxu0 %v1324_v63  ;;  %v1286_v63 = vunpack.c.l.s8.bf16 %v4474_v57 }
 0x221   : > { %973 = vmatpush1.bf16.msra.mxu1 %v811_v45  ;;  %v836_v45 = vunpack.c.h.s8.bf16 %v710_v29 }
 0x222   : > { %974 = vmatprep.subr.bf16.mxu1 %v814_v58  ;;  %v835_v58 = vunpack.c.h.s8.bf16 %v709_v40 }
 0x223   : > { %1463 = vmatpush1.bf16.msra.mxu0 %v1323_v2  ;;  %v1288_v2 = vunpack.c.h.s8.bf16 %v4474_v57 }
 0x224   : > { %1464 = vmatprep.subr.bf16.mxu0 %v1326_v9  ;;  %v4475_v9 = vld [vmem:[%s5920_s26 + $0x220] sm:$0xff] }
 0x225   : > { %975 = vmatpush1.bf16.msra.mxu1 %v813_v37  ;;  %v837_v37 = vunpack.c.l.s8.bf16 %v711_v60  ;;  %v1289_v10 = vunpack.c.l.s8.bf16 %v4475_v9 }
 0x226   : > { %976 = vmatprep.subr.bf16.mxu1 %v816_v42  ;;  %v839_v42 = vunpack.c.h.s8.bf16 %v711_v60  ;;  %v1331_v60 = vunpack.c.h.s8.bf16 %v6104_v31  ;;  %v4499_v31 = vld [vmem:[%s5920_s26 + $0x2e0] sm:$0xff] }
 0x227   : > { %1465 = vmatpush1.bf16.msra.mxu0 %v1325_v15  ;;  %v4478_v15 = vld [vmem:[%s5920_s26 + $0x238] sm:$0xff] }
 0x228   : > { %1466 = vmatprep.subr.bf16.mxu0 %v1328_v20  ;;  %v1294_v20 = vunpack.c.l.s8.bf16 %v4478_v15 }
 0x229   : > { %977 = vmatpush1.bf16.msra.mxu1 %v815_v62 }
 0x22a   : > { %978 = vmatprep.subr.bf16.mxu1 %v818_v0  ;;  %v4473_v0 = vld [vmem:[%s5920_s26 + $0x210] sm:$0xff] }
 0x22b   : > { %1467 = vmatpush1.bf16.msra.mxu0 %v1327_v23  ;;  %v1285_v1 = vunpack.c.l.s8.bf16 %v4473_v0  ;;  %v1287_v7 = vunpack.c.h.s8.bf16 %v4473_v0  ;;  %v1296_v23 = vunpack.c.h.s8.bf16 %v4478_v15 }
 0x22c   : > { %1468 = vmatprep.subr.bf16.mxu0 %v1330_v28 }
 0x22d   : > { %979 = vmatpush1.bf16.msra.mxu1 %v817_v6  ;;  %v4476_v6 = vld [vmem:[%s5920_s26 + $0x228] sm:$0xff] }
 0x22e   : > { %980 = vmatprep.subr.bf16.mxu1 %v820_v8  ;;  %v1290_v8 = vunpack.c.l.s8.bf16 %v4476_v6  ;;  %v1292_v14 = vunpack.c.h.s8.bf16 %v4476_v6  ;;  %v4504_v6 = vld [vmem:[%s5920_s26 + $0x308] sm:$0xff] }
 0x22f   : > { %1469 = vmatpush1.bf16.msra.mxu0 %v1329_v33  ;;  %v1297_v33 = vunpack.c.l.s8.bf16 %v4479_v32 }
 0x231   : > { %981 = vmatpush1.bf16.msra.mxu1 %v819_v18  ;;  %v1291_v18 = vunpack.c.h.s8.bf16 %v4475_v9 }
 0x232   : > { %982 = vmatprep.subr.bf16.mxu1 %v822_v21  ;;  %v4477_v21 = vld [vmem:[%s5920_s26 + $0x230] sm:$0xff] }
 0x233   : > { %v1293_v22 = vunpack.c.l.s8.bf16 %v4477_v21 }
 0x235   : > { %983 = vmatpush1.bf16.msra.mxu1 %v821_v24  ;;  %v4480_v24 = vld [vmem:[%s5920_s26 + $0x248] sm:$0xff] }
 0x236   : > { %984 = vmatprep.subr.bf16.mxu1 %v824_v27  ;;  %v1295_v27 = vunpack.c.h.s8.bf16 %v4477_v21  ;;  %v1298_v28 = vunpack.c.l.s8.bf16 %v4480_v24 }
 0x239   : > { %985 = vmatpush1.bf16.msra.mxu1 %v823_v34  ;;  %v1300_v34 = vunpack.c.h.s8.bf16 %v4480_v24 }
 0x23a   : > { %986 = vmatprep.subr.bf16.mxu1 %v826_v35  ;;  %v4482_v35 = vld [vmem:[%s5920_s26 + $0x258] sm:$0xff] }
 0x23d   : > { %987 = vmatpush1.bf16.msra.mxu1 %v825_v38  ;;  %v1302_v38 = vunpack.c.l.s8.bf16 %v4482_v35 }
 0x23e   : > { %988 = vmatprep.subr.bf16.mxu1 %v828_v39  ;;  %v4481_v39 = vld [vmem:[%s5920_s26 + $0x250] sm:$0xff] }
 0x23f   : > { %v1301_v44 = vunpack.c.l.s8.bf16 %v4481_v39  ;;  %v1303_v48 = vunpack.c.h.s8.bf16 %v4481_v39  ;;  %v4505_v39 = vld [vmem:[%s5920_s26 + $0x310] sm:$0xff] }
 0x241   : > { %989 = vmatpush1.bf16.msra.mxu1 %v827_v46  ;;  %v1304_v46 = vunpack.c.h.s8.bf16 %v4482_v35  ;;  %v1348_v35 = vunpack.c.h.s8.bf16 %v4504_v6 }
 0x242   : > { %990 = vmatprep.subr.bf16.mxu1 %v830_v47  ;;  %v4484_v47 = vld [vmem:[%s5920_s26 + $0x268] sm:$0xff] }
 0x245   : > { %991 = vmatpush1.bf16.msra.mxu1 %v829_v50  ;;  %v1306_v50 = vunpack.c.l.s8.bf16 %v4484_v47 }
 0x246   : > { %992 = vmatprep.subr.bf16.mxu1 %v832_v25  ;;  %v4483_v25 = vld [vmem:[%s5920_s26 + $0x260] sm:$0xff] }
 0x247   : > { %v1305_v29 = vunpack.c.l.s8.bf16 %v4483_v25  ;;  %v1307_v40 = vunpack.c.h.s8.bf16 %v4483_v25 }
 0x249   : > { %993 = vmatpush1.bf16.msra.mxu1 %v831_v30  ;;  %v1308_v30 = vunpack.c.h.s8.bf16 %v4484_v47 }
 0x24a   : > { %994 = vmatprep.subr.bf16.mxu1 %v834_v51  ;;  %v4486_v51 = vld [vmem:[%s5920_s26 + $0x278] sm:$0xff] }
 0x24d   : > { %995 = vmatpush1.bf16.msra.mxu1 %v833_v43  ;;  %v1310_v43 = vunpack.c.l.s8.bf16 %v4486_v51 }
 0x24e   : > { %996 = vmatprep.subr.bf16.mxu1 %v836_v45  ;;  %v4485_v45 = vld [vmem:[%s5920_s26 + $0x270] sm:$0xff] }
 0x24f   : > { %v1309_v56 = vunpack.c.l.s8.bf16 %v4485_v45 }
 0x251   : > { %997 = vmatpush1.bf16.msra.mxu1 %v835_v58  ;;  %v1332_v58 = vunpack.c.h.s8.bf16 %v6100_v26 }
 0x252   : > { %998 = vmatprep.subr.bf16.mxu1 %v838_v59  ;;  %v1312_v59 = vunpack.c.h.s8.bf16 %v4486_v51 }
 0x253   : > { %1470 = vmatprep.subr.bf16.mxu0 %v1332_v58 }
 0x254   : > { %1471 = vmatpush1.bf16.msra.mxu0 %v1331_v60 }
 0x255   : > { %999 = vmatpush1.bf16.msra.mxu1 %v837_v37  ;;  %v1311_v37 = vunpack.c.h.s8.bf16 %v4485_v45 }
 0x256   : > { %1000 = vmatprep.subr.bf16.mxu1 %v840_v41  ;;  %v4498_v41 = vld [vmem:[%s5920_s26 + $0x2d8] sm:$0xff] }
 0x257   : > { %v1336_v26 = vunpack.c.h.s8.bf16 %v4498_v41 }
 0x259   : > { %1001 = vmatpush1.bf16.msra.mxu1 %v839_v42  ;;  %v1334_v42 = vunpack.c.l.s8.bf16 %v4498_v41 }
 0x25a   : > { %1032 = vmatprep.subr.bf16.mxu1 %v5942_v3 }
 0x25b   : > { %1472 = vmatprep.subr.bf16.mxu0 %v1334_v42  ;;  %v4509_v42 = vld [vmem:[%s5920_s26 + $0x330] sm:$0xff] }
 0x25c   : > { %1003 = vmatmul.mubr.bf16.vlgmr.msra.gmra.mrb[16].mxu1 %v643_v54  ;;  %v4471_v54 = vld [vmem:[%s5920_s26 + $0x200] sm:$0xff] }
 0x25d   : > { %1033 = vmatpush1.bf16.msra.mxu1 %v5944_v4  ;;  %1064 = vmatprep.mubr.bf16.mxu1 %v5646_v5  ;;  %v1281_v52 = vunpack.c.l.s8.bf16 %v4471_v54  ;;  %v1283_v62 = vunpack.c.h.s8.bf16 %v4471_v54  ;;  %v4500_v54 = vld [vmem:[%s5920_s26 + $0x2e8] sm:$0xff] }
 0x25e   : > { %1075 = vmatprep.subr.bf16.mxu1 %v5961_v11  ;;  %v1340_v57 = vunpack.c.h.s8.bf16 %v4500_v54 }
 0x264   : > { %4467 = vmatmul.mubr.msk.bf16.vlgmr.msra.gmra.mrb[20].mxu1 %vm461_vm0, %v5166_v61 }
 0x265   : > { %1076 = vmatpush1.bf16.msra.mxu1 %v5964_v12  ;;  %1107 = vmatprep.mubr.bf16.mxu1 %v5646_v5 }
 0x266   : > { %1118 = vmatprep.subr.bf16.mxu1 %v5967_v13 }
 0x26c   : > { %4468 = vmatmul.mubr.msk.bf16.vlgmr.msra.gmra.mrb[24].mxu1 %vm461_vm0, %v5166_v61 }
 0x26d   : > { %1119 = vmatpush1.bf16.msra.mxu1 %v5979_v16  ;;  %1150 = vmatprep.mubr.bf16.mxu1 %v5646_v5 }
 0x26e   : > { %1161 = vmatprep.subr.bf16.mxu1 %v5981_v17 }
 0x274   : > { %4469 = vmatmul.mubr.msk.bf16.vlgmr.msra.gmra.mrb[28].mxu1 %vm461_vm0, %v5166_v61 }
 0x275   : > { %1162 = vmatpush1.bf16.msra.mxu1 %v5988_v19  ;;  %1193 = vmatprep.mubr.bf16.mxu1 %v5646_v5 }
 0x276   : > { %1409 = vmatprep.subr.bf16.mxu1 %v1282_v53 }
 0x27c   : > { %4470 = vmatmul.mubr.msk.bf16.vlgmr.msra.gmra.mrb[32].mxu1 %vm461_vm0, %v5166_v61  ;;  %v4497_v61 = vld [vmem:[%s5920_s26 + $0x2d0] sm:$0xff] }
 0x27d   : > { %1410 = vmatpush1.bf16.msra.mxu1 %v1281_v52  ;;  %v1333_v49 = vunpack.c.l.s8.bf16 %v4497_v61  ;;  %v1335_v53 = vunpack.c.h.s8.bf16 %v4497_v61  ;;  %v1338_v52 = vunpack.c.l.s8.bf16 %v4500_v54  ;;  %v1357_v61 = vunpack.c.l.s8.bf16 %v4509_v42 }
 0x27e   : > { %1411 = vmatprep.subr.bf16.mxu1 %v1284_v55  ;;  %v1337_v55 = vunpack.c.l.s8.bf16 %v4499_v31 }
 0x27f   : > { %1473 = vmatpush1.bf16.msra.mxu0 %v1333_v49 }
 0x280   : > { %1474 = vmatprep.subr.bf16.mxu0 %v1336_v26  ;;  %v4512_v26 = vld [vmem:[%s5920_s26 + $0x348] sm:$0xff] }
 0x281   : > { %1412 = vmatpush1.bf16.msra.mxu1 %v1283_v62  ;;  %v1339_v62 = vunpack.c.h.s8.bf16 %v4499_v31  ;;  %v1362_v54 = vunpack.c.l.s8.bf16 %v4512_v26 }
 0x282   : > { %1413 = vmatprep.subr.bf16.mxu1 %v1286_v63  ;;  %v4502_v63 = vld [vmem:[%s5920_s26 + $0x2f8] sm:$0xff] }
 0x283   : > { %1475 = vmatpush1.bf16.msra.mxu0 %v1335_v53  ;;  %v1342_v0 = vunpack.c.l.s8.bf16 %v4502_v63  ;;  %v1359_v53 = vunpack.c.h.s8.bf16 %v4509_v42 }
 0x284   : > { %1476 = vmatprep.subr.bf16.mxu0 %v1338_v52  ;;  %v4514_v52 = vld [vmem:[%s5920_s26 + $0x358] sm:$0xff] }
 0x285   : > { %1414 = vmatpush1.bf16.msra.mxu1 %v1285_v1  ;;  %v4501_v1 = vld [vmem:[%s5920_s26 + $0x2f0] sm:$0xff] }
 0x286   : > { %1415 = vmatprep.subr.bf16.mxu1 %v1288_v2  ;;  %v1344_v2 = vunpack.c.h.s8.bf16 %v4502_v63 }
 0x287   : > { %1477 = vmatpush1.bf16.msra.mxu0 %v1337_v55 }
 0x288   : > { %1478 = vmatprep.subr.bf16.mxu0 %v1340_v57  ;;  %v1366_v57 = vunpack.c.l.s8.bf16 %v4514_v52 }
 0x289   : > { %1416 = vmatpush1.bf16.msra.mxu1 %v1287_v7  ;;  %v1343_v7 = vunpack.c.h.s8.bf16 %v4501_v1 }
 0x28a   : > { %1417 = vmatprep.subr.bf16.mxu1 %v1290_v8  ;;  %v1346_v8 = vunpack.c.l.s8.bf16 %v4504_v6  ;;  %v4515_v6 = vld [vmem:[%s5920_s26 + $0x360] sm:$0xff] }
 0x28b   : > { %1479 = vmatpush1.bf16.msra.mxu0 %v1339_v62  ;;  %v4513_v62 = vld [vmem:[%s5920_s26 + $0x350] sm:$0xff] }
 0x28c   : > { %1480 = vmatprep.subr.bf16.mxu0 %v1342_v0  ;;  %v1365_v63 = vunpack.c.l.s8.bf16 %v4513_v62  ;;  %v1368_v0 = vunpack.c.h.s8.bf16 %v4514_v52 }
 0x28d   : > { %1418 = vmatpush1.bf16.msra.mxu1 %v1289_v10 }
 0x28e   : > { %1419 = vmatprep.subr.bf16.mxu1 %v1292_v14 }
 0x291   : > { %1420 = vmatpush1.bf16.msra.mxu1 %v1291_v18 }
 0x292   : > { %1421 = vmatprep.subr.bf16.mxu1 %v1294_v20 }
 0x295   : > { %1422 = vmatpush1.bf16.msra.mxu1 %v1293_v22 }
 0x296   : > { %1423 = vmatprep.subr.bf16.mxu1 %v1296_v23  ;;  %v4503_v23 = vld [vmem:[%s5920_s26 + $0x300] sm:$0xff] }
 0x299   : > { %1424 = vmatpush1.bf16.msra.mxu1 %v1295_v27  ;;  %v6166_v27 = vld [vmem:[%s5913_s24 + $0x10] sm:$0xff]  }
 0x29a   : > { %1425 = vmatprep.subr.bf16.mxu1 %v1298_v28 }
 0x29d   : > { %1426 = vmatpush1.bf16.msra.mxu1 %v1297_v33 }
 0x29e   : > { %1427 = vmatprep.subr.bf16.mxu1 %v1300_v34  ;;  %v1345_v34 = vunpack.c.l.s8.bf16 %v4503_v23 }
 0x2a1   : > { %1428 = vmatpush1.bf16.msra.mxu1 %v1299_v36  ;;  %v4506_v36 = vld [vmem:[%s5920_s26 + $0x318] sm:$0xff] }
 0x2a2   : > { %1429 = vmatprep.subr.bf16.mxu1 %v1302_v38  ;;  %v1350_v38 = vunpack.c.l.s8.bf16 %v4506_v36  ;;  %v1352_v25 = vunpack.c.h.s8.bf16 %v4506_v36 }
 0x2a5   : > { %1430 = vmatpush1.bf16.msra.mxu1 %v1301_v44 }
 0x2a6   : > { %1431 = vmatprep.subr.bf16.mxu1 %v1304_v46 }
 0x2a9   : > { %1432 = vmatpush1.bf16.msra.mxu1 %v1303_v48 }
 0x2aa   : > { %1433 = vmatprep.subr.bf16.mxu1 %v1306_v50 }
 0x2ad   : > { %1434 = vmatpush1.bf16.msra.mxu1 %v1305_v29  ;;  %v4508_v29 = vld [vmem:[%s5920_s26 + $0x328] sm:$0xff] }
 0x2ae   : > { %1435 = vmatprep.subr.bf16.mxu1 %v1308_v30  ;;  %v1351_v30 = vunpack.c.h.s8.bf16 %v4505_v39  ;;  %v1354_v51 = vunpack.c.l.s8.bf16 %v4508_v29  ;;  %v1356_v60 = vunpack.c.h.s8.bf16 %v4508_v29 }
 0x2b1   : > { %1436 = vmatpush1.bf16.msra.mxu1 %v1307_v40  ;;  %v4507_v40 = vld [vmem:[%s5920_s26 + $0x320] sm:$0xff] }
 0x2b2   : > { %1437 = vmatprep.subr.bf16.mxu1 %v1310_v43  ;;  %v1355_v41 = vunpack.c.h.s8.bf16 %v4507_v40 }
 0x2b5   : > { %1438 = vmatpush1.bf16.msra.mxu1 %v1309_v56 }
 0x2b6   : > { %1439 = vmatprep.subr.bf16.mxu1 %v1312_v59 }
 0x2b9   : > { %1440 = vmatpush1.bf16.msra.mxu1 %v1311_v37  ;;  %v4510_v37 = vld [vmem:[%s5920_s26 + $0x338] sm:$0xff] }
 0x2ba   : > { %1600 = vmatprep.subr.bf16.mxu1 %v5942_v3  ;;  %v1341_v3 = vunpack.c.l.s8.bf16 %v4501_v1  ;;  %v1360_v49 = vunpack.c.h.s8.bf16 %v4510_v37  ;;  %v4516_v1 = vld [vmem:[%s5920_s26 + $0x368] sm:$0xff] }
 0x2bc   : > { %1481 = vmatpush1.bf16.msra.mxu0 %v1341_v3  ;;  %v1367_v3 = vunpack.c.h.s8.bf16 %v4513_v62 }
 0x2bd   : > { %1482 = vmatprep.subr.bf16.mxu0 %v1344_v2  ;;  %v1370_v2 = vunpack.c.l.s8.bf16 %v4516_v1 }
 0x2c0   : > { %1483 = vmatpush1.bf16.msra.mxu0 %v1343_v7  ;;  %v1369_v7 = vunpack.c.l.s8.bf16 %v4515_v6 }
 0x2c1   : > { %1495 = vmatprep.subr.bf16.mxu0 %v1346_v8  ;;  %v1372_v8 = vunpack.c.h.s8.bf16 %v4516_v1 }
 0x337   : > { %v1066_v9 = vpop.f32.mrb[20].mxu1 }
 0x338   : > { %v1068_v10 = vpop.f32.mrb[21].mxu1 }
 0x339   : > { %v1070_v14 = vpop.f32.mrb[22].mxu1 }
 0x33a   : > { %v1204_v15 = vpack.c.bf16 %v1070_v14, %v1066_v9  ;;  %v1072_v18 = vpop.f32.mrb[23].mxu1  ;;  %v4518_v9 = vld [vmem:[%s5920_s26 + $0x378] sm:$0xff] }
 0x33b   : > { %v1205_v20 = vpack.c.bf16 %v1072_v18, %v1068_v10  ;;  %v1371_v10 = vunpack.c.h.s8.bf16 %v4515_v6  ;;  %v1374_v14 = vunpack.c.l.s8.bf16 %v4518_v9 }
 0x33d   : > { %1441 = vmatprep.mubr.bf16.mxu1 %v1205_v20  ;;  %v1376_v20 = vunpack.c.h.s8.bf16 %v4518_v9 }
 0x33e   : > { %1442 = vmatmul.mubr.bf16.vlgmr.msra.gmra.mrb[16].mxu1 %v1204_v15  ;;  %v4517_v15 = vld [vmem:[%s5920_s26 + $0x370] sm:$0xff] }
 0x33f   : > { %1601 = vmatpush1.bf16.msra.mxu1 %v5944_v4  ;;  %1632 = vmatprep.mubr.bf16.mxu1 %v5646_v5  ;;  %v1109_v21 = vpop.f32.mrb[24].mxu1  ;;  %v1347_v4 = vunpack.c.h.s8.bf16 %v4503_v23  ;;  %v1373_v18 = vunpack.c.l.s8.bf16 %v4517_v15 }
 0x340   : > { %v1111_v22 = vpop.f32.mrb[25].mxu1  ;;  %1643 = vmatprep.subr.bf16.mxu1 %v5961_v11 }
 0x341   : > { %v1113_v24 = vpop.f32.mrb[26].mxu1 }
 0x342   : > { %v1206_v28 = vpack.c.bf16 %v1113_v24, %v1109_v21  ;;  %v1115_v32 = vpop.f32.mrb[27].mxu1  ;;  %v4520_v21 = vld [vmem:[%s5920_s26 + $0x388] sm:$0xff]  ;;  %v4519_v24 = vld [vmem:[%s5920_s26 + $0x380] sm:$0xff] }
 0x343   : > { %v1207_v33 = vpack.c.bf16 %v1115_v32, %v1111_v22  ;;  %v1375_v22 = vunpack.c.h.s8.bf16 %v4517_v15  ;;  %v1378_v23 = vunpack.c.l.s8.bf16 %v4520_v21  ;;  %v4522_v32 = vld [vmem:[%s5920_s26 + $0x398] sm:$0xff] }
 0x345   : > { %1484 = vmatprep.mubr.bf16.mxu0 %v1207_v33  ;;  %v1379_v33 = vunpack.c.h.s8.bf16 %v4519_v24 }
 0x346   : > { %4538 = vmatmul.mubr.msk.bf16.vlgmr.msra.gmra.mrb[36].mxu1 %vm461_vm0, %v6166_v27  ;;  %1485 = vmatmul.mubr.bf16.vlgmr.msra.gmra.mrb[0].mxu0 %v1206_v28  ;;  %v1380_v28 = vunpack.c.h.s8.bf16 %v4520_v21 }
 0x347   : > { %1496 = vmatpush1.bf16.msra.mxu0 %v1345_v34  ;;  %1644 = vmatpush1.bf16.msra.mxu1 %v5964_v12  ;;  %v6172_v11 = vpop.f32.mrb[28].mxu1  ;;  %v1349_v12 = vunpack.c.l.s8.bf16 %v4505_v39  ;;  %v1382_v34 = vunpack.c.l.s8.bf16 %v4522_v32 }
 0x348   : > { %1497 = vmatprep.subr.bf16.mxu0 %v1348_v35  ;;  %1675 = vmatprep.mubr.bf16.mxu1 %v5646_v5  ;;  %v1154_v44 = vpop.f32.mrb[29].mxu1  ;;  %v4521_v35 = vld [vmem:[%s5920_s26 + $0x390] sm:$0xff] }
 0x349   : > { %v6176_v46 = vpop.f32.mrb[30].mxu1  ;;  %1686 = vmatprep.subr.bf16.mxu1 %v5967_v13  ;;  %v1381_v36 = vunpack.c.l.s8.bf16 %v4521_v35 }
 0x34a   : > { %v1208_v47 = vpack.c.bf16 %v6176_v46, %v6172_v11  ;;  %v1158_v48 = vpop.f32.mrb[31].mxu1  ;;  %v1383_v11 = vunpack.c.h.s8.bf16 %v4521_v35 }
 0x34b   : > { %1498 = vmatpush1.bf16.msra.mxu0 %v1347_v4  ;;  %v1209_v50 = vpack.c.bf16 %v1158_v48, %v1154_v44  ;;  %v1384_v4 = vunpack.c.h.s8.bf16 %v4522_v32  ;;  %v4523_v44 = vld [vmem:[%s5920_s26 + $0x3a0] sm:$0xff]  ;;  %v4526_v48 = vld [vmem:[%s5920_s26 + $0x3b8] sm:$0xff] }
 0x34c   : > { %1499 = vmatprep.subr.bf16.mxu0 %v1350_v38  ;;  %v4524_v38 = vld [vmem:[%s5920_s26 + $0x3a8] sm:$0xff]  ;;  %v1385_v46 = vunpack.c.l.s8.bf16 %v4523_v44 }
 0x34d   : > { %1527 = vmatprep.mubr.bf16.mxu0 %v1209_v50  ;;  %v1386_v39 = vunpack.c.l.s8.bf16 %v4524_v38  ;;  %v1390_v50 = vunpack.c.l.s8.bf16 %v4526_v48 }
 0x34e   : > { %4539 = vmatmul.mubr.msk.bf16.vlgmr.msra.gmra.mrb[40].mxu1 %vm461_vm0, %v6166_v27 }
 0x34f   : > { %1500 = vmatpush1.bf16.msra.mxu0 %v1349_v12  ;;  %1687 = vmatpush1.bf16.msra.mxu1 %v5979_v16  ;;  %v6185_v13 = vpop.f32.mrb[32].mxu1  ;;  %v1353_v16 = vunpack.c.l.s8.bf16 %v4507_v40  ;;  %v1387_v12 = vunpack.c.h.s8.bf16 %v4523_v44 }
 0x350   : > { %1501 = vmatprep.subr.bf16.mxu0 %v1352_v25  ;;  %1718 = vmatprep.mubr.bf16.mxu1 %v5646_v5  ;;  %v6189_v43 = vpop.f32.mrb[33].mxu1  ;;  %v4525_v25 = vld [vmem:[%s5920_s26 + $0x3b0] sm:$0xff] }
 0x351   : > { %v6191_v45 = vpop.f32.mrb[34].mxu1  ;;  %1729 = vmatprep.subr.bf16.mxu1 %v5981_v17  ;;  %v1358_v17 = vunpack.c.l.s8.bf16 %v4510_v37  ;;  %v1389_v29 = vunpack.c.l.s8.bf16 %v4525_v25  ;;  %v1391_v40 = vunpack.c.h.s8.bf16 %v4525_v25 }
 0x352   : > { %v1210_v56 = vpack.c.bf16 %v6191_v45, %v6185_v13  ;;  %v6196_v58 = vpop.f32.mrb[35].mxu1  ;;  %v4546_v13 = vld [vmem:[%s5920_s26 + $0x420] sm:$0xff] }
 0x353   : > { %1502 = vmatpush1.bf16.msra.mxu0 %v1351_v30  ;;  %v1211_v59 = vpack.c.bf16 %v6196_v58, %v6189_v43  ;;  %v1392_v30 = vunpack.c.h.s8.bf16 %v4526_v48  ;;  %v4527_v58 = vld [vmem:[%s5920_s26 + $0x3c0] sm:$0xff]  ;;  %v1857_v45 = vunpack.c.l.s8.bf16 %v4546_v13 }
 0x354   : > { %1503 = vmatprep.subr.bf16.mxu0 %v1354_v51  ;;  %v4528_v51 = vld [vmem:[%s5920_s26 + $0x3c8] sm:$0xff]  ;;  %v1395_v37 = vunpack.c.h.s8.bf16 %v4527_v58 }
 0x355   : > { %v1394_v43 = vunpack.c.l.s8.bf16 %v4528_v51 }
 0x356   : > { %4540 = vmatmul.mubr.msk.bf16.vlgmr.msra.gmra.mrb[44].mxu1 %vm461_vm0, %v6166_v27 }
 0x357   : > { %1504 = vmatpush1.bf16.msra.mxu0 %v1353_v16  ;;  %1730 = vmatpush1.bf16.msra.mxu1 %v5988_v19  ;;  %v4511_v19 = vld [vmem:[%s5920_s26 + $0x340] sm:$0xff]  ;;  %v1393_v16 = vunpack.c.l.s8.bf16 %v4527_v58 }
 0x358   : > { %1505 = vmatprep.subr.bf16.mxu0 %v1356_v60  ;;  %1761 = vmatprep.mubr.bf16.mxu1 %v5646_v5  ;;  %v1361_v31 = vunpack.c.l.s8.bf16 %v4511_v19  ;;  %v1364_v5 = vunpack.c.h.s8.bf16 %v4512_v26  ;;  %v1363_v55 = vunpack.c.h.s8.bf16 %v4511_v19  ;;  %v4530_v60 = vld [vmem:[%s5920_s26 + $0x3d8] sm:$0xff] }
 0x35b   : > { %1506 = vmatpush1.bf16.msra.mxu0 %v1355_v41  ;;  %v1398_v41 = vunpack.c.l.s8.bf16 %v4530_v60 }
 0x35c   : > { %1507 = vmatprep.subr.bf16.mxu0 %v1358_v17  ;;  %v4529_v17 = vld [vmem:[%s5920_s26 + $0x3d0] sm:$0xff] }
 0x35d   : > { %v1397_v42 = vunpack.c.l.s8.bf16 %v4529_v17  ;;  %v1399_v26 = vunpack.c.h.s8.bf16 %v4529_v17 }
 0x35e   : > { %4541 = vmatmul.mubr.msk.bf16.vlgmr.msra.gmra.mrb[48].mxu1 %vm461_vm0, %v6166_v27  ;;  %v1377_v27 = vunpack.c.l.s8.bf16 %v4519_v24  ;;  %v1859_v24 = vunpack.c.h.s8.bf16 %v4546_v13 }
 0x35f   : > { %1508 = vmatpush1.bf16.msra.mxu0 %v1357_v61  ;;  %v1400_v61 = vunpack.c.h.s8.bf16 %v4530_v60 }
 0x360   : > { %1509 = vmatprep.subr.bf16.mxu0 %v1360_v49  ;;  %v4532_v49 = vld [vmem:[%s5920_s26 + $0x3e8] sm:$0xff] }
 0x363   : > { %1510 = vmatpush1.bf16.msra.mxu0 %v1359_v53  ;;  %v1402_v53 = vunpack.c.l.s8.bf16 %v4532_v49 }
 0x364   : > { %1511 = vmatprep.subr.bf16.mxu0 %v1362_v54  ;;  %v4531_v54 = vld [vmem:[%s5920_s26 + $0x3e0] sm:$0xff] }
 0x365   : > { %v1401_v19 = vunpack.c.l.s8.bf16 %v4531_v54  ;;  %v1403_v52 = vunpack.c.h.s8.bf16 %v4531_v54 }
 0x367   : > { %1512 = vmatpush1.bf16.msra.mxu0 %v1361_v31  ;;  %v1404_v31 = vunpack.c.h.s8.bf16 %v4532_v49 }
 0x368   : > { %1513 = vmatprep.subr.bf16.mxu0 %v1364_v5  ;;  %v4534_v5 = vld [vmem:[%s5920_s26 + $0x3f8] sm:$0xff] }
 0x36b   : > { %1514 = vmatpush1.bf16.msra.mxu0 %v1363_v55  ;;  %v1406_v55 = vunpack.c.l.s8.bf16 %v4534_v5 }
 0x36c   : > { %1515 = vmatprep.subr.bf16.mxu0 %v1366_v57  ;;  %v4533_v57 = vld [vmem:[%s5920_s26 + $0x3f0] sm:$0xff] }
 0x36d   : > { %v1405_v62 = vunpack.c.l.s8.bf16 %v4533_v57  ;;  %v1407_v1 = vunpack.c.h.s8.bf16 %v4533_v57 }
 0x36f   : > { %1516 = vmatpush1.bf16.msra.mxu0 %v1365_v63  ;;  %v1408_v63 = vunpack.c.h.s8.bf16 %v4534_v5 }
 0x370   : > { %1517 = vmatprep.subr.bf16.mxu0 %v1368_v0  ;;  %v4543_v0 = vld [vmem:[%s5920_s26 + $0x408] sm:$0xff] }
 0x373   : > { %1518 = vmatpush1.bf16.msra.mxu0 %v1367_v3  ;;  %v1850_v3 = vunpack.c.l.s8.bf16 %v4543_v0 }
 0x374   : > { %1519 = vmatprep.subr.bf16.mxu0 %v1370_v2  ;;  %v4542_v2 = vld [vmem:[%s5920_s26 + $0x400] sm:$0xff] }
 0x375   : > { %v1849_v6 = vunpack.c.l.s8.bf16 %v4542_v2  ;;  %v1851_v9 = vunpack.c.h.s8.bf16 %v4542_v2 }
 0x377   : > { %1520 = vmatpush1.bf16.msra.mxu0 %v1369_v7  ;;  %v1852_v7 = vunpack.c.h.s8.bf16 %v4543_v0  ;;  %v4561_v0 = vld [vmem:[%s5920_s26 + $0x498] sm:$0xff] }
 0x378   : > { %1521 = vmatprep.subr.bf16.mxu0 %v1372_v8  ;;  %v4545_v8 = vld [vmem:[%s5920_s26 + $0x418] sm:$0xff]  ;;  %v1886_v2 = vunpack.c.l.s8.bf16 %v4561_v0 }
 0x37b   : > { %1522 = vmatpush1.bf16.msra.mxu0 %v1371_v10  ;;  %v1854_v10 = vunpack.c.l.s8.bf16 %v4545_v8 }
 0x37c   : > { %1523 = vmatprep.subr.bf16.mxu0 %v1374_v14  ;;  %v4544_v14 = vld [vmem:[%s5920_s26 + $0x410] sm:$0xff] }
 0x37d   : > { %v1853_v15 = vunpack.c.l.s8.bf16 %v4544_v14  ;;  %v1855_v21 = vunpack.c.h.s8.bf16 %v4544_v14 }
 0x37f   : > { %1524 = vmatpush1.bf16.msra.mxu0 %v1373_v18  ;;  %v1856_v18 = vunpack.c.h.s8.bf16 %v4545_v8 }
 0x380   : > { %1525 = vmatprep.subr.bf16.mxu0 %v1376_v20  ;;  %v4547_v20 = vld [vmem:[%s5920_s26 + $0x428] sm:$0xff] }
 0x383   : > { %1526 = vmatpush1.bf16.msra.mxu0 %v1375_v22  ;;  %v1858_v22 = vunpack.c.l.s8.bf16 %v4547_v20 }
 0x384   : > { %1538 = vmatprep.subr.bf16.mxu0 %v1378_v23  ;;  %v4549_v23 = vld [vmem:[%s5920_s26 + $0x438] sm:$0xff] }
 0x386   : > { %1528 = vmatmul.mubr.bf16.vlgmr.msra.gmra.mrb[0].mxu0 %v1208_v47  ;;  %v1388_v47 = vunpack.c.h.s8.bf16 %v4524_v38 }
 0x387   : > { %1539 = vmatpush1.bf16.msra.mxu0 %v1377_v27  ;;  %1570 = vmatprep.mubr.bf16.mxu0 %v1211_v59  ;;  %v1396_v59 = vunpack.c.h.s8.bf16 %v4528_v51  ;;  %v1862_v27 = vunpack.c.l.s8.bf16 %v4549_v23 }
 0x388   : > { %1540 = vmatprep.subr.bf16.mxu0 %v1380_v28  ;;  %v4548_v28 = vld [vmem:[%s5920_s26 + $0x430] sm:$0xff] }
 0x389   : > { %v1861_v32 = vunpack.c.l.s8.bf16 %v4548_v28  ;;  %v1863_v35 = vunpack.c.h.s8.bf16 %v4548_v28 }
 0x38b   : > { %1541 = vmatpush1.bf16.msra.mxu0 %v1379_v33  ;;  %v1864_v33 = vunpack.c.h.s8.bf16 %v4549_v23 }
 0x38c   : > { %1542 = vmatprep.subr.bf16.mxu0 %v1382_v34  ;;  %v4551_v34 = vld [vmem:[%s5920_s26 + $0x448] sm:$0xff] }
 0x38f   : > { %1543 = vmatpush1.bf16.msra.mxu0 %v1381_v36  ;;  %v1866_v36 = vunpack.c.l.s8.bf16 %v4551_v34 }
 0x390   : > { %1544 = vmatprep.subr.bf16.mxu0 %v1384_v4  ;;  %v4550_v4 = vld [vmem:[%s5920_s26 + $0x440] sm:$0xff] }
 0x391   : > { %v1865_v38 = vunpack.c.l.s8.bf16 %v4550_v4  ;;  %v1867_v44 = vunpack.c.h.s8.bf16 %v4550_v4  ;;  %v4564_v4 = vld [vmem:[%s5920_s26 + $0x4b0] sm:$0xff] }
 0x393   : > { %1545 = vmatpush1.bf16.msra.mxu0 %v1383_v11  ;;  %v1868_v11 = vunpack.c.h.s8.bf16 %v4551_v34  ;;  %v4565_v34 = vld [vmem:[%s5920_s26 + $0x4b8] sm:$0xff] }
 0x394   : > { %1546 = vmatprep.subr.bf16.mxu0 %v1386_v39  ;;  %v4553_v39 = vld [vmem:[%s5920_s26 + $0x458] sm:$0xff] }
 0x397   : > { %1547 = vmatpush1.bf16.msra.mxu0 %v1385_v46  ;;  %v1870_v46 = vunpack.c.l.s8.bf16 %v4553_v39 }
 0x398   : > { %1548 = vmatprep.subr.bf16.mxu0 %v1388_v47  ;;  %v4552_v47 = vld [vmem:[%s5920_s26 + $0x450] sm:$0xff] }
 0x399   : > { %v1869_v48 = vunpack.c.l.s8.bf16 %v4552_v47  ;;  %v1871_v25 = vunpack.c.h.s8.bf16 %v4552_v47  ;;  %v4566_v47 = vld [vmem:[%s5920_s26 + $0x4c0] sm:$0xff] }
 0x39b   : > { %1549 = vmatpush1.bf16.msra.mxu0 %v1387_v12  ;;  %v1872_v12 = vunpack.c.h.s8.bf16 %v4553_v39  ;;  %v4567_v39 = vld [vmem:[%s5920_s26 + $0x4c8] sm:$0xff] }
 0x39c   : > { %1550 = vmatprep.subr.bf16.mxu0 %v1390_v50  ;;  %v4555_v50 = vld [vmem:[%s5920_s26 + $0x468] sm:$0xff] }
 0x39f   : > { %1551 = vmatpush1.bf16.msra.mxu0 %v1389_v29  ;;  %v1874_v29 = vunpack.c.l.s8.bf16 %v4555_v50 }
 0x3a0   : > { %1552 = vmatprep.subr.bf16.mxu0 %v1392_v30  ;;  %v4554_v30 = vld [vmem:[%s5920_s26 + $0x460] sm:$0xff] }
 0x3a1   : > { %v1873_v51 = vunpack.c.l.s8.bf16 %v4554_v30  ;;  %v1875_v58 = vunpack.c.h.s8.bf16 %v4554_v30  ;;  %v4568_v30 = vld [vmem:[%s5920_s26 + $0x4d0] sm:$0xff] }
 0x3a3   : > { %1553 = vmatpush1.bf16.msra.mxu0 %v1391_v40  ;;  %v1876_v40 = vunpack.c.h.s8.bf16 %v4555_v50  ;;  %v4569_v50 = vld [vmem:[%s5920_s26 + $0x4d8] sm:$0xff] }
 0x3a4   : > { %1554 = vmatprep.subr.bf16.mxu0 %v1394_v43  ;;  %v4557_v43 = vld [vmem:[%s5920_s26 + $0x478] sm:$0xff] }
 0x3a7   : > { %1555 = vmatpush1.bf16.msra.mxu0 %v1393_v16  ;;  %v1878_v16 = vunpack.c.l.s8.bf16 %v4557_v43 }
 0x3a8   : > { %1556 = vmatprep.subr.bf16.mxu0 %v1396_v59  ;;  %v4556_v59 = vld [vmem:[%s5920_s26 + $0x470] sm:$0xff] }
 0x3a9   : > { %v1877_v60 = vunpack.c.l.s8.bf16 %v4556_v59  ;;  %v1879_v17 = vunpack.c.h.s8.bf16 %v4556_v59  ;;  %v4570_v59 = vld [vmem:[%s5920_s26 + $0x4e0] sm:$0xff] }
 0x3ab   : > { %1557 = vmatpush1.bf16.msra.mxu0 %v1395_v37  ;;  %v1880_v37 = vunpack.c.h.s8.bf16 %v4557_v43  ;;  %v4571_v43 = vld [vmem:[%s5920_s26 + $0x4e8] sm:$0xff] }
 0x3ac   : > { %1558 = vmatprep.subr.bf16.mxu0 %v1398_v41  ;;  %v4559_v41 = vld [vmem:[%s5920_s26 + $0x488] sm:$0xff] }
 0x3af   : > { %1559 = vmatpush1.bf16.msra.mxu0 %v1397_v42  ;;  %v1882_v42 = vunpack.c.l.s8.bf16 %v4559_v41 }
 0x3b0   : > { %1560 = vmatprep.subr.bf16.mxu0 %v1400_v61 }
 0x3b3   : > { %1561 = vmatpush1.bf16.msra.mxu0 %v1399_v26 }
 0x3b4   : > { %1562 = vmatprep.subr.bf16.mxu0 %v1402_v53 }
 0x3b7   : > { %1563 = vmatpush1.bf16.msra.mxu0 %v1401_v19 }
 0x3b8   : > { %1564 = vmatprep.subr.bf16.mxu0 %v1404_v31  ;;  %v4558_v31 = vld [vmem:[%s5920_s26 + $0x480] sm:$0xff] }
 0x3bb   : > { %1565 = vmatpush1.bf16.msra.mxu0 %v1403_v52 }
 0x3bc   : > { %1566 = vmatprep.subr.bf16.mxu0 %v1406_v55 }
 0x3bf   : > { %1567 = vmatpush1.bf16.msra.mxu0 %v1405_v62  ;;  %v1881_v62 = vunpack.c.l.s8.bf16 %v4558_v31 }
 0x3c0   : > { %1568 = vmatprep.subr.bf16.mxu0 %v1408_v63  ;;  %v1884_v63 = vunpack.c.h.s8.bf16 %v4559_v41  ;;  %v4573_v41 = vld [vmem:[%s5920_s26 + $0x4f8] sm:$0xff] }
 0x3c3   : > { %1569 = vmatpush1.bf16.msra.mxu0 %v1407_v1  ;;  %v1883_v1 = vunpack.c.h.s8.bf16 %v4558_v31 }
 0x3c4   : > { %1977 = vmatprep.subr.bf16.mxu0 %v1850_v3 }
 0x3c6   : > { %1571 = vmatmul.mubr.bf16.vlgmr.msra.gmra.mrb[0].mxu0 %v1210_v56  ;;  %v1860_v56 = vunpack.c.h.s8.bf16 %v4547_v20  ;;  %v4563_v20 = vld [vmem:[%s5920_s26 + $0x4a8] sm:$0xff] }
 0x3c7   : > { %1978 = vmatpush1.bf16.msra.mxu0 %v1849_v6  ;;  %v4560_v6 = vld [vmem:[%s5920_s26 + $0x490] sm:$0xff]  ;;  %v1890_v13 = vunpack.c.l.s8.bf16 %v4563_v20 }
 0x3c8   : > { %1979 = vmatprep.subr.bf16.mxu0 %v1852_v7  ;;  %v1885_v14 = vunpack.c.l.s8.bf16 %v4560_v6 }
 0x3cb   : > { %1980 = vmatpush1.bf16.msra.mxu0 %v1851_v9 }
 0x3cc   : > { %1981 = vmatprep.subr.bf16.mxu0 %v1854_v10 }
 0x3cf   : > { %1982 = vmatpush1.bf16.msra.mxu0 %v1853_v15 }
 0x3d0   : > { %1983 = vmatprep.subr.bf16.mxu0 %v1856_v18  ;;  %v1888_v18 = vunpack.c.h.s8.bf16 %v4561_v0 }
 0x3d3   : > { %1984 = vmatpush1.bf16.msra.mxu0 %v1855_v21  ;;  %v1887_v21 = vunpack.c.h.s8.bf16 %v4560_v6 }
 0x3d4   : > { %1985 = vmatprep.subr.bf16.mxu0 %v1858_v22 }
 0x3d7   : > { %1986 = vmatpush1.bf16.msra.mxu0 %v1857_v45  ;;  %v4562_v45 = vld [vmem:[%s5920_s26 + $0x4a0] sm:$0xff] }
 0x3d8   : > { %1987 = vmatprep.subr.bf16.mxu0 %v1860_v56  ;;  %v1889_v28 = vunpack.c.l.s8.bf16 %v4562_v45 }
 0x3db   : > { %1988 = vmatpush1.bf16.msra.mxu0 %v1859_v24 }
 0x3dc   : > { %1989 = vmatprep.subr.bf16.mxu0 %v1862_v27 }
 0x3df   : > { %1990 = vmatpush1.bf16.msra.mxu0 %v1861_v32 }
 0x3e0   : > { %1991 = vmatprep.subr.bf16.mxu0 %v1864_v33  ;;  %v1892_v33 = vunpack.c.h.s8.bf16 %v4563_v20  ;;  %v4576_v20 = vld [vmem:[%s5920_s26 + $0x510] sm:$0xff] }
 0x3e3   : > { %1992 = vmatpush1.bf16.msra.mxu0 %v1863_v35  ;;  %v1891_v35 = vunpack.c.h.s8.bf16 %v4562_v45  ;;  %v4579_v45 = vld [vmem:[%s5920_s26 + $0x528] sm:$0xff] }
 0x3e4   : > { %1993 = vmatprep.subr.bf16.mxu0 %v1866_v36  ;;  %v1894_v36 = vunpack.c.l.s8.bf16 %v4565_v34 }
 0x3e7   : > { %1994 = vmatpush1.bf16.msra.mxu0 %v1865_v38  ;;  %v1893_v38 = vunpack.c.l.s8.bf16 %v4564_v4 }
 0x3e8   : > { %1995 = vmatprep.subr.bf16.mxu0 %v1868_v11  ;;  %v1896_v11 = vunpack.c.h.s8.bf16 %v4565_v34  ;;  %v4580_v34 = vld [vmem:[%s5920_s26 + $0x530] sm:$0xff] }
 0x3eb   : > { %1996 = vmatpush1.bf16.msra.mxu0 %v1867_v44  ;;  %v1895_v44 = vunpack.c.h.s8.bf16 %v4564_v4  ;;  %v4583_v4 = vld [vmem:[%s5920_s26 + $0x548] sm:$0xff] }
 0x3ec   : > { %1997 = vmatprep.subr.bf16.mxu0 %v1870_v46  ;;  %v1898_v46 = vunpack.c.l.s8.bf16 %v4567_v39 }
 0x3ef   : > { %1998 = vmatpush1.bf16.msra.mxu0 %v1869_v48  ;;  %v1897_v48 = vunpack.c.l.s8.bf16 %v4566_v47 }
 0x3f0   : > { %1999 = vmatprep.subr.bf16.mxu0 %v1872_v12  ;;  %v1900_v12 = vunpack.c.h.s8.bf16 %v4567_v39  ;;  %v4582_v39 = vld [vmem:[%s5920_s26 + $0x540] sm:$0xff] }
 0x3f3   : > { %2000 = vmatpush1.bf16.msra.mxu0 %v1871_v25  ;;  %v1899_v25 = vunpack.c.h.s8.bf16 %v4566_v47  ;;  %v4585_v47 = vld [vmem:[%s5920_s26 + $0x558] sm:$0xff] }
 0x3f4   : > { %2001 = vmatprep.subr.bf16.mxu0 %v1874_v29  ;;  %v1902_v29 = vunpack.c.l.s8.bf16 %v4569_v50 }
 0x3f7   : > { %2002 = vmatpush1.bf16.msra.mxu0 %v1873_v51  ;;  %v1901_v51 = vunpack.c.l.s8.bf16 %v4568_v30 }
 0x3f8   : > { %2003 = vmatprep.subr.bf16.mxu0 %v1876_v40  ;;  %v1904_v40 = vunpack.c.h.s8.bf16 %v4569_v50  ;;  %v4584_v50 = vld [vmem:[%s5920_s26 + $0x550] sm:$0xff] }
 0x3fb   : > { %2004 = vmatpush1.bf16.msra.mxu0 %v1875_v58  ;;  %v1903_v58 = vunpack.c.h.s8.bf16 %v4568_v30  ;;  %v4587_v30 = vld [vmem:[%s5920_s26 + $0x568] sm:$0xff] }
 0x3fc   : > { %2005 = vmatprep.subr.bf16.mxu0 %v1878_v16  ;;  %v1906_v16 = vunpack.c.l.s8.bf16 %v4571_v43 }
 0x3ff   : > { %2006 = vmatpush1.bf16.msra.mxu0 %v1877_v60  ;;  %v1905_v60 = vunpack.c.l.s8.bf16 %v4570_v59 }
 0x400   : > { %2007 = vmatprep.subr.bf16.mxu0 %v1880_v37  ;;  %v1908_v37 = vunpack.c.h.s8.bf16 %v4571_v43  ;;  %v4586_v43 = vld [vmem:[%s5920_s26 + $0x560] sm:$0xff] }
 0x403   : > { %2008 = vmatpush1.bf16.msra.mxu0 %v1879_v17  ;;  %v1907_v17 = vunpack.c.h.s8.bf16 %v4570_v59  ;;  %v4589_v59 = vld [vmem:[%s5920_s26 + $0x578] sm:$0xff] }
 0x404   : > { %2020 = vmatprep.subr.bf16.mxu0 %v1882_v42  ;;  %v1910_v42 = vunpack.c.l.s8.bf16 %v4573_v41 }
 0x411   : > { %v6258_v61 = vpop.f32.mrb[16].mxu1 }
 0x412   : > { %v6260_v49 = vpop.f32.mrb[17].mxu1 }
 0x413   : > { %v6262_v26 = vpop.f32.mrb[18].mxu1 }
 0x414   : > { %v6264_v53 = vpop.f32.mrb[19].mxu1 }
 0x419   : > { %v1634_v54 = vpop.f32.mrb[36].mxu1 }
 0x41a   : > { %v1636_v19 = vpop.f32.mrb[37].mxu1 }
 0x41b   : > { %v1638_v5 = vpop.f32.mrb[38].mxu1 }
 0x41c   : > { %v1772_v52 = vpack.c.bf16 %v1638_v5, %v1634_v54  ;;  %v1640_v55 = vpop.f32.mrb[39].mxu1  ;;  %v4572_v54 = vld [vmem:[%s5920_s26 + $0x4f0] sm:$0xff]  ;;  %v1912_v5 = vunpack.c.h.s8.bf16 %v4573_v41 }
 0x41d   : > { %v1773_v57 = vpack.c.bf16 %v1640_v55, %v1636_v19  ;;  %v1909_v19 = vunpack.c.l.s8.bf16 %v4572_v54  ;;  %v4575_v55 = vld [vmem:[%s5920_s26 + $0x508] sm:$0xff]  ;;  %v4588_v41 = vld [vmem:[%s5920_s26 + $0x570] sm:$0xff] }
 0x41f   : > { %2009 = vmatprep.mubr.bf16.mxu0 %v1773_v57 }
 0x420   : > { %2010 = vmatmul.mubr.bf16.vlgmr.msra.gmra.mrb[0].mxu0 %v1772_v52 }
 0x421   : > { %2021 = vmatpush1.bf16.msra.mxu0 %v1881_v62  ;;  %v6268_v3 = vpop.f32.mrb[40].mxu1 }
 0x422   : > { %2022 = vmatprep.subr.bf16.mxu0 %v1884_v63  ;;  %v1679_v7 = vpop.f32.mrb[41].mxu1  ;;  %v1911_v63 = vunpack.c.h.s8.bf16 %v4572_v54  ;;  %v4591_v54 = vld [vmem:[%s5920_s26 + $0x588] sm:$0xff] }
 0x423   : > { %v6271_v8 = vpop.f32.mrb[42].mxu1 }
 0x424   : > { %v1774_v9 = vpack.c.bf16 %v6271_v8, %v6268_v3  ;;  %v1683_v10 = vpop.f32.mrb[43].mxu1  ;;  %v1919_v3 = vunpack.c.h.s8.bf16 %v4576_v20  ;;  %v1922_v8 = vunpack.c.l.s8.bf16 %v4579_v45 }
 0x425   : > { %2023 = vmatpush1.bf16.msra.mxu0 %v1883_v1  ;;  %v1775_v15 = vpack.c.bf16 %v1683_v10, %v1679_v7  ;;  %v1914_v1 = vunpack.c.l.s8.bf16 %v4575_v55  ;;  %v1916_v10 = vunpack.c.h.s8.bf16 %v4575_v55  ;;  %v4590_v55 = vld [vmem:[%s5920_s26 + $0x580] sm:$0xff] }
 0x426   : > { %2024 = vmatprep.subr.bf16.mxu0 %v1886_v2  ;;  %v4574_v2 = vld [vmem:[%s5920_s26 + $0x500] sm:$0xff] }
 0x427   : > { %2052 = vmatprep.mubr.bf16.mxu0 %v1775_v15  ;;  %v1913_v7 = vunpack.c.l.s8.bf16 %v4574_v2  ;;  %v1915_v15 = vunpack.c.h.s8.bf16 %v4574_v2  ;;  %v4593_v2 = vld [vmem:[%s5920_s26 + $0x598] sm:$0xff] }
 0x429   : > { %2025 = vmatpush1.bf16.msra.mxu0 %v1885_v14  ;;  %v6276_v22 = vpop.f32.mrb[44].mxu1  ;;  %v4577_v14 = vld [vmem:[%s5920_s26 + $0x518] sm:$0xff] }
 0x42a   : > { %2026 = vmatprep.subr.bf16.mxu0 %v1888_v18  ;;  %v6279_v56 = vpop.f32.mrb[45].mxu1  ;;  %v1918_v18 = vunpack.c.l.s8.bf16 %v4577_v14 }
 0x42b   : > { %v6281_v23 = vpop.f32.mrb[46].mxu1 }
 0x42c   : > { %v1776_v24 = vpack.c.bf16 %v6281_v23, %v6276_v22  ;;  %v6285_v27 = vpop.f32.mrb[47].mxu1 }
 0x42d   : > { %2027 = vmatpush1.bf16.msra.mxu0 %v1887_v21  ;;  %v1777_v32 = vpack.c.bf16 %v6285_v27, %v6279_v56  ;;  %v1917_v21 = vunpack.c.l.s8.bf16 %v4576_v20  ;;  %v1924_v56 = vunpack.c.h.s8.bf16 %v4579_v45  ;;  %v4581_v27 = vld [vmem:[%s5920_s26 + $0x538] sm:$0xff]  ;;  %v4595_v20 = vld [vmem:[%s5920_s26 + $0x5a8] sm:$0xff]  ;;  %v4596_v45 = vld [vmem:[%s5920_s26 + $0x5b0] sm:$0xff] }
 0x42e   : > { %2028 = vmatprep.subr.bf16.mxu0 %v1890_v13  ;;  %v1920_v13 = vunpack.c.h.s8.bf16 %v4577_v14  ;;  %v4592_v14 = vld [vmem:[%s5920_s26 + $0x590] sm:$0xff]  ;;  %v1954_v23 = vunpack.c.l.s8.bf16 %v4595_v20 }
 0x42f   : > { %v1951_v22 = vunpack.c.h.s8.bf16 %v4592_v14 }
 0x431   : > { %2029 = vmatpush1.bf16.msra.mxu0 %v1889_v28  ;;  %v6299_v31 = vpop.f32.mrb[48].mxu1 }
 0x432   : > { %2030 = vmatprep.subr.bf16.mxu0 %v1892_v33  ;;  %v6301_v52 = vpop.f32.mrb[49].mxu1  ;;  %v1926_v33 = vunpack.c.l.s8.bf16 %v4581_v27 }
 0x433   : > { %v6304_v57 = vpop.f32.mrb[50].mxu1 }
 0x434   : > { %v1778_v62 = vpack.c.bf16 %v6304_v57, %v6299_v31  ;;  %v6308_v0 = vpop.f32.mrb[51].mxu1 }
 0x435   : > { %2031 = vmatpush1.bf16.msra.mxu0 %v1891_v35  ;;  %v1779_v6 = vpack.c.bf16 %v6308_v0, %v6301_v52  ;;  %v1925_v35 = vunpack.c.l.s8.bf16 %v4580_v34  ;;  %v1956_v52 = vunpack.c.h.s8.bf16 %v4595_v20  ;;  %v4597_v0 = vld [vmem:[%s5920_s26 + $0x5b8] sm:$0xff] }
 0x436   : > { %2032 = vmatprep.subr.bf16.mxu0 %v1894_v36  ;;  %v1928_v36 = vunpack.c.h.s8.bf16 %v4581_v27  ;;  %v4598_v27 = vld [vmem:[%s5920_s26 + $0x5c0] sm:$0xff]  ;;  %v5205_v20 = vld [vmem:[%s6957_s6 + $0x58] ss:$20 sps:$4 sm:$0xff] (!%p4606_p12)  }
 0x439   : > { %2033 = vmatpush1.bf16.msra.mxu0 %v1893_v38  ;;  %v1927_v38 = vunpack.c.h.s8.bf16 %v4580_v34  ;;  %v4601_v34 = vld [vmem:[%s5920_s26 + $0x5d8] sm:$0xff] }
 0x43a   : > { %2034 = vmatprep.subr.bf16.mxu0 %v1896_v11  ;;  %v1930_v11 = vunpack.c.l.s8.bf16 %v4583_v4 }
 0x43d   : > { %2035 = vmatpush1.bf16.msra.mxu0 %v1895_v44  ;;  %v1929_v44 = vunpack.c.l.s8.bf16 %v4582_v39 }
 0x43e   : > { %2036 = vmatprep.subr.bf16.mxu0 %v1898_v46  ;;  %v1932_v46 = vunpack.c.h.s8.bf16 %v4583_v4  ;;  %v4600_v4 = vld [vmem:[%s5920_s26 + $0x5d0] sm:$0xff] }
 0x441   : > { %2037 = vmatpush1.bf16.msra.mxu0 %v1897_v48  ;;  %v1931_v48 = vunpack.c.h.s8.bf16 %v4582_v39  ;;  %v4603_v39 = vld [vmem:[%s5920_s26 + $0x5e8] sm:$0xff] }
 0x442   : > { %2038 = vmatprep.subr.bf16.mxu0 %v1900_v12  ;;  %v1934_v12 = vunpack.c.l.s8.bf16 %v4585_v47 }
 0x445   : > { %2039 = vmatpush1.bf16.msra.mxu0 %v1899_v25  ;;  %v1933_v25 = vunpack.c.l.s8.bf16 %v4584_v50 }
 0x446   : > { %2040 = vmatprep.subr.bf16.mxu0 %v1902_v29  ;;  %v1936_v29 = vunpack.c.h.s8.bf16 %v4585_v47  ;;  %v4602_v47 = vld [vmem:[%s5920_s26 + $0x5e0] sm:$0xff] }
 0x449   : > { %2041 = vmatpush1.bf16.msra.mxu0 %v1901_v51  ;;  %v1935_v51 = vunpack.c.h.s8.bf16 %v4584_v50  ;;  %v4605_v50 = vld [vmem:[%s5920_s26 + $0x5f8] sm:$0xff] }
 0x44a   : > { %2042 = vmatprep.subr.bf16.mxu0 %v1904_v40  ;;  %v1938_v40 = vunpack.c.l.s8.bf16 %v4587_v30 }
 0x44d   : > { %2043 = vmatpush1.bf16.msra.mxu0 %v1903_v58  ;;  %v1937_v58 = vunpack.c.l.s8.bf16 %v4586_v43 }
 0x44e   : > { %2044 = vmatprep.subr.bf16.mxu0 %v1906_v16  ;;  %v1940_v16 = vunpack.c.h.s8.bf16 %v4587_v30  ;;  %v4604_v30 = vld [vmem:[%s5920_s26 + $0x5f0] sm:$0xff] }
 0x451   : > { %2045 = vmatpush1.bf16.msra.mxu0 %v1905_v60  ;;  %v1939_v60 = vunpack.c.h.s8.bf16 %v4586_v43  ;;  %v1975_v43 = vunpack.c.h.s8.bf16 %v4604_v30 }
 0x452   : > { %2046 = vmatprep.subr.bf16.mxu0 %v1908_v37  ;;  %v1942_v37 = vunpack.c.l.s8.bf16 %v4589_v59 }
 0x455   : > { %2047 = vmatpush1.bf16.msra.mxu0 %v1907_v17  ;;  %v1941_v17 = vunpack.c.l.s8.bf16 %v4588_v41 }
 0x456   : > { %2048 = vmatprep.subr.bf16.mxu0 %v1910_v42  ;;  %v1944_v42 = vunpack.c.h.s8.bf16 %v4589_v59  ;;  %v647_v59 = vld [vmem:[#allocation2 + $0x10] sm:$0xff] }
 0x459   : > { %2049 = vmatpush1.bf16.msra.mxu0 %v1909_v19  ;;  %v1943_v19 = vunpack.c.h.s8.bf16 %v4588_v41 }
 0x45a   : > { %2050 = vmatprep.subr.bf16.mxu0 %v1912_v5  ;;  %v1946_v5 = vunpack.c.l.s8.bf16 %v4591_v54 }
 0x45d   : > { %2051 = vmatpush1.bf16.msra.mxu0 %v1911_v63  ;;  %v1945_v63 = vunpack.c.l.s8.bf16 %v4590_v55 }
 0x45e   : > { %2063 = vmatprep.subr.bf16.mxu0 %v1914_v1  ;;  %v1948_v1 = vunpack.c.h.s8.bf16 %v4591_v54 }
 0x460   : > { %2053 = vmatmul.mubr.bf16.vlgmr.msra.gmra.mrb[0].mxu0 %v1774_v9  ;;  %v4578_v9 = vld [vmem:[%s5920_s26 + $0x520] sm:$0xff] }
 0x461   : > { %2064 = vmatpush1.bf16.msra.mxu0 %v1913_v7  ;;  %2095 = vmatprep.mubr.bf16.mxu0 %v1777_v32  ;;  %v1921_v28 = vunpack.c.l.s8.bf16 %v4578_v9  ;;  %v1923_v32 = vunpack.c.h.s8.bf16 %v4578_v9  ;;  %v1947_v7 = vunpack.c.h.s8.bf16 %v4590_v55  ;;  %v4599_v9 = vld [vmem:[%s5920_s26 + $0x5c8] sm:$0xff] }
 0x462   : > { %2065 = vmatprep.subr.bf16.mxu0 %v1916_v10  ;;  %v1950_v10 = vunpack.c.l.s8.bf16 %v4593_v2 }
 0x465   : > { %2066 = vmatpush1.bf16.msra.mxu0 %v1915_v15  ;;  %v1949_v15 = vunpack.c.l.s8.bf16 %v4592_v14  ;;  %v5200_v14 = vld [vmem:[%s6957_s6 + $0x54] ss:$20 sps:$4 sm:$0xff] (!%p4606_p12)  }
 0x466   : > { %2067 = vmatprep.subr.bf16.mxu0 %v1918_v18  ;;  %v1952_v18 = vunpack.c.h.s8.bf16 %v4593_v2  ;;  %v5196_v2 = vld [vmem:[%s6957_s6 + $0x34] ss:$20 sps:$4 sm:$0xff] (!%p4606_p12)  }
 0x469   : > { %2068 = vmatpush1.bf16.msra.mxu0 %v1917_v21 }
 0x46a   : > { %2069 = vmatprep.subr.bf16.mxu0 %v1920_v13  ;;  %v1958_v13 = vunpack.c.l.s8.bf16 %v4597_v0 }
 0x46d   : > { %2070 = vmatpush1.bf16.msra.mxu0 %v1919_v3  ;;  %v1957_v3 = vunpack.c.l.s8.bf16 %v4596_v45 }
 0x46e   : > { %2071 = vmatprep.subr.bf16.mxu0 %v1922_v8  ;;  %v1960_v8 = vunpack.c.h.s8.bf16 %v4597_v0  ;;  %v5214_v0 = vld [vmem:[%s6957_s6 + $0xac] ss:$20 sps:$4 sm:$0xff] (!%p4606_p12)  }
 0x471   : > { %2072 = vmatpush1.bf16.msra.mxu0 %v1921_v28  ;;  %v1959_v28 = vunpack.c.h.s8.bf16 %v4596_v45  ;;  %v5218_v45 = vld [vmem:[%s6957_s6 + $0xcc] ss:$20 sps:$4 sm:$0xff] (!%p4606_p12)  }
 0x472   : > { %2073 = vmatprep.subr.bf16.mxu0 %v1924_v56  ;;  %v1962_v56 = vunpack.c.l.s8.bf16 %v4599_v9 }
 0x475   : > { %2074 = vmatpush1.bf16.msra.mxu0 %v1923_v32  ;;  %v1961_v32 = vunpack.c.l.s8.bf16 %v4598_v27 }
 0x476   : > { %2075 = vmatprep.subr.bf16.mxu0 %v1926_v33  ;;  %v1964_v33 = vunpack.c.h.s8.bf16 %v4599_v9  ;;  %v5223_v9 = vld [vmem:[%s6957_s6 + $0xd0] ss:$20 sps:$4 sm:$0xff] (!%p4606_p12)  }
 0x479   : > { %2076 = vmatpush1.bf16.msra.mxu0 %v1925_v35  ;;  %v1963_v35 = vunpack.c.h.s8.bf16 %v4598_v27  ;;  %v5228_v27 = vld [vmem:[%s6957_s6 + $0xf0] ss:$20 sps:$4 sm:$0xff] (!%p4606_p12)  }
 0x47a   : > { %2077 = vmatprep.subr.bf16.mxu0 %v1928_v36  ;;  %v1966_v36 = vunpack.c.l.s8.bf16 %v4601_v34 }
 0x47d   : > { %2078 = vmatpush1.bf16.msra.mxu0 %v1927_v38  ;;  %v1965_v38 = vunpack.c.l.s8.bf16 %v4600_v4 }
 0x47e   : > { %2079 = vmatprep.subr.bf16.mxu0 %v1930_v11  ;;  %v1968_v11 = vunpack.c.h.s8.bf16 %v4601_v34  ;;  %v5232_v34 = vld [vmem:[%s6957_s6 + $0x124] ss:$20 sps:$4 sm:$0xff] (!%p4606_p12)  }
 0x481   : > { %2080 = vmatpush1.bf16.msra.mxu0 %v1929_v44  ;;  %v1967_v44 = vunpack.c.h.s8.bf16 %v4600_v4  ;;  %v5236_v4 = vld [vmem:[%s6957_s6 + $0x144] ss:$20 sps:$4 sm:$0xff] (!%p4606_p12)  }
 0x482   : > { %2081 = vmatprep.subr.bf16.mxu0 %v1932_v46  ;;  %v1970_v46 = vunpack.c.l.s8.bf16 %v4603_v39 }
 0x485   : > { %2082 = vmatpush1.bf16.msra.mxu0 %v1931_v48  ;;  %v1969_v48 = vunpack.c.l.s8.bf16 %v4602_v47 }
 0x486   : > { %2083 = vmatprep.subr.bf16.mxu0 %v1934_v12  ;;  %v1972_v12 = vunpack.c.h.s8.bf16 %v4603_v39  ;;  %v5241_v39 = vld [vmem:[%s6957_s6 + $0x148] ss:$20 sps:$4 sm:$0xff] (!%p4606_p12)  }
 0x489   : > { %2084 = vmatpush1.bf16.msra.mxu0 %v1933_v25  ;;  %v1971_v25 = vunpack.c.h.s8.bf16 %v4602_v47  ;;  %v5244_v47 = vld [vmem:[%s6957_s6 + $0x174] ss:$20 sps:$4 sm:$0xff] (!%p4606_p12)  }
 0x48a   : > { %2085 = vmatprep.subr.bf16.mxu0 %v1936_v29  ;;  %v1974_v29 = vunpack.c.l.s8.bf16 %v4605_v50 }
 0x48d   : > { %2086 = vmatpush1.bf16.msra.mxu0 %v1935_v51  ;;  %v1973_v51 = vunpack.c.l.s8.bf16 %v4604_v30  ;;  %v5252_v30 = vld [vmem:[%s6957_s6 + $0x190] ss:$20 sps:$4 sm:$0xff] (!%p4606_p12)  }
 0x48e   : > { %2087 = vmatprep.subr.bf16.mxu0 %v1938_v40  ;;  %v1976_v40 = vunpack.c.h.s8.bf16 %v4605_v50  ;;  %v5248_v50 = vld [vmem:[%s6957_s6 + $0x194] ss:$20 sps:$4 sm:$0xff] (!%p4606_p12)  }
 0x491   : > { %2088 = vmatpush1.bf16.msra.mxu0 %v1937_v58  ;;  %v645_v58 = vld [vmem:[#allocation2] sm:$0xff] }
 0x492   : > { %2089 = vmatprep.subr.bf16.mxu0 %v1940_v16  ;;  %v646_v16 = vld [vmem:[#allocation2 + $0x8] sm:$0xff] }
 0x493   : > { %v4987_v41 = vadd.f32 %v6260_v49, %v646_v16  ;;  %v5190_v49 = vld [vmem:[%s6957_s6 + $0xc] ss:$20 sps:$4 sm:$0xff] (!%p4606_p12)  }
 0x494   : > { %3331 = vmatprep.subr.bf16.mxu1 (!%p4606_p12), %v5190_v49  ;;  %v5258_v16 = vld [vmem:[%s6957_s6 + $0x1b8] ss:$20 sps:$4 sm:$0xff] (!%p4606_p12)  }
 0x495   : > { %2090 = vmatpush1.bf16.msra.mxu0 %v1939_v60  ;;  %v4981_v60 = vadd.f32 %v6258_v61, %v645_v58  ;;  %v5188_v61 = vld [vmem:[%s6957_s6 + $0x4] ss:$20 sps:$4 sm:$0xff] (!%p4606_p12)  }
 0x496   : > { %2091 = vmatprep.subr.bf16.mxu0 %v1942_v37  ;;  %v648_v37 = vld [vmem:[#allocation2 + $0x18] sm:$0xff] }
 0x497   : > { %v5256_v58 = vld [vmem:[%s6957_s6 + $0x1c4] ss:$20 sps:$4 sm:$0xff] (!%p4606_p12)  }
 0x499   : > { %2092 = vmatpush1.bf16.msra.mxu0 %v1941_v17 }
 0x49a   : > { %2093 = vmatprep.subr.bf16.mxu0 %v1944_v42  ;;  %v4993_v42 = vadd.f32 %v6262_v26, %v647_v59  ;;  %v5192_v26 = vld [vmem:[%s6957_s6] ss:$20 sps:$4 sm:$0xff] (!%p4606_p12)  }
 0x49d   : > { %2094 = vmatpush1.bf16.msra.mxu0 %v1943_v19 }
 0x49e   : > { %2106 = vmatprep.subr.bf16.mxu0 %v1946_v5  ;;  %v4999_v5 = vadd.f32 %v6264_v53, %v648_v37  ;;  %v5193_v53 = vld [vmem:[%s6957_s6 + $0x8] ss:$20 sps:$4 sm:$0xff] (!%p4606_p12)   ;;  %v2165_v37 = vld [vmem:[#allocation8] sm:$0x3] (!%p4606_p12) }
 0x49f   : > { %3332 = vmatpush1.bf16.msra.mxu1 (!%p4606_p12), %v5193_v53  ;;  %v5272_v53 = vld [vmem:[%s6957_s6 + $0x234] ss:$20 sps:$4 sm:$0xff] (!%p4606_p12)  }
 0x4a0   : > { %2096 = vmatmul.mubr.bf16.vlgmr.msra.gmra.mrb[0].mxu0 %v1776_v24  ;;  %v4594_v24 = vld [vmem:[%s5920_s26 + $0x5a0] sm:$0xff]  ;;  %3333 = vmatprep.subr.bf16.mxu1 (!%p4606_p12), %v5196_v2 }
 0x4a1   : > { %2107 = vmatpush1.bf16.msra.mxu0 %v1945_v63  ;;  %2138 = vmatprep.mubr.bf16.mxu0 %v1779_v6  ;;  %v1953_v21 = vunpack.c.l.s8.bf16 %v4594_v24  ;;  %v1955_v6 = vunpack.c.h.s8.bf16 %v4594_v24  ;;  %v5210_v24 = vld [vmem:[%s6957_s6 + $0x78] ss:$20 sps:$4 sm:$0xff] (!%p4606_p12)   ;;  %v5276_v2 = vld [vmem:[%s6957_s6 + $0x230] ss:$20 sps:$4 sm:$0xff] (!%p4606_p12)  }
 0x4a2   : > { %2108 = vmatprep.subr.bf16.mxu0 %v1948_v1  ;;  %v5194_v1 = vld [vmem:[%s6957_s6 + $0x2c] ss:$20 sps:$4 sm:$0xff] (!%p4606_p12)  }
 0x4a5   : > { %2109 = vmatpush1.bf16.msra.mxu0 %v1947_v7  ;;  %v5198_v7 = vld [vmem:[%s6957_s6 + $0x28] ss:$20 sps:$4 sm:$0xff] (!%p4606_p12)  }
 0x4a6   : > { %2110 = vmatprep.subr.bf16.mxu0 %v1950_v10  ;;  %v5199_v10 = vld [vmem:[%s6957_s6 + $0x30] ss:$20 sps:$4 sm:$0xff] (!%p4606_p12)  }
 0x4a7   : > { %3334 = vmatpush1.bf16.msra.mxu1 (!%p4606_p12), %v5199_v10 }
 0x4a9   : > { %2111 = vmatpush1.bf16.msra.mxu0 %v1949_v15  ;;  %v5202_v15 = vld [vmem:[%s6957_s6 + $0x5c] ss:$20 sps:$4 sm:$0xff] (!%p4606_p12)  }
 0x4aa   : > { %2112 = vmatprep.subr.bf16.mxu0 %v1952_v18  ;;  %v5204_v18 = vld [vmem:[%s6957_s6 + $0x50] ss:$20 sps:$4 sm:$0xff] (!%p4606_p12)   ;;  %3335 = vmatprep.subr.bf16.mxu1 (!%p4606_p12), %v5202_v15 }
 0x4ab   : > { %3336 = vmatpush1.bf16.msra.mxu1 (!%p4606_p12), %v5205_v20  ;;  %v5280_v20 = vld [vmem:[%s6957_s6 + $0x264] ss:$20 sps:$4 sm:$0xff] (!%p4606_p12)  }
 0x4ad   : > { %2113 = vmatpush1.bf16.msra.mxu0 %v1951_v22  ;;  %v5206_v22 = vld [vmem:[%s6957_s6 + $0x7c] ss:$20 sps:$4 sm:$0xff] (!%p4606_p12)  }
 0x4ae   : > { %2114 = vmatprep.subr.bf16.mxu0 %v1954_v23  ;;  %v5208_v23 = vld [vmem:[%s6957_s6 + $0x84] ss:$20 sps:$4 sm:$0xff] (!%p4606_p12)  }
 0x4af   : > { %3337 = vmatprep.subr.bf16.mxu1 (!%p4606_p12), %v5208_v23 }
 0x4b1   : > { %2115 = vmatpush1.bf16.msra.mxu0 %v1953_v21  ;;  %v5211_v21 = vld [vmem:[%s6957_s6 + $0x80] ss:$20 sps:$4 sm:$0xff] (!%p4606_p12)  }
 0x4b2   : > { %2116 = vmatprep.subr.bf16.mxu0 %v1956_v52  ;;  %v5212_v52 = vld [vmem:[%s6957_s6 + $0xa4] ss:$20 sps:$4 sm:$0xff] (!%p4606_p12)   ;;  %3338 = vmatpush1.bf16.msra.mxu1 (!%p4606_p12), %v5211_v21  ;;  %v5283_v21 = vld [vmem:[%s6957_s6 + $0x260] ss:$20 sps:$4 sm:$0xff] (!%p4606_p12)  }
 0x4b3   : > { %3339 = vmatprep.subr.bf16.mxu1 (!%p4606_p12), %v5214_v0  ;;  %v5289_v0 = vld [vmem:[%s6957_s6 + $0x28c] ss:$20 sps:$4 sm:$0xff] (!%p4606_p12)  }
 0x4b5   : > { %2117 = vmatpush1.bf16.msra.mxu0 %v1955_v6  ;;  %v5216_v6 = vld [vmem:[%s6957_s6 + $0xa0] ss:$20 sps:$4 sm:$0xff] (!%p4606_p12)  }
 0x4b6   : > { %2118 = vmatprep.subr.bf16.mxu0 %v1958_v13  ;;  %v5217_v13 = vld [vmem:[%s6957_s6 + $0xa8] ss:$20 sps:$4 sm:$0xff] (!%p4606_p12)  }
 0x4b7   : > { %3340 = vmatpush1.bf16.msra.mxu1 (!%p4606_p12), %v5217_v13 }
 0x4b9   : > { %2119 = vmatpush1.bf16.msra.mxu0 %v1957_v3  ;;  %v5220_v3 = vld [vmem:[%s6957_s6 + $0xd4] ss:$20 sps:$4 sm:$0xff] (!%p4606_p12)  }
 0x4ba   : > { %2120 = vmatprep.subr.bf16.mxu0 %v1960_v8  ;;  %v5222_v8 = vld [vmem:[%s6957_s6 + $0xc8] ss:$20 sps:$4 sm:$0xff] (!%p4606_p12)   ;;  %3341 = vmatprep.subr.bf16.mxu1 (!%p4606_p12), %v5220_v3  ;;  %v5292_v3 = vld [vmem:[%s6957_s6 + $0x2ac] ss:$20 sps:$4 sm:$0xff] (!%p4606_p12)  }
 0x4bb   : > { %3342 = vmatpush1.bf16.msra.mxu1 (!%p4606_p12), %v5223_v9  ;;  %v5290_v9 = vld [vmem:[%s6957_s6 + $0x2a8] ss:$20 sps:$4 sm:$0xff] (!%p4606_p12)  }
 0x4bd   : > { %2121 = vmatpush1.bf16.msra.mxu0 %v1959_v28  ;;  %v5224_v28 = vld [vmem:[%s6957_s6 + $0xf4] ss:$20 sps:$4 sm:$0xff] (!%p4606_p12)  }
 0x4be   : > { %2122 = vmatprep.subr.bf16.mxu0 %v1962_v56  ;;  %v5226_v56 = vld [vmem:[%s6957_s6 + $0xfc] ss:$20 sps:$4 sm:$0xff] (!%p4606_p12)  }
 0x4bf   : > { %3343 = vmatprep.subr.bf16.mxu1 (!%p4606_p12), %v5226_v56  ;;  %v5298_v56 = vld [vmem:[%s6957_s6 + $0x2d4] ss:$20 sps:$4 sm:$0xff] (!%p4606_p12)  }
 0x4c1   : > { %2123 = vmatpush1.bf16.msra.mxu0 %v1961_v32  ;;  %v5229_v32 = vld [vmem:[%s6957_s6 + $0xf8] ss:$20 sps:$4 sm:$0xff] (!%p4606_p12)  }
 0x4c2   : > { %2124 = vmatprep.subr.bf16.mxu0 %v1964_v33  ;;  %v5230_v33 = vld [vmem:[%s6957_s6 + $0x11c] ss:$20 sps:$4 sm:$0xff] (!%p4606_p12)   ;;  %3344 = vmatpush1.bf16.msra.mxu1 (!%p4606_p12), %v5229_v32 }
 0x4c3   : > { %3345 = vmatprep.subr.bf16.mxu1 (!%p4606_p12), %v5232_v34  ;;  %v5296_v32 = vld [vmem:[%s6957_s6 + $0x2d0] ss:$20 sps:$4 sm:$0xff] (!%p4606_p12)  }
 0x4c4   : > { %v5304_v34 = vld [vmem:[%s6957_s6 + $0x2fc] ss:$20 sps:$4 sm:$0xff] (!%p4606_p12)  }
 0x4c5   : > { %2125 = vmatpush1.bf16.msra.mxu0 %v1963_v35  ;;  %v5234_v35 = vld [vmem:[%s6957_s6 + $0x118] ss:$20 sps:$4 sm:$0xff] (!%p4606_p12)  }
 0x4c6   : > { %2126 = vmatprep.subr.bf16.mxu0 %v1966_v36  ;;  %v5235_v36 = vld [vmem:[%s6957_s6 + $0x120] ss:$20 sps:$4 sm:$0xff] (!%p4606_p12)  }
 0x4c7   : > { %3346 = vmatpush1.bf16.msra.mxu1 (!%p4606_p12), %v5235_v36  ;;  %v5302_v36 = vld [vmem:[%s6957_s6 + $0x2f8] ss:$20 sps:$4 sm:$0xff] (!%p4606_p12)  }
 0x4c9   : > { %2127 = vmatpush1.bf16.msra.mxu0 %v1965_v38  ;;  %v5238_v38 = vld [vmem:[%s6957_s6 + $0x14c] ss:$20 sps:$4 sm:$0xff] (!%p4606_p12)  }
 0x4ca   : > { %2128 = vmatprep.subr.bf16.mxu0 %v1968_v11  ;;  %v5240_v11 = vld [vmem:[%s6957_s6 + $0x140] ss:$20 sps:$4 sm:$0xff] (!%p4606_p12)   ;;  %3347 = vmatprep.subr.bf16.mxu1 (!%p4606_p12), %v5238_v38  ;;  %v5310_v38 = vld [vmem:[%s6957_s6 + $0x324] ss:$20 sps:$4 sm:$0xff] (!%p4606_p12)  }
 0x4cb   : > { %3348 = vmatpush1.bf16.msra.mxu1 (!%p4606_p12), %v5241_v39  ;;  %v5647_v39 = vmov (!%p4606_p12), 1966171168  }
 0x4cc   : > { %3349 = vmatprep.subr.bf16.mxu1 (!%p4606_p12), %v5244_v47  ;;  %v5311_v47 = vld [vmem:[%s6957_s6 + $0x328] ss:$20 sps:$4 sm:$0xff] (!%p4606_p12)  }
 0x4cd   : > { %2129 = vmatpush1.bf16.msra.mxu0 %v1967_v44  ;;  %v5242_v44 = vld [vmem:[%s6957_s6 + $0x16c] ss:$20 sps:$4 sm:$0xff] (!%p4606_p12)  }
 0x4ce   : > { %2130 = vmatprep.subr.bf16.mxu0 %v1970_v46  ;;  %v2167_v46 = vlaneseq (!%p4606_p12) }
 0x4d1   : > { %2131 = vmatpush1.bf16.msra.mxu0 %v1969_v48  ;;  %v5246_v48 = vld [vmem:[%s6957_s6 + $0x168] ss:$20 sps:$4 sm:$0xff] (!%p4606_p12)  }
 0x4d2   : > { %2132 = vmatprep.subr.bf16.mxu0 %v1972_v12  ;;  %v5247_v12 = vld [vmem:[%s6957_s6 + $0x170] ss:$20 sps:$4 sm:$0xff] (!%p4606_p12)  }
 0x4d3   : > { %3350 = vmatpush1.bf16.msra.mxu1 (!%p4606_p12), %v5247_v12  ;;  %v5319_v12 = vld [vmem:[%s6957_s6 + $0x354] ss:$20 sps:$4 sm:$0xff] (!%p4606_p12)  }
 0x4d5   : > { %2133 = vmatpush1.bf16.msra.mxu0 %v1971_v25  ;;  %v6486_v25 = vshrl.u32 (!%p4606_p12), %v2167_v46, 7  ;;  %v5308_v46 = vld [vmem:[%s6957_s6 + $0x320] ss:$20 sps:$4 sm:$0xff] (!%p4606_p12)  }
 0x4d6   : > { %2134 = vmatprep.subr.bf16.mxu0 %v1974_v29  ;;  %v5250_v29 = vld [vmem:[%s6957_s6 + $0x19c] ss:$20 sps:$4 sm:$0xff] (!%p4606_p12)  }
 0x4d7   : > { %3351 = vmatprep.subr.bf16.mxu1 (!%p4606_p12), %v5250_v29  ;;  %v6536_v49 = vsub.s32 (!%p4606_p12), 0, %v6486_v25  ;;  %v5314_v29 = vld [vmem:[%s6957_s6 + $0x348] ss:$20 sps:$4 sm:$0xff] (!%p4606_p12)  }
 0x4d9   : > { %2135 = vmatpush1.bf16.msra.mxu0 %v1973_v51  ;;  %v5253_v51 = vld [vmem:[%s6957_s6 + $0x198] ss:$20 sps:$4 sm:$0xff] (!%p4606_p12)  }
 0x4da   : > { %2136 = vmatprep.subr.bf16.mxu0 %v1976_v40  ;;  %v5254_v40 = vld [vmem:[%s6957_s6 + $0x1bc] ss:$20 sps:$4 sm:$0xff] (!%p4606_p12)   ;;  %3352 = vmatpush1.bf16.msra.mxu1 (!%p4606_p12), %v5253_v51  ;;  %v5322_v51 = vld [vmem:[%s6957_s6 + $0x374] ss:$20 sps:$4 sm:$0xff] (!%p4606_p12)  }
 0x4db   : > { %3353 = vmatprep.subr.bf16.mxu1 (!%p4606_p12), %v5256_v58  ;;  %v5323_v58 = vld [vmem:[%s6957_s6 + $0x378] ss:$20 sps:$4 sm:$0xff] (!%p4606_p12)  }
 0x4dd   : > { %2137 = vmatpush1.bf16.msra.mxu0 %v1975_v43  ;;  %v2173_v43 = vsub.s32 (!%p4606_p12), 1, %v6486_v25 }
 0x4de   : > { %3245 = vmatprep.subr.bf16.mxu0 (!%p4606_p12), %v5188_v61  ;;  %v5270_v61 = vld [vmem:[%s6957_s6 + $0x208] ss:$20 sps:$4 sm:$0xff] (!%p4606_p12)  }
 0x4e0   : > { %2139 = vmatmul.mubr.bf16.vlgmr.msra.gmra.mrb[0].mxu0 %v1778_v62 }
 0x4e1   : > { %3246 = vmatpush1.bf16.msra.mxu0 (!%p4606_p12), %v5192_v26  ;;  %v5271_v26 = vld [vmem:[%s6957_s6 + $0x210] ss:$20 sps:$4 sm:$0xff] (!%p4606_p12)  }
 0x4e2   : > { %3247 = vmatprep.subr.bf16.mxu0 (!%p4606_p12), %v5194_v1  ;;  %v5274_v1 = vld [vmem:[%s6957_s6 + $0x23c] ss:$20 sps:$4 sm:$0xff] (!%p4606_p12)  }
 0x4e5   : > { %3248 = vmatpush1.bf16.msra.mxu0 (!%p4606_p12), %v5198_v7  ;;  %v5277_v7 = vld [vmem:[%s6957_s6 + $0x238] ss:$20 sps:$4 sm:$0xff] (!%p4606_p12)  }
 0x4e6   : > { %3249 = vmatprep.subr.bf16.mxu0 (!%p4606_p12), %v5200_v14  ;;  %v2170_v14 = vrot.slane (!%p4606_p12), %v2165_v37, %v6536_v49 }
 0x4e9   : > { %3250 = vmatpush1.bf16.msra.mxu0 (!%p4606_p12), %v5204_v18  ;;  %v5278_v18 = vld [vmem:[%s6957_s6 + $0x25c] ss:$20 sps:$4 sm:$0xff] (!%p4606_p12)  }
 0x4ea   : > { %3251 = vmatprep.subr.bf16.mxu0 (!%p4606_p12), %v5206_v22  ;;  %v5282_v22 = vld [vmem:[%s6957_s6 + $0x258] ss:$20 sps:$4 sm:$0xff] (!%p4606_p12)  }
 0x4ed   : > { %3252 = vmatpush1.bf16.msra.mxu0 (!%p4606_p12), %v5210_v24 }
 0x4ee   : > { %3253 = vmatprep.subr.bf16.mxu0 (!%p4606_p12), %v5212_v52  ;;  %v5286_v52 = vld [vmem:[%s6957_s6 + $0x284] ss:$20 sps:$4 sm:$0xff] (!%p4606_p12)  }
 0x4f1   : > { %3254 = vmatpush1.bf16.msra.mxu0 (!%p4606_p12), %v5216_v6  ;;  %v5284_v6 = vld [vmem:[%s6957_s6 + $0x280] ss:$20 sps:$4 sm:$0xff] (!%p4606_p12)  }
 0x4f2   : > { %3255 = vmatprep.subr.bf16.mxu0 (!%p4606_p12), %v5218_v45  ;;  %v5287_v45 = vld [vmem:[%s6957_s6 + $0x288] ss:$20 sps:$4 sm:$0xff] (!%p4606_p12)  }
 0x4f5   : > { %3256 = vmatpush1.bf16.msra.mxu0 (!%p4606_p12), %v5222_v8  ;;  %v5295_v8 = vld [vmem:[%s6957_s6 + $0x2b4] ss:$20 sps:$4 sm:$0xff] (!%p4606_p12)  }
 0x4f6   : > { %3257 = vmatprep.subr.bf16.mxu0 (!%p4606_p12), %v5224_v28  ;;  %v5293_v28 = vld [vmem:[%s6957_s6 + $0x2b0] ss:$20 sps:$4 sm:$0xff] (!%p4606_p12)  }
 0x4f9   : > { %3258 = vmatpush1.bf16.msra.mxu0 (!%p4606_p12), %v5228_v27  ;;  %v5301_v27 = vld [vmem:[%s6957_s6 + $0x2dc] ss:$20 sps:$4 sm:$0xff] (!%p4606_p12)  }
 0x4fa   : > { %3259 = vmatprep.subr.bf16.mxu0 (!%p4606_p12), %v5230_v33  ;;  %v5299_v33 = vld [vmem:[%s6957_s6 + $0x2d8] ss:$20 sps:$4 sm:$0xff] (!%p4606_p12)  }
 0x4fd   : > { %3260 = vmatpush1.bf16.msra.mxu0 (!%p4606_p12), %v5234_v35  ;;  %v5307_v35 = vld [vmem:[%s6957_s6 + $0x304] ss:$20 sps:$4 sm:$0xff] (!%p4606_p12)  }
 0x4fe   : > { %3261 = vmatprep.subr.bf16.mxu0 (!%p4606_p12), %v5236_v4  ;;  %v5305_v4 = vld [vmem:[%s6957_s6 + $0x300] ss:$20 sps:$4 sm:$0xff] (!%p4606_p12)  }
 0x501   : > { %3262 = vmatpush1.bf16.msra.mxu0 (!%p4606_p12), %v5240_v11  ;;  %v5313_v11 = vld [vmem:[%s6957_s6 + $0x32c] ss:$20 sps:$4 sm:$0xff] (!%p4606_p12)  }
 0x502   : > { %3263 = vmatprep.subr.bf16.mxu0 (!%p4606_p12), %v5242_v44  ;;  %v2194_v44 = vunpack.c.l.s4 (!%p4606_p12), %v5647_v39  ;;  %v5384_v39 = vld [vmem:[%s6957_s6 + $0x1a0] ss:$20 sps:$4 sm:$0xff] (!%p4606_p12)  }
 0x505   : > { %3264 = vmatpush1.bf16.msra.mxu0 (!%p4606_p12), %v5246_v48  ;;  %v5316_v48 = vld [vmem:[%s6957_s6 + $0x34c] ss:$20 sps:$4 sm:$0xff] (!%p4606_p12)  }
 0x506   : > { %3265 = vmatprep.subr.bf16.mxu0 (!%p4606_p12), %v5248_v50  ;;  %v2195_v50 = vunpack.c.0.s8 (!%p4606_p12), %v2194_v44  ;;  %v5385_v44 = vld [vmem:[%s6957_s6 + $0x60] ss:$20 sps:$4 sm:$0xff] (!%p4606_p12)  }
 0x509   : > { %3266 = vmatpush1.bf16.msra.mxu0 (!%p4606_p12), %v5252_v30  ;;  %v5317_v30 = vld [vmem:[%s6957_s6 + $0x350] ss:$20 sps:$4 sm:$0xff] (!%p4606_p12)  }
 0x50a   : > { %3267 = vmatprep.subr.bf16.mxu0 (!%p4606_p12), %v5254_v40  ;;  %v5325_v40 = vld [vmem:[%s6957_s6 + $0x37c] ss:$20 sps:$4 sm:$0xff] (!%p4606_p12)  }
 0x50d   : > { %3268 = vmatpush1.bf16.msra.mxu0 (!%p4606_p12), %v5258_v16  ;;  %v6655_v16 = vsub.s32 (!%p4606_p12), %v2195_v50, %v6486_v25  ;;  %v5331_v25 = vld [vmem:[%s6957_s6 + $0x3a4] ss:$20 sps:$4 sm:$0xff] (!%p4606_p12)  }
 0x50e   : > { %v5391_v50 = vld [vmem:[%s6957_s6 + $0xd8] ss:$20 sps:$4 sm:$0xff] (!%p4606_p12)  }
 0x5b3   : > { %v2140_v17 = vpop.f32.mrb[0].mxu0  ;;  %2160 = sbr.rel (%p4606_p12) target bundleno = 2373 (0x945), region = 80 }
 0x5b4   : > { %v4984_v54 = vadd.f32 %v4981_v60, %v2140_v17  ;;  %v2142_v19 = vpop.f32.mrb[1].mxu0  ;;  %v5260_v17 = vld [vmem:[%s6957_s6 + $0x1e4] ss:$20 sps:$4 sm:$0xff] (!%p4606_p12)  }
 0x5b5   : > { %v4990_v55 = vadd.f32 %v4987_v41, %v2142_v19  ;;  %v2144_v63 = vpop.f32.mrb[2].mxu0  ;;  %v5259_v41 = vld [vmem:[%s6957_s6 + $0x1c0] ss:$20 sps:$4 sm:$0xff] (!%p4606_p12)   ;;  %3269 = vmatprep.subr.bf16.mxu0 (!%p4606_p12), %v5260_v17 }
 0x5b6   : > { %2153 = vst [vmem:[#allocation2] sm:$0xff] %v4984_v54  ;;  %v4996_v31 = vadd.f32 %v4993_v42, %v2144_v63  ;;  %v2146_v57 = vpop.f32.mrb[3].mxu0  ;;  %v2174_v42 = vrot.slane (!%p4606_p12), %v2165_v37, %v2173_v43  ;;  %v5262_v54 = vld [vmem:[%s6957_s6 + $0x1ec] ss:$20 sps:$4 sm:$0xff] (!%p4606_p12)   ;;  %3354 = vmatpush1.bf16.msra.mxu1 (!%p4606_p12), %v5259_v41  ;;  %v5265_v63 = vld [vmem:[%s6957_s6 + $0x1e8] ss:$20 sps:$4 sm:$0xff] (!%p4606_p12)  }
 0x5b7   : > { %2154 = vst [vmem:[#allocation2 + $0x8] sm:$0xff] %v4990_v55  ;;  %v5002_v62 = vadd.f32 %v4999_v5, %v2146_v57  ;;  %v5264_v55 = vld [vmem:[%s6957_s6 + $0x1e0] ss:$20 sps:$4 sm:$0xff] (!%p4606_p12)   ;;  %3355 = vmatprep.subr.bf16.mxu1 (!%p4606_p12), %v5262_v54  ;;  %v5320_v43 = vld [vmem:[%s6957_s6 + $0x370] ss:$20 sps:$4 sm:$0xff] (!%p4606_p12)  }
 0x5b8   : > { %2155 = vst [vmem:[#allocation2 + $0x10] sm:$0xff] %v4996_v31  ;;  %v5266_v57 = vld [vmem:[%s6957_s6 + $0x20c] ss:$20 sps:$4 sm:$0xff] (!%p4606_p12)   ;;  %3270 = vmatpush1.bf16.msra.mxu0 (!%p4606_p12), %v5264_v55  ;;  %v5334_v54 = vld [vmem:[%s6957_s6 + $0x3c4] ss:$20 sps:$4 sm:$0xff] (!%p4606_p12)  }
 0x5b9   : > { %2156 = vst [vmem:[#allocation2 + $0x18] sm:$0xff] %v5002_v62  ;;  %v5268_v62 = vld [vmem:[%s6957_s6 + $0x214] ss:$20 sps:$4 sm:$0xff] (!%p4606_p12)   ;;  %3271 = vmatprep.subr.bf16.mxu0 (!%p4606_p12), %v5266_v57  ;;  %v5326_v41 = vld [vmem:[%s6957_s6 + $0x398] ss:$20 sps:$4 sm:$0xff] (!%p4606_p12)  }
 0x5ba   : > { %3356 = vmatpush1.bf16.msra.mxu1 %v5265_v63  ;;  %v5332_v55 = vld [vmem:[%s6957_s6 + $0x3c0] ss:$20 sps:$4 sm:$0xff]   ;;  %v5335_v57 = vld [vmem:[%s6957_s6 + $0x3c8] ss:$20 sps:$4 sm:$0xff]  }
 0x5bb   : > { %3357 = vmatprep.subr.bf16.mxu1 %v5268_v62  ;;  %v5340_v62 = vld [vmem:[%s6957_s6 + $0x3ec] ss:$20 sps:$4 sm:$0xff]  }
 0x5bc   : > { %3272 = vmatpush1.bf16.msra.mxu0 %v5270_v61  ;;  %v5343_v61 = vld [vmem:[%s6957_s6 + $0x3f4] ss:$20 sps:$4 sm:$0xff]  }
 0x5bd   : > { %v2161_v10 = vld [vmem:[#allocation2] sm:$0xff]  ;;  %3273 = vmatprep.subr.bf16.mxu0 %v5272_v53 }
 0x5be   : > { %v2162_v59 = vld [vmem:[#allocation2 + $0x8] sm:$0xff]  ;;  %3358 = vmatpush1.bf16.msra.mxu1 %v5271_v26  ;;  %v2177_v23 = vmul.f32 %v2170_v14, %v2161_v10  ;;  %v5341_v53 = vld [vmem:[%s6957_s6 + $0x3f0] ss:$20 sps:$4 sm:$0xff]  }
 0x5bf   : > { %v2178_v19 = vmul.f32 %v2174_v42, %v2162_v59  ;;  %v2163_v15 = vld [vmem:[#allocation2 + $0x10] sm:$0xff]  ;;  %3359 = vmatprep.subr.bf16.mxu1 %v5274_v1  ;;  %v6660_v59 = vld.sshfl [vmem:[%s6955_s4] sm:$0x11 pattern:$0x75316420] }
 0x5c0   : > { %v2164_v60 = vld [vmem:[#allocation2 + $0x18] sm:$0xff]  ;;  %v2179_v24 = vmul.f32 %v2170_v14, %v2163_v15  ;;  %3274 = vmatpush1.bf16.msra.mxu0 %v5276_v2  ;;  %v2192_v37 = vcombine.high %v6660_v59, %v6660_v59  ;;  %v5346_v1 = vld [vmem:[%s6957_s6 + $0x414] ss:$20 sps:$4 sm:$0xff]  }
 0x5c1   : > { %v2180_v5 = vmul.f32 %v2174_v42, %v2164_v60  ;;  %3275 = vmatprep.subr.bf16.mxu0 %v5278_v18  ;;  %v5328_v60 = vld [vmem:[%s6957_s6 + $0x39c] ss:$20 sps:$4 sm:$0xff]   ;;  %v5329_v42 = vld [vmem:[%s6957_s6 + $0x3a0] ss:$20 sps:$4 sm:$0xff]   ;;  %v5347_v10 = vld [vmem:[%s6957_s6 + $0x418] ss:$20 sps:$4 sm:$0xff]  }
 0x5c2   : > { %3360 = vmatpush1.bf16.msra.mxu1 %v5277_v7  ;;  %v6575_v13 = vpack.c.bf16 %v2179_v24, %v2177_v23  ;;  %v2206_v17 = vrot.slane %v2192_v37, %v6655_v16  ;;  %v5338_v26 = vld [vmem:[%s6957_s6 + $0x3e8] ss:$20 sps:$4 sm:$0xff]   ;;  %v5344_v7 = vld [vmem:[%s6957_s6 + $0x410] ss:$20 sps:$4 sm:$0xff]   ;;  %v5350_v18 = vld [vmem:[%s6957_s6 + $0x438] ss:$20 sps:$4 sm:$0xff]  }
 0x5c3   : > { %v6522_v31 = vpack.c.bf16 %v2180_v5, %v2178_v19  ;;  %3361 = vmatprep.subr.bf16.mxu1 %v5280_v20  ;;  %v5337_v5 = vld [vmem:[%s6957_s6 + $0x3cc] ss:$20 sps:$4 sm:$0xff]   ;;  %v5349_v2 = vld [vmem:[%s6957_s6 + $0x41c] ss:$20 sps:$4 sm:$0xff]   ;;  %v5355_v15 = vld [vmem:[%s6957_s6 + $0x444] ss:$20 sps:$4 sm:$0xff]  }
 0x5c4   : > { %3276 = vmatpush1.bf16.msra.mxu0 %v5282_v22  ;;  %v2215_v19 = vpack.i.b16 %v2206_v17, %v2206_v17  ;;  %v5352_v14 = vld [vmem:[%s6957_s6 + $0x43c] ss:$20 sps:$4 sm:$0xff]   ;;  %v5353_v20 = vld [vmem:[%s6957_s6 + $0x440] ss:$20 sps:$4 sm:$0xff]   ;;  %v5358_v22 = vld [vmem:[%s6957_s6 + $0x464] ss:$20 sps:$4 sm:$0xff]  }
 0x5c5   : > { %3277 = vmatprep.mubr.bf16.mxu0 %v6522_v31  ;;  %3363 = vmatprep.mubr.bf16.mxu1 %v6522_v31  ;;  %v5361_v23 = vld [vmem:[%s6957_s6 + $0x46c] ss:$20 sps:$4 sm:$0xff]   ;;  %v5405_v17 = vld [vmem:[%s6957_s6 + $0x330] ss:$20 sps:$4 sm:$0xff]  }
 0x5c6   : > { %3362 = vmatpush1.bf16.msra.mxu1 %v5283_v21  ;;  %3288 = vmatprep.subr.bf16.mxu0 %v5286_v52  ;;  %v6687_v63 = vrot.slane %v2215_v19, %v6536_v49  ;;  %v5356_v24 = vld [vmem:[%s6957_s6 + $0x460] ss:$20 sps:$4 sm:$0xff]   ;;  %v5359_v21 = vld [vmem:[%s6957_s6 + $0x468] ss:$20 sps:$4 sm:$0xff]  }
 0x5c7   : > { %3374 = vmatprep.subr.bf16.mxu1 %v5289_v0  ;;  %3278 = vmatmul.mubr.bf16.vlgmr.msra.gmra.mrb[0].mxu0 %v6575_v13  ;;  %v5364_v52 = vld [vmem:[%s6957_s6 + $0x48c] ss:$20 sps:$4 sm:$0xff]   ;;  %v5367_v0 = vld [vmem:[%s6957_s6 + $0x494] ss:$20 sps:$4 sm:$0xff]  }
 0x5c8   : > { %3289 = vmatpush1.bf16.msra.mxu0 %v5284_v6  ;;  %3320 = vmatprep.mubr.bf16.mxu0 %v6687_v63  ;;  %v5362_v6 = vld [vmem:[%s6957_s6 + $0x488] ss:$20 sps:$4 sm:$0xff]   ;;  %v5401_v37 = vld [vmem:[%s6957_s6 + $0x2e0] ss:$20 sps:$4 sm:$0xff]  }
 0x5c9   : > { %3364 = vmatmul.mubr.bf16.vlgmr.msra.gmra.mrb[0].mxu1 %v6575_v13  ;;  %3290 = vmatprep.subr.bf16.mxu0 %v5292_v3  ;;  %v5370_v3 = vld [vmem:[%s6957_s6 + $0x4b4] ss:$20 sps:$4 sm:$0xff]  }
 0x5ca   : > { %3375 = vmatpush1.bf16.msra.mxu1 %v5287_v45  ;;  %3406 = vmatprep.mubr.bf16.mxu1 %v6687_v63  ;;  %v5365_v45 = vld [vmem:[%s6957_s6 + $0x490] ss:$20 sps:$4 sm:$0xff]   ;;  %v5408_v19 = vld [vmem:[%s6957_s6 + $0x4c0] ss:$20 sps:$4 sm:$0xff]  }
 0x5cb   : > { %3376 = vmatprep.subr.bf16.mxu1 %v5295_v8  ;;  %v5373_v8 = vld [vmem:[%s6957_s6 + $0x4bc] ss:$20 sps:$4 sm:$0xff]  }
 0x5cc   : > { %3291 = vmatpush1.bf16.msra.mxu0 %v5290_v9  ;;  %v2199_v9 = vrot.slane %v6660_v59, %v6655_v16  ;;  %v5398_v16 = vld [vmem:[%s6957_s6 + $0x3f8] ss:$20 sps:$4 sm:$0xff]  }
 0x5cd   : > { %3292 = vmatprep.subr.bf16.mxu0 %v5298_v56  ;;  %v5371_v56 = vld [vmem:[%s6957_s6 + $0x4b8] ss:$20 sps:$4 sm:$0xff]  }
 0x5ce   : > { %3377 = vmatpush1.bf16.msra.mxu1 %v5293_v28  ;;  %v5368_v28 = vld [vmem:[%s6957_s6 + $0x4b0] ss:$20 sps:$4 sm:$0xff]   ;;  %v5399_v59 = vld [vmem:[%s6957_s6 + $0x2b8] ss:$20 sps:$4 sm:$0xff]  }
 0x5cf   : > { %3378 = vmatprep.subr.bf16.mxu1 %v5301_v27  ;;  %v5376_v27 = vld [vmem:[%s6957_s6 + $0x4dc] ss:$20 sps:$4 sm:$0xff]  }
 0x5d0   : > { %3293 = vmatpush1.bf16.msra.mxu0 %v5296_v32  ;;  %v5379_v32 = vld [vmem:[%s6957_s6 + $0x4e4] ss:$20 sps:$4 sm:$0xff]  }
 0x5d1   : > { %3294 = vmatprep.subr.bf16.mxu0 %v5304_v34  ;;  %v5374_v34 = vld [vmem:[%s6957_s6 + $0x4d8] ss:$20 sps:$4 sm:$0xff]  }
 0x5d2   : > { %3379 = vmatpush1.bf16.msra.mxu1 %v5299_v33  ;;  %v2208_v33 = vpack.i.b16 %v2199_v9, %v2199_v9 }
 0x5d3   : > { %3380 = vmatprep.subr.bf16.mxu1 %v5307_v35  ;;  %v5377_v35 = vld [vmem:[%s6957_s6 + $0x4e0] ss:$20 sps:$4 sm:$0xff]  }
 0x5d4   : > { %3295 = vmatpush1.bf16.msra.mxu0 %v5302_v36  ;;  %v5380_v36 = vld [vmem:[%s6957_s6 + $0x150] ss:$20 sps:$4 sm:$0xff]  }
 0x5d5   : > { %3296 = vmatprep.subr.bf16.mxu0 %v5310_v38  ;;  %v5381_v38 = vld [vmem:[%s6957_s6 + $0x10] ss:$20 sps:$4 sm:$0xff]  }
 0x5d6   : > { %3381 = vmatpush1.bf16.msra.mxu1 %v5305_v4  ;;  %v6784_v4 = vrot.slane %v2208_v33, %v6536_v49  ;;  %v5383_v49 = vld [vmem:[%s6957_s6 + $0x38] ss:$20 sps:$4 sm:$0xff]  }
 0x5d7   : > { %3382 = vmatprep.subr.bf16.mxu1 %v5313_v11  ;;  %v5382_v11 = vld [vmem:[%s6957_s6 + $0x178] ss:$20 sps:$4 sm:$0xff]  }
 0x5d8   : > { %3297 = vmatpush1.bf16.msra.mxu0 %v5308_v46  ;;  %v5386_v46 = vld [vmem:[%s6957_s6 + $0x1c8] ss:$20 sps:$4 sm:$0xff]  }
 0x5d9   : > { %3298 = vmatprep.subr.bf16.mxu0 %v5316_v48  ;;  %v5389_v48 = vld [vmem:[%s6957_s6 + $0xb0] ss:$20 sps:$4 sm:$0xff]  }
 0x5da   : > { %3383 = vmatpush1.bf16.msra.mxu1 %v5311_v47  ;;  %v5388_v47 = vld [vmem:[%s6957_s6 + $0x1f0] ss:$20 sps:$4 sm:$0xff]  }
 0x5db   : > { %3384 = vmatprep.subr.bf16.mxu1 %v5319_v12  ;;  %v5390_v12 = vld [vmem:[%s6957_s6 + $0x218] ss:$20 sps:$4 sm:$0xff]  }
 0x5dc   : > { %3299 = vmatpush1.bf16.msra.mxu0 %v5314_v29  ;;  %v5392_v29 = vld [vmem:[%s6957_s6 + $0x240] ss:$20 sps:$4 sm:$0xff]  }
 0x5dd   : > { %3300 = vmatprep.subr.bf16.mxu0 %v5322_v51  ;;  %v5394_v51 = vld [vmem:[%s6957_s6 + $0x268] ss:$20 sps:$4 sm:$0xff]  }
 0x5de   : > { %3385 = vmatpush1.bf16.msra.mxu1 %v5317_v30  ;;  %v5393_v30 = vld [vmem:[%s6957_s6 + $0x100] ss:$20 sps:$4 sm:$0xff]  }
 0x5df   : > { %3386 = vmatprep.subr.bf16.mxu1 %v5325_v40  ;;  %v5395_v40 = vld [vmem:[%s6957_s6 + $0x128] ss:$20 sps:$4 sm:$0xff]  }
 0x5e0   : > { %3301 = vmatpush1.bf16.msra.mxu0 %v5320_v43  ;;  %v5396_v43 = vld [vmem:[%s6957_s6 + $0x3d0] ss:$20 sps:$4 sm:$0xff]  }
 0x5e1   : > { %3302 = vmatprep.subr.bf16.mxu0 %v5328_v60  ;;  %v5400_v60 = vld [vmem:[%s6957_s6 + $0x420] ss:$20 sps:$4 sm:$0xff]  }
 0x5e2   : > { %3387 = vmatpush1.bf16.msra.mxu1 %v5323_v58  ;;  %v5397_v58 = vld [vmem:[%s6957_s6 + $0x290] ss:$20 sps:$4 sm:$0xff]  }
 0x5e3   : > { %3388 = vmatprep.subr.bf16.mxu1 %v5331_v25  ;;  %v5403_v25 = vld [vmem:[%s6957_s6 + $0x308] ss:$20 sps:$4 sm:$0xff]  }
 0x5e4   : > { %3303 = vmatpush1.bf16.msra.mxu0 %v5326_v41  ;;  %v5404_v41 = vld [vmem:[%s6957_s6 + $0x470] ss:$20 sps:$4 sm:$0xff]  }
 0x5e5   : > { %3304 = vmatprep.subr.bf16.mxu0 %v5334_v54  ;;  %v5407_v54 = vld [vmem:[%s6957_s6 + $0x358] ss:$20 sps:$4 sm:$0xff]  }
 0x5e6   : > { %3389 = vmatpush1.bf16.msra.mxu1 %v5329_v42  ;;  %v5406_v42 = vld [vmem:[%s6957_s6 + $0x498] ss:$20 sps:$4 sm:$0xff]  }
 0x5e7   : > { %3390 = vmatprep.subr.bf16.mxu1 %v5337_v5  ;;  %v5409_v5 = vld [vmem:[%s6957_s6 + $0x380] ss:$20 sps:$4 sm:$0xff]  }
 0x5e8   : > { %3305 = vmatpush1.bf16.msra.mxu0 %v5332_v55  ;;  %v5410_v55 = vld [vmem:[%s6957_s6 + $0x4e8] ss:$20 sps:$4 sm:$0xff]  }
 0x5e9   : > { %3306 = vmatprep.subr.bf16.mxu0 %v5340_v62 }
 0x5ea   : > { %3391 = vmatpush1.bf16.msra.mxu1 %v5335_v57  ;;  %v3502_v57 = vld [vmem:[#allocation9 + $0x10] sm:$0xff] }
 0x5eb   : > { %3392 = vmatprep.subr.bf16.mxu1 %v5343_v61 }
 0x5ec   : > { %3307 = vmatpush1.bf16.msra.mxu0 %v5338_v26 }
 0x5ed   : > { %3308 = vmatprep.subr.bf16.mxu0 %v5346_v1 }
 0x5ee   : > { %3393 = vmatpush1.bf16.msra.mxu1 %v5341_v53 }
 0x5ef   : > { %3394 = vmatprep.subr.bf16.mxu1 %v5349_v2 }
 0x5f0   : > { %3309 = vmatpush1.bf16.msra.mxu0 %v5344_v7 }
 0x5f1   : > { %3310 = vmatprep.subr.bf16.mxu0 %v5352_v14 }
 0x5f2   : > { %3395 = vmatpush1.bf16.msra.mxu1 %v5347_v10 }
 0x5f3   : > { %3396 = vmatprep.subr.bf16.mxu1 %v5355_v15 }
 0x5f4   : > { %3311 = vmatpush1.bf16.msra.mxu0 %v5350_v18 }
 0x5f5   : > { %3312 = vmatprep.subr.bf16.mxu0 %v5358_v22 }
 0x5f6   : > { %3397 = vmatpush1.bf16.msra.mxu1 %v5353_v20 }
 0x5f7   : > { %3398 = vmatprep.subr.bf16.mxu1 %v5361_v23 }
 0x5f8   : > { %3313 = vmatpush1.bf16.msra.mxu0 %v5356_v24 }
 0x5f9   : > { %3314 = vmatprep.subr.bf16.mxu0 %v5364_v52 }
 0x5fa   : > { %3399 = vmatpush1.bf16.msra.mxu1 %v5359_v21 }
 0x5fb   : > { %3400 = vmatprep.subr.bf16.mxu1 %v5367_v0 }
 0x5fc   : > { %3315 = vmatpush1.bf16.msra.mxu0 %v5362_v6 }
 0x5fd   : > { %3316 = vmatprep.subr.bf16.mxu0 %v5370_v3 }
 0x5fe   : > { %3401 = vmatpush1.bf16.msra.mxu1 %v5365_v45 }
 0x5ff   : > { %3402 = vmatprep.subr.bf16.mxu1 %v5373_v8 }
 0x600   : > { %3317 = vmatpush1.bf16.msra.mxu0 %v5368_v28 }
 0x601   : > { %3318 = vmatprep.subr.bf16.mxu0 %v5376_v27 }
 0x602   : > { %3403 = vmatpush1.bf16.msra.mxu1 %v5371_v56 }
 0x603   : > { %3404 = vmatprep.subr.bf16.mxu1 %v5379_v32 }
 0x604   : > { %3319 = vmatpush1.bf16.msra.mxu0 %v5374_v34 }
 0x606   : > { %3405 = vmatpush1.bf16.msra.mxu1 %v5377_v35 }
 0x607   : > { %4800 = vmatprep.subr.bf16.mxu1 %v5380_v36  ;;  %3321 = vmatmul.mubr.bf16.vlgmr.msra.gmra.mrb[0].mxu0 %v6784_v4 }
 0x608   : > { %4884 = vmatprep.mubr.msk.f32.mxu0 %vm461_vm0, %v3502_v57  ;;  %v4216_v57 = vld [vmem:[#allocation9 + $0x88] sm:$0xff] }
 0x609   : > { %3407 = vmatmul.mubr.bf16.vlgmr.msra.gmra.mrb[0].mxu1 %v6784_v4 }
 0x60a   : > { %4801 = vmatpush3.bf16.msra.mxu1 %v5381_v38  ;;  %3449 = vmatprep.mubr.bf16.mxu1 %v6522_v31  ;;  %v5387_v31 = vld [vmem:[%s6957_s6 + $0x88] ss:$20 sps:$4 sm:$0xff]  }
 0x60b   : > { %4802 = vmatprep.subr.bf16.mxu1 %v5382_v11 }
 0x60e   : > { %4803 = vmatpush3.bf16.msra.mxu1 %v5383_v49 }
 0x60f   : > { %4804 = vmatprep.subr.bf16.mxu1 %v5384_v39  ;;  %v3503_v39 = vld [vmem:[#allocation9 + $0x18] sm:$0xff] }
 0x612   : > { %4805 = vmatpush3.bf16.msra.mxu1 %v5385_v44  ;;  %v3499_v44 = vld [vmem:[#allocation9] sm:$0xff] }
 0x613   : > { %4806 = vmatprep.subr.bf16.mxu1 %v5386_v46 }
 0x616   : > { %4807 = vmatpush3.bf16.msra.mxu1 %v5387_v31 }
 0x617   : > { %4808 = vmatprep.subr.bf16.mxu1 %v5388_v47 }
 0x61a   : > { %4809 = vmatpush3.bf16.msra.mxu1 %v5389_v48  ;;  %v3500_v48 = vld [vmem:[#allocation9 + $0x8] sm:$0xff] }
 0x61b   : > { %4810 = vmatprep.subr.bf16.mxu1 %v5390_v12  ;;  %v3675_v12 = vld [vmem:[#allocation9 + $0x20] sm:$0xff] }
 0x61e   : > { %4811 = vmatpush3.bf16.msra.mxu1 %v5391_v50 }
 0x61f   : > { %4812 = vmatprep.subr.bf16.mxu1 %v5392_v29  ;;  %v3676_v29 = vld [vmem:[#allocation9 + $0x28] sm:$0xff] }
 0x622   : > { %4813 = vmatpush3.bf16.msra.mxu1 %v5393_v30  ;;  %v3761_v30 = vld [vmem:[#allocation9 + $0x30] sm:$0xff] }
 0x623   : > { %4814 = vmatprep.subr.bf16.mxu1 %v5394_v51 }
 0x626   : > { %4815 = vmatpush3.bf16.msra.mxu1 %v5395_v40 }
 0x627   : > { %4822 = vmatprep.subr.bf16.mxu1 %v5396_v43 }
 0x629   : > { %3450 = vmatmul.mubr.bf16.vlgmr.msra.gmra.mrb[4].mxu1 %v6575_v13  ;;  %v5402_v13 = vld [vmem:[%s6957_s6 + $0x448] ss:$20 sps:$4 sm:$0xff]  }
 0x62a   : > { %4823 = vmatpush3.bf16.msra.mxu1 %v5397_v58  ;;  %3490 = vmatprep.mubr.bf16.mxu1 %v6687_v63  ;;  %v5411_v63 = vld [vmem:[%s6957_s6 + $0x3a8] ss:$20 sps:$4 sm:$0xff]  }
 0x62b   : > { %4824 = vmatprep.subr.bf16.mxu1 %v5398_v16  ;;  %v3762_v58 = vld [vmem:[#allocation9 + $0x38] sm:$0xff]  ;;  %v3855_v16 = vld [vmem:[#allocation9 + $0x40] sm:$0xff] }
 0x62e   : > { %4825 = vmatpush3.bf16.msra.mxu1 %v5399_v59 }
 0x62f   : > { %4826 = vmatprep.subr.bf16.mxu1 %v5400_v60  ;;  %v3856_v60 = vld [vmem:[#allocation9 + $0x48] sm:$0xff] }
 0x632   : > { %4827 = vmatpush3.bf16.msra.mxu1 %v5401_v37  ;;  %v3941_v37 = vld [vmem:[#allocation9 + $0x50] sm:$0xff] }
 0x633   : > { %4828 = vmatprep.subr.bf16.mxu1 %v5402_v13 }
 0x636   : > { %4829 = vmatpush3.bf16.msra.mxu1 %v5403_v25 }
 0x637   : > { %4830 = vmatprep.subr.bf16.mxu1 %v5404_v41 }
 0x63a   : > { %4831 = vmatpush3.bf16.msra.mxu1 %v5405_v17  ;;  %v3942_v17 = vld [vmem:[#allocation9 + $0x58] sm:$0xff] }
 0x63b   : > { %4832 = vmatprep.subr.bf16.mxu1 %v5406_v42  ;;  %v4035_v42 = vld [vmem:[#allocation9 + $0x60] sm:$0xff] }
 0x63e   : > { %4833 = vmatpush3.bf16.msra.mxu1 %v5407_v54 }
 0x63f   : > { %4834 = vmatprep.subr.bf16.mxu1 %v5408_v19  ;;  %v4036_v19 = vld [vmem:[#allocation9 + $0x68] sm:$0xff] }
 0x642   : > { %4835 = vmatpush3.bf16.msra.mxu1 %v5409_v5  ;;  %v4121_v5 = vld [vmem:[#allocation9 + $0x70] sm:$0xff] }
 0x643   : > { %4836 = vmatprep.subr.bf16.mxu1 %v5410_v55  ;;  %v4122_v55 = vld [vmem:[#allocation9 + $0x78] sm:$0xff] }
 0x646   : > { %4837 = vmatpush3.bf16.msra.mxu1 %v5411_v63  ;;  %v4215_v63 = vld [vmem:[#allocation9 + $0x80] sm:$0xff] }
 0x649   : > { %3491 = vmatmul.mubr.bf16.vlgmr.msra.gmra.mrb[8].mxu1 %v6784_v4 }
 0x6da   : > { %v3322_v62 = vpop.f32.mrb[0].mxu0 }
 0x6db   : > { %v3324_v26 = vpop.f32.mrb[1].mxu0 }
 0x6dc   : > { %v3408_v61 = vpop.f32.mrb[0].mxu1  ;;  %v3326_v1 = vpop.f32.mrb[2].mxu0 }
 0x6dd   : > { %v3410_v53 = vpop.f32.mrb[1].mxu1  ;;  %v4947_v7 = vpack.c.bf16 %v3326_v1, %v3322_v62  ;;  %v3328_v14 = vpop.f32.mrb[3].mxu0  ;;  %v5168_v20 = vpack.i.bf16 %v3326_v1, %v3322_v62  ;;  %v4795_v62 = vld [vmem:[#allocation11] sm:$0xff]  }
 0x6de   : > { %v3412_v2 = vpop.f32.mrb[2].mxu1  ;;  %v5173_v22 = vpack.i.bf16 %v3328_v14, %v3324_v26  ;;  %v4951_v23 = vpack.c.bf16 %v3328_v14, %v3324_v26  ;;  %v4797_v26 = vunpack.c.h.bf16 %v4795_v62 }
 0x6df   : > { %v6886_v10 = vpack.c.bf16 %v3412_v2, %v3408_v61  ;;  %v3414_v15 = vpop.f32.mrb[3].mxu1  ;;  %v5178_v18 = vpack.i.bf16 %v3412_v2, %v3408_v61  ;;  %5169 = vrot.lane.b32.xlu0 %v5168_v20, %s5648_s3  ;;  %v4796_v2 = vunpack.c.l.bf16 %v4795_v62 }
 0x6e0   : > { %v5183_v24 = vpack.i.bf16 %v3414_v15, %v3410_v53  ;;  %v6888_v21 = vpack.c.bf16 %v3414_v15, %v3410_v53 }
 0x6e1   : > { %5179 = vrot.lane.b32.xlu1 %v5178_v18, %s5648_s3 }
 0x6e3   : > { %5174 = vrot.lane.b32.xlu0 %v5173_v22, %s5648_s3 }
 0x6e5   : > { %5184 = vrot.lane.b32.xlu1 %v5183_v24, %s5648_s3 }
 0x6fc   : > { %v4816_v52 = vpop.f32.mrb[4].mxu1 }
 0x6fd   : > { %v4817_v0 = vpop.f32.mrb[5].mxu1 }
 0x6fe   : > { %v4818_v6 = vadd.f32 %v4817_v0, %v4816_v52  ;;  %v4819_v45 = vpop.f32.mrb[6].mxu1 }
 0x6ff   : > { %v4820_v3 = vpop.f32.mrb[7].mxu1 }
 0x700   : > { %v4821_v8 = vadd.f32 %v4820_v3, %v4819_v45 }
 0x71c   : > { %v4838_v9 = vpop.f32.mrb[8].mxu1 }
 0x71d   : > { %v4839_v28 = vpop.f32.mrb[9].mxu1 }
 0x71e   : > { %v4840_v56 = vadd.f32 %v4839_v28, %v4838_v9  ;;  %v4841_v27 = vpop.f32.mrb[10].mxu1 }
 0x71f   : > { %v4842_v32 = vpop.f32.mrb[11].mxu1 }
 0x720   : > { %v3493_v33 = vadd.f32 %v4840_v56, %v4818_v6  ;;  %v4843_v34 = vadd.f32 %v4842_v32, %v4841_v27 }
 0x722   : > { %v3496_v35 = vadd.f32 %v4843_v34, %v4821_v8 }
 0x724   : > { %v6890_v36 = vpack.c.bf16 %v3496_v35, %v3493_v33 }
 0x751   : > { %v5170_v4 = vpop.permute.xlu0 %5169 }
 0x752   : > { %v5172_v38 = vunpack.i.h.bf16 %v5170_v4  ;;  %v5171_v11 = vunpack.i.l.bf16 %v5170_v4 }
 0x753   : > { %v5180_v51 = vpop.permute.xlu1 %5179 }
 0x754   : > { %v4943_v49 = vpack.c.bf16 %v5172_v38, %v5171_v11  ;;  %v5182_v40 = vunpack.i.h.bf16 %v5180_v51  ;;  %v5181_v43 = vunpack.i.l.bf16 %v5180_v51 }
 0x755   : > { %v5175_v46 = vpop.permute.xlu0 %5174 }
 0x756   : > { %4944 = vmatprep.subr.bf16.mxu0 %v4943_v49  ;;  %v5177_v31 = vunpack.i.h.bf16 %v5175_v46  ;;  %v5176_v47 = vunpack.i.l.bf16 %v5175_v46  ;;  %v4963_v59 = vpack.c.bf16 %v5182_v40, %v5181_v43 }
 0x757   : > { %4946 = vmatpush3.bf16.msra.mxu0 %v4943_v49  ;;  %v5185_v13 = vpop.permute.xlu1 %5184 }
 0x758   : > { %4948 = vmatprep.subr.bf16.mxu0 %v4947_v7  ;;  %v4955_v50 = vpack.c.bf16 %v5177_v31, %v5176_v47  ;;  %v5187_v25 = vunpack.i.h.bf16 %v5185_v13  ;;  %v5186_v41 = vunpack.i.l.bf16 %v5185_v13 }
 0x75a   : > { %4885 = vmatmul.mubr.msk.f32.vlgmr.msra.gmra.mrb[4].mxu0 %vm461_vm0, %v3503_v39  ;;  %v4971_v54 = vpack.c.bf16 %v5187_v25, %v5186_v41 }
 0x75b   : > { %4950 = vmatpush3.bf16.msra.mxu0 %v4947_v7  ;;  %4891 = vmatprep.mubr.msk.f32.mxu0 %vm461_vm0, %v3499_v44 }
 0x75c   : > { %4952 = vmatprep.subr.bf16.mxu0 %v4951_v23 }
 0x762   : > { %4892 = vmatmul.mubr.msk.f32.vlgmr.msra.gmra.mrb[4].mxu0 %vm461_vm0, %v3500_v48 }
 0x763   : > { %4954 = vmatpush3.bf16.msra.mxu0 %v4951_v23  ;;  %4898 = vmatprep.mubr.msk.f32.mxu0 %vm461_vm0, %v3675_v12 }
 0x764   : > { %4956 = vmatprep.subr.bf16.mxu0 %v4955_v50 }
 0x76a   : > { %4899 = vmatmul.mubr.msk.f32.vlgmr.msra.gmra.mrb[4].mxu0 %vm461_vm0, %v3676_v29 }
 0x76b   : > { %4958 = vmatpush3.bf16.msra.mxu0 %v4955_v50  ;;  %4905 = vmatprep.mubr.msk.f32.mxu0 %vm461_vm0, %v3761_v30 }
 0x76c   : > { %4960 = vmatprep.subr.bf16.mxu0 %v6886_v10 }
 0x772   : > { %4906 = vmatmul.mubr.msk.f32.vlgmr.msra.gmra.mrb[4].mxu0 %vm461_vm0, %v3762_v58 }
 0x773   : > { %4962 = vmatpush3.bf16.msra.mxu0 %v6886_v10  ;;  %4912 = vmatprep.mubr.msk.f32.mxu0 %vm461_vm0, %v3855_v16 }
 0x774   : > { %4964 = vmatprep.subr.bf16.mxu0 %v4963_v59 }
 0x77a   : > { %4913 = vmatmul.mubr.msk.f32.vlgmr.msra.gmra.mrb[4].mxu0 %vm461_vm0, %v3856_v60 }
 0x77b   : > { %4966 = vmatpush3.bf16.msra.mxu0 %v4963_v59  ;;  %4919 = vmatprep.mubr.msk.f32.mxu0 %vm461_vm0, %v3941_v37 }
 0x77c   : > { %4968 = vmatprep.subr.bf16.mxu0 %v6888_v21 }
 0x782   : > { %4920 = vmatmul.mubr.msk.f32.vlgmr.msra.gmra.mrb[4].mxu0 %vm461_vm0, %v3942_v17 }
 0x783   : > { %4970 = vmatpush3.bf16.msra.mxu0 %v6888_v21  ;;  %4926 = vmatprep.mubr.msk.f32.mxu0 %vm461_vm0, %v4035_v42 }
 0x784   : > { %4972 = vmatprep.subr.bf16.mxu0 %v4971_v54 }
 0x78a   : > { %4927 = vmatmul.mubr.msk.f32.vlgmr.msra.gmra.mrb[4].mxu0 %vm461_vm0, %v4036_v19 }
 0x78b   : > { %4974 = vmatpush3.bf16.msra.mxu0 %v4971_v54  ;;  %4933 = vmatprep.mubr.msk.f32.mxu0 %vm461_vm0, %v4121_v5 }
 0x78c   : > { %4976 = vmatprep.subr.bf16.mxu0 %v6890_v36 }
 0x792   : > { %4934 = vmatmul.mubr.msk.f32.vlgmr.msra.gmra.mrb[4].mxu0 %vm461_vm0, %v4122_v55 }
 0x793   : > { %4978 = vmatpush3.bf16.msra.mxu0 %v6890_v36  ;;  %4940 = vmatprep.mubr.msk.f32.mxu0 %vm461_vm0, %v4215_v63 }
 0x79a   : > { %4941 = vmatmul.mubr.msk.f32.vlgmr.msra.gmra.mrb[4].mxu0 %vm461_vm0, %v4216_v57 }
 0x86d   : > { %v4942_v61 = vpop.f32.mrb[4].mxu0 }
 0x86e   : > { %vm4301_vm1 = vcmp.ge.f32.partialorder %v4942_v61, 0.0  ;;  %v4303_v53 = vmul.f32 0.2, %v4942_v61  ;;  %v4289_v1 = vpop.f32.mrb[5].mxu0 }
 0x86f   : > { %vm4300_vm2 = vcmp.ge.f32.partialorder %v4289_v1, 0.0  ;;  %v4302_v7 = vmul.f32 0.2, %v4289_v1 }
 0x870   : > { %v4305_v10 = vsel %vm4301_vm1, %v4942_v61, %v4303_v53 }
 0x871   : > { %v4304_v14 = vsel %vm4300_vm2, %v4289_v1, %v4302_v7  ;;  %v4311_v15 = vmul.f32 %v4797_v26, %v4305_v10 }
 0x872   : > { %v4310_v18 = vmul.f32 %v4796_v2, %v4304_v14 }
 0x873   : > { %v4314_v20 = vsel %vm4312_vm3, %v4311_v15, 0.0 }
 0x874   : > { %v4313_v22 = vsel %vm4312_vm3, %v4310_v18, 0.0 }
 0x875   : > { %v4315_v23 = vadd.f32 %v4314_v20, %v4313_v22 }
 0x877   : > { %4316 = vadd.xlane.f32.xlu0 %v4315_v23 }
 0x904   : > { %v4317_v24 = vpop.xlane.xlu0 %4316 }
 0x905   : > { %v4318_v21 = vrot.slane %v4317_v24, 4 }
 0x907   : > { %v4319_v52 = vadd.f32 %v4318_v21, %v4317_v24 }
 0x909   : > { %v4320_v0 = vrot.slane %v4319_v52, 2 }
 0x90b   : > { %v4321_v6 = vadd.f32 %v4320_v0, %v4319_v52 }
 0x90d   : > { %v4322_v45 = vrot.slane %v4321_v6, 1 }
 0x90f   : > { %v4323_v3 = vadd.f32 %v4322_v45, %v4321_v6 }
 0x911   : > { %5071 = vpush %v4323_v3 }
 0x942   : > { %s5072_s26 = spop %5071 }
 0x943   : > { %v4325_v8 = vstv %s5072_s26 }
 0x944   : > { %4327 = vst.msk [vmem:[#allocation12] sm:$0x1] %vm4326_vm4, %v4325_v8 }
 0x945 PF: > { %p5117_p0 = scmp.eq.s32.totalorder %s5714_s9, 2  ;;  %s5649_s10 = smov [#allocation12]  }
 0x946   : > { %s4335_s11 = sshll.u32 %s5649_s10, 4  ;;  %s4336_s11 = int_to_ptr.vmem [resolvable:$true] %s4335_s11 }
 0x947   : > { %s5556_s15 = scalar_lea.vmem %s4336_s11, 16  ;;  %s5562_s13 = scalar_lea.vmem %s4336_s11, 32 }
 0x948   : > { %p5557_p2 = scmp.ne.s32.totalorder %s4336_s11, %s5556_s15  ;;  %p5563_p10 = scmp.lt.s32.totalorder %s4336_s11, %s4336_s11 }
 0x949   : > { %p5564_p9 = scmp.lt.s32.totalorder %s5562_s13, %s5556_s15 }
 0x94a   : > { %p5558_p13 = pnand %p5557_p2, %p5117_p0 }
 0x94b   : > { %p5565_p6 = por %p5564_p9, %p5563_p10 }
 0x94c   : > { %p5559_p3 = pneg %p5558_p13 }
 0x94e   : > { %p5566_p7 = pnand %p5565_p6, %p5559_p3 }
 0x950   : > { %5569 = shalt.err (!%p5566_p7)
}
 0x951   : > { %s5570_s1 = scalar_lea.hbm %s6959_s8, 16 }
 0x952   : > { %p5571_p5 = scmp.ne.s32.totalorder %s6959_s8, %s5570_s1  ;;  %p5576_p4 = scmp.lt.u32.totalorder %s5570_s1, %s6959_s8 }
 0x954   : > { %p5572_p11 = pnand %p5571_p5, %p5117_p0 }
 0x956   : > { %p5573_p1 = pneg %p5572_p11 }
 0x958   : > { %p5578_p8 = pnand %p5576_p4, %p5573_p1 }
 0x95a   : > { %5581 = shalt.err (!%p5578_p8)
}
 0x95b   : > { %5090 = dma.vmem_to_hbm [thread:$0]  (%p5117_p0), %s4336_s11, 16, %s6959_s8, [#allocation5]  }
 0x95c   : > { %5615 = dma.done.wait (%p5117_p0), [#allocation5], 16  }
 0x95d   : > { %5617 = vsyncadd (%p5117_p0), [#allocation5], 4294967280 }
 0x95e PF: > { %p23_p12 = scmp.ge.s32.totalorder %s5813_s12, 5   ;;  %s6984_s27 = smov %s5624_s28 }
 0x95f   : > { %s6985_s28 = smov %s5628_s29  ;;  %s6986_s29 = smov %s5823_s19 }
 0x960   : > { %s6987_s30 = smov %s5813_s12  ;;  %25 = sbr.rel (!%p23_p12) target bundleno = 11 (0xb), region = 134 }
 0x967   :  { %4348 = vsyncpa [#allocation4], 1 }
 0x968   :  { %4350 = vsyncpa [#allocation4 + $0x1], 1 }
 0x969   :  { %4351 = vsyncpa [#allocation7], 1 }
 0x96a   :  { %4353 = vsyncpa [#allocation7 + $0x1], 1 }
 0x96b   :  { %4354 = vsyncpa [#allocation10], 1 }
 0x96c   :  { %4355 = vsyncpa [#allocation5], 1 }
 0x96d   :  { %4357 = vsyncpa [#allocation5 + $0x1], 1 }

</bundles_post_ra>
